<compile_context>
chip_gen: v7x
topology: tpu7x:2x2x1
jax: 0.10.0
libtpu: 0.0.40
codegen_flags: <defaults>
</compile_context>

<pallas_src>
import functools

import jax
import jax.numpy as jnp
from jax.experimental import pallas as pl
from jax.experimental.pallas import tpu as pltpu

# ----------------------------- static geometry ------------------------------
H1, W1 = 28, 28
KH = KW = 5
OH1, OW1 = H1 - KH + 1, W1 - KW + 1          # 24, 24
L1 = OH1 * W1                                # 672 "wide conv" length (junk cols ow>=24)
LM1 = L1 - W1 - 1                            # 643
PH1, PW1 = OH1 // 2, OW1 // 2                # 12, 12
P1_COLS = PH1 * PW1 + KW - 1                 # 148 = 144 real cols + 4 zero tail cols

H2, W2 = PH1, PW1                            # 12, 12
OH2, OW2 = H2 - KH + 1, W2 - KW + 1          # 8, 8
L2 = OH2 * W2                                # 96
LM2 = L2 - W2 - 1                            # 83
PH2, PW2 = OH2 // 2, OW2 // 2                # 4, 4

C1, C2 = 20, 50
NTAP = KH * KW                               # 25
K2 = NTAP * C1                               # 500 (merged conv2 contraction depth)
FEAT = C2 * PH2 * PW2                        # 800
NCLASS = 10
NCLASS_PAD = 128
N1_PAD = 512
XPAD = H1 * W1 + KW - 1                      # 788 (wide-conv slab width)

VMEM_LIMIT = 32 * 1024 * 1024


# ---------------------------------------------------------------------------
# Kernels
# ---------------------------------------------------------------------------
def _conv_stage_kernel(x_ref, w1_ref, b1_ref, s1_ref, w2_ref, b2_ref, s2_ref,
                       o_ref,
                       xpad_ref, t1_ref, o1_ref, p1_ref, t2_ref, *, tb):
    """Fused conv1+relu+pool + conv2+relu+pool for a block of `tb` samples.

    x_ref : (tb, 1, 784) f32      input block
    w1    : (20, 25)  bf16        conv1 taps,   w1[co, kh*5+kw]
    b1    : (20, 1)   f32
    s1    : (643,148) bf16        one-hot pool/stride-2 selection (4 zero tail cols)
    w2    : (50, 500) bf16        conv2 merged, w2[co, (kh*5+kw)*20 + ci]
    b2    : (50, 1)   f32
    s2    : (83, 16)  bf16
    o_ref : (tb, 50, 16) bf16     pooled conv2 output (torch channel-major flatten)
    """
    # Stage input rows into a 788-wide slab (4 zero tail cols keep every wide-conv
    # tap slice in bounds; the junk positions are never selected by s1/s2).
    xpad_ref[:, :H1 * W1] = x_ref[...].reshape(tb, H1 * W1)
    xpad_ref[:, H1 * W1:] = jnp.zeros((tb, KW - 1), jnp.float32)

    for t in range(tb):
        # ---- conv1: 25 lane-shifted copies -> one (20,25)@(25,672) MXU matmul ----
        for kh in range(KH):
            for kw in range(KW):
                tap = kh * KW + kw
                off = kh * W1 + kw
                t1_ref[tap:tap + 1, :] = xpad_ref[t:t + 1, off:off + L1]
        o1_ref[...] = jnp.dot(w1_ref[...], t1_ref[...].astype(jnp.bfloat16),
                              preferred_element_type=jnp.float32) + b1_ref[...]

        # 2x2/2 max-pool (+ReLU): max of 4 shifted ref slices, stride-2 gather as a
        # one-hot bf16 selection matmul (relu(pool(x)) == pool(relu(x))).
        m4 = jnp.maximum(
            jnp.maximum(o1_ref[:, 0:LM1], o1_ref[:, 1:1 + LM1]),
            jnp.maximum(o1_ref[:, W1:W1 + LM1], o1_ref[:, W1 + 1:W1 + 1 + LM1]))
        pooled1 = jnp.dot(m4.astype(jnp.bfloat16), s1_ref[...],
                          preferred_element_type=jnp.float32)
        p1_ref[...] = jnp.maximum(pooled1, 0.0)               # (20, 148), tail cols == 0

        # ---- conv2: stack 25 taps over channels -> one K=500 MXU matmul ----
        for kh in range(KH):
            for kw in range(KW):
                tap = kh * KW + kw
                off = kh * W2 + kw
                t2_ref[tap * C1:(tap + 1) * C1, :] = p1_ref[:, off:off + L2]
        o2 = jnp.dot(w2_ref[...], t2_ref[...].astype(jnp.bfloat16),
                     preferred_element_type=jnp.float32) + b2_ref[...]   # (50, 96)

        m4b = jnp.maximum(jnp.maximum(o2[:, 0:LM2], o2[:, 1:1 + LM2]),
                          jnp.maximum(o2[:, W2:W2 + LM2], o2[:, W2 + 1:W2 + 1 + LM2]))
        pooled2 = jnp.dot(m4b.astype(jnp.bfloat16), s2_ref[...],
                          preferred_element_type=jnp.float32)            # (50, 16)
        o_ref[t] = jnp.maximum(pooled2, 0.0).astype(o_ref.dtype)


def _mlp_head_kernel(x_ref, w1_ref, b1_ref, w2_ref, b2_ref, o_ref):
    """fc1 + ReLU + fc2 (lane-padded to 128) + log_softmax, fused and batched."""
    h = jnp.dot(x_ref[...], w1_ref[...],
                preferred_element_type=jnp.float32) + b1_ref[...]        # (TB, 512)
    h = jnp.maximum(h, 0.0).astype(jnp.bfloat16)
    logits = jnp.dot(h, w2_ref[...],
                     preferred_element_type=jnp.float32) + b2_ref[...]   # (TB, 128)
    # Padded class lanes carry bias -1e30 -> exp underflows to 0, so the softmax over
    # 128 lanes equals the softmax over the 10 real classes (exact in f32).
    s = logits - jnp.max(logits, axis=1, keepdims=True)
    out = s - jnp.log(jnp.sum(jnp.exp(s), axis=1, keepdims=True))
    o_ref[...] = out[:, :NCLASS]


# ---------------------------------------------------------------------------
# pallas_call wrappers
# ---------------------------------------------------------------------------
def conv_stage(x, fp, *, tb_default=8):
    """x: (B, 1, 28, 28) f32 -> (B, 50, 16) bf16 pooled conv2 activations."""
    B = x.shape[0]
    x3 = x.reshape(B, 1, H1 * W1)                       # free reshape
    tb = max(1, min(tb_default, B // 2)) if B > 1 else 1
    grid = (pl.cdiv(B, tb),)

    flops = 2 * B * (C1 * NTAP * L1 + C1 * LM1 * P1_COLS
                     + C2 * K2 * L2 + C2 * LM2 * PH2 * PW2)
    bytes_accessed = (B * H1 * W1 * 4 + B * C2 * PH2 * PW2 * 2
                      + fp["c1_w"].size * 2 + fp["c1_S"].size * 2
                      + fp["c2_w"].size * 2 + fp["c2_S"].size * 2
                      + (C1 + C2) * 4)

    kernel = functools.partial(_conv_stage_kernel, tb=tb)
    return pl.pallas_call(
        kernel,
        out_shape=jax.ShapeDtypeStruct((B, C2, PH2 * PW2), jnp.bfloat16),
        grid=grid,
        in_specs=[
            pl.BlockSpec((tb, 1, H1 * W1), lambda i: (i, 0, 0)),
            pl.BlockSpec((C1, NTAP), lambda i: (0, 0)),
            pl.BlockSpec((C1, 1), lambda i: (0, 0)),
            pl.BlockSpec((LM1, P1_COLS), lambda i: (0, 0)),
            pl.BlockSpec((C2, K2), lambda i: (0, 0)),
            pl.BlockSpec((C2, 1), lambda i: (0, 0)),
            pl.BlockSpec((LM2, PH2 * PW2), lambda i: (0, 0)),
        ],
        out_specs=pl.BlockSpec((tb, C2, PH2 * PW2), lambda i: (i, 0, 0)),
        scratch_shapes=[
            pltpu.VMEM((tb, XPAD), jnp.float32),     # padded input rows
            pltpu.VMEM((NTAP, L1), jnp.float32),     # conv1 tap slab (25, 672)
            pltpu.VMEM((C1, L1), jnp.float32),       # conv1 pre-pool activations
            pltpu.VMEM((C1, P1_COLS), jnp.float32),  # pooled conv1 (+4 zero tail cols)
            pltpu.VMEM((K2, L2), jnp.float32),       # conv2 merged-K tap slab (500, 96)
        ],
        compiler_params=pltpu.CompilerParams(
            dimension_semantics=("parallel",),
            vmem_limit_bytes=VMEM_LIMIT),
        cost_estimate=pl.CostEstimate(flops=flops, transcendentals=0,
                                      bytes_accessed=bytes_accessed),
    )(x3, fp["c1_w"], fp["c1_b"], fp["c1_S"], fp["c2_w"], fp["c2_b"], fp["c2_S"])


def mlp_head(feat, fp):
    """feat: (B, 800) bf16 -> (B, 10) f32 log-probabilities."""
    B = feat.shape[0]
    tb = min(256, B)
    grid = (pl.cdiv(B, tb),)
    flops = 2 * B * (FEAT * N1_PAD + N1_PAD * NCLASS_PAD)
    bytes_accessed = (B * FEAT * 2 + FEAT * N1_PAD * 2 + N1_PAD * NCLASS_PAD * 2
                      + N1_PAD * 4 + NCLASS_PAD * 4 + B * NCLASS * 4)
    return pl.pallas_call(
        _mlp_head_kernel,
        out_shape=jax.ShapeDtypeStruct((B, NCLASS), jnp.float32),
        grid=grid,
        in_specs=[
            pl.BlockSpec((tb, FEAT), lambda i: (i, 0)),
            pl.BlockSpec((FEAT, N1_PAD), lambda i: (0, 0)),
            pl.BlockSpec((1, N1_PAD), lambda i: (0, 0)),
            pl.BlockSpec((N1_PAD, NCLASS_PAD), lambda i: (0, 0)),
            pl.BlockSpec((1, NCLASS_PAD), lambda i: (0, 0)),
        ],
        out_specs=pl.BlockSpec((tb, NCLASS), lambda i: (i, 0)),
        compiler_params=pltpu.CompilerParams(
            dimension_semantics=("parallel",),
            vmem_limit_bytes=VMEM_LIMIT),
        cost_estimate=pl.CostEstimate(flops=flops, transcendentals=B * NCLASS_PAD,
                                      bytes_accessed=bytes_accessed),
    )(feat, fp["fc1_w"], fp["fc1_b"], fp["fc2_w"], fp["fc2_b"])


# ---------------------------------------------------------------------------
# Parameters (PyTorch-style init) + one-time layout preparation
# ---------------------------------------------------------------------------
def init_params(key):
    ks = jax.random.split(key, 8)

    def uniform(k, shape, fan_in):
        bound = 1.0 / (fan_in ** 0.5)
        return jax.random.uniform(k, shape, jnp.float32, -bound, bound)

    return {
        "conv1_w": uniform(ks[0], (20, 1, 5, 5), 1 * 5 * 5),
        "conv1_b": uniform(ks[1], (20,), 1 * 5 * 5),
        "conv2_w": uniform(ks[2], (50, 20, 5, 5), 20 * 5 * 5),
        "conv2_b": uniform(ks[3], (50,), 20 * 5 * 5),
        "fc1_w": uniform(ks[4], (500, 800), 800),
        "fc1_b": uniform(ks[5], (500,), 800),
        "fc2_w": uniform(ks[6], (10, 500), 500),
        "fc2_b": uniform(ks[7], (10,), 500),
    }


def _pool_select_matrix(OH, OW, W, out_cols):
    """One-hot bf16 S such that (m4 @ S)[:, ph*PW+pw] = m4[:, 2*ph*W + 2*pw]."""
    PH, PW = OH // 2, OW // 2
    Lm = OH * W - W - 1
    src = ((2 * jnp.arange(PH) * W)[:, None] + 2 * jnp.arange(PW)[None, :]).reshape(-1)
    cols = jnp.arange(PH * PW)
    return jnp.zeros((Lm, out_cols), jnp.bfloat16).at[src, cols].set(1.0)


def prepare_params(p):
    """Hoist all weight-layout transforms out of the forward pass (done once)."""
    c1_w = p["conv1_w"].reshape(C1, NTAP).astype(jnp.bfloat16)        # [co, kh*5+kw]
    c2_w = (p["conv2_w"].transpose(0, 2, 3, 1)                        # [co, kh, kw, ci]
            .reshape(C2, K2).astype(jnp.bfloat16))                    # [co, tap*20+ci]
    fc1_w = (jnp.zeros((FEAT, N1_PAD), jnp.bfloat16)
             .at[:, :500].set(p["fc1_w"].T.astype(jnp.bfloat16)))
    fc1_b = jnp.zeros((1, N1_PAD), jnp.float32).at[0, :500].set(p["fc1_b"])
    fc2_w = (jnp.zeros((N1_PAD, NCLASS_PAD), jnp.bfloat16)
             .at[:500, :NCLASS].set(p["fc2_w"].T.astype(jnp.bfloat16)))
    fc2_b = (jnp.full((1, NCLASS_PAD), -1e30, jnp.float32)
             .at[0, :NCLASS].set(p["fc2_b"]))
    return {
        "c1_w": c1_w, "c1_b": p["conv1_b"].reshape(C1, 1),
        "c1_S": _pool_select_matrix(OH1, OW1, W1, P1_COLS),
        "c2_w": c2_w, "c2_b": p["conv2_b"].reshape(C2, 1),
        "c2_S": _pool_select_matrix(OH2, OW2, W2, PH2 * PW2),
        "fc1_w": fc1_w, "fc1_b": fc1_b, "fc2_w": fc2_w, "fc2_b": fc2_b,
    }


# ---------------------------------------------------------------------------
# Forward
# ---------------------------------------------------------------------------
@jax.jit
def net_forward(fp, x):
    # x: (B, 1, 28, 28) f32
    B = x.shape[0]
    feat = conv_stage(x, fp)                         # (B, 50, 16) bf16
    feat = feat.reshape(B, FEAT)                     # free reshape == torch .view order
    return mlp_head(feat, fp)                        # (B, 10) f32 log-probs


# ---------------------------------------------------------------------------
# Pure-JAX reference (for correctness check only)
# ---------------------------------------------------------------------------
def _reference_forward(p, x):
    dn1 = jax.lax.conv_dimension_numbers(x.shape, p["conv1_w"].shape,
                                         ("NCHW", "OIHW", "NCHW"))
    y = jax.lax.conv_general_dilated(x, p["conv1_w"], (1, 1), "VALID",
                                     dimension_numbers=dn1)
    y = jax.nn.relu(y + p["conv1_b"][None, :, None, None])
    y = jax.lax.reduce_window(y, -jnp.inf, jax.lax.max, (1, 1, 2, 2), (1, 1, 2, 2), "VALID")
    dn2 = jax.lax.conv_dimension_numbers(y.shape, p["conv2_w"].shape,
                                         ("NCHW", "OIHW", "NCHW"))
    y = jax.lax.conv_general_dilated(y, p["conv2_w"], (1, 1), "VALID",
                                     dimension_numbers=dn2)
    y = jax.nn.relu(y + p["conv2_b"][None, :, None, None])
    y = jax.lax.reduce_window(y, -jnp.inf, jax.lax.max, (1, 1, 2, 2), (1, 1, 2, 2), "VALID")
    y = y.reshape(x.shape[0], 4 * 4 * 50)
    y = jax.nn.relu(y @ p["fc1_w"].T + p["fc1_b"])
    y = y @ p["fc2_w"].T + p["fc2_b"]
    return jax.nn.log_softmax(y, axis=1)


if __name__ == "__main__":
    key = jax.random.PRNGKey(0)
    pkey, xkey = jax.random.split(key)
    params = init_params(pkey)
    fwd_params = prepare_params(params)   # hoisted once, reused every forward step

    x = jax.random.normal(xkey, (2, 1, 28, 28), jnp.float32)

    out = jax.block_until_ready(net_forward(fwd_params, x))

    assert out.shape == (2, NCLASS), out.shape
    # log_softmax rows must normalize
    assert jnp.allclose(jnp.sum(jnp.exp(out), axis=1), 1.0, atol=1e-4)
    # match the pure-JAX f32 reference (bf16 MXU inputs -> loose tolerance)
    ref = _reference_forward(params, x)
    assert jnp.allclose(out, ref, atol=5e-2), float(jnp.max(jnp.abs(out - ref)))
    print("KERNEL_OK")
</pallas_src>

<mosaic_0001>
module attributes {stable_mosaic.version = 11 : i64} {
  func.func @_conv_stage_kernel(%arg0: i32, %arg1: memref<1x1x784xf32, #tpu.memory_space<vmem>>, %arg2: memref<20x25xbf16, #tpu.memory_space<vmem>>, %arg3: memref<20x1xf32, #tpu.memory_space<vmem>>, %arg4: memref<643x148xbf16, #tpu.memory_space<vmem>>, %arg5: memref<50x500xbf16, #tpu.memory_space<vmem>>, %arg6: memref<50x1xf32, #tpu.memory_space<vmem>>, %arg7: memref<83x16xbf16, #tpu.memory_space<vmem>>, %arg8: memref<1x50x16xbf16, #tpu.memory_space<vmem>>, %arg9: memref<1x788xf32, #tpu.memory_space<vmem>>, %arg10: memref<25x672xf32, #tpu.memory_space<vmem>>, %arg11: memref<20x672xf32, #tpu.memory_space<vmem>>, %arg12: memref<20x148xf32, #tpu.memory_space<vmem>>, %arg13: memref<500x96xf32, #tpu.memory_space<vmem>>) attributes {dimension_semantics = [#tpu.dimension_semantics<parallel>], iteration_bounds = array<i64: 2>, scalar_prefetch = 0 : i64, scratch_operands = 5 : i64, tpu.core_type = #tpu.core_type<tc>, window_params = [{transform_indices = @transform_0, window_bounds = array<i64: 1, 1, 784>}, {pipeline_mode = #tpu.pipeline_mode<synchronous>, transform_indices = @transform_1, window_bounds = array<i64: 20, 25>}, {pipeline_mode = #tpu.pipeline_mode<synchronous>, transform_indices = @transform_2, window_bounds = array<i64: 20, 1>}, {pipeline_mode = #tpu.pipeline_mode<synchronous>, transform_indices = @transform_3, window_bounds = array<i64: 643, 148>}, {pipeline_mode = #tpu.pipeline_mode<synchronous>, transform_indices = @transform_4, window_bounds = array<i64: 50, 500>}, {pipeline_mode = #tpu.pipeline_mode<synchronous>, transform_indices = @transform_5, window_bounds = array<i64: 50, 1>}, {pipeline_mode = #tpu.pipeline_mode<synchronous>, transform_indices = @transform_6, window_bounds = array<i64: 83, 16>}, {transform_indices = @transform_7, window_bounds = array<i64: 1, 50, 16>}]} {
    %c0 = arith.constant 0 : index
    %c0_0 = arith.constant 0 : index
    %c0_1 = arith.constant 0 : index
    %0 = vector.load %arg1[%c0, %c0_0, %c0_1] : memref<1x1x784xf32, #tpu.memory_space<vmem>>, vector<1x1x784xf32>
    %1 = vector.shape_cast %0 : vector<1x1x784xf32> to vector<1x784xf32>
    %c0_2 = arith.constant 0 : index
    %c0_3 = arith.constant 0 : index
    %2 = vector.load %arg9[%c0_2, %c0_3] : memref<1x788xf32, #tpu.memory_space<vmem>>, vector<1x784xf32>
    tpu.vector_store %arg9[%c0_2, %c0_3], %1 {strides = array<i32>} : memref<1x788xf32, #tpu.memory_space<vmem>>, vector<1x784xf32>,
    %cst = arith.constant 0.000000e+00 : f32
    %3 = vector.broadcast %cst : f32 to vector<1x4xf32>
    %c0_4 = arith.constant 0 : index
    %c784 = arith.constant 784 : index
    %4 = vector.load %arg9[%c0_4, %c784] : memref<1x788xf32, #tpu.memory_space<vmem>>, vector<1x4xf32>
    tpu.vector_store %arg9[%c0_4, %c784], %3 {strides = array<i32>} : memref<1x788xf32, #tpu.memory_space<vmem>>, vector<1x4xf32>,
    %c0_5 = arith.constant 0 : index
    %c0_6 = arith.constant 0 : index
    %5 = vector.load %arg9[%c0_5, %c0_6] : memref<1x788xf32, #tpu.memory_space<vmem>>, vector<1x672xf32>
    %c0_7 = arith.constant 0 : index
    %c0_8 = arith.constant 0 : index
    %6 = vector.load %arg10[%c0_7, %c0_8] : memref<25x672xf32, #tpu.memory_space<vmem>>, vector<1x672xf32>
    tpu.vector_store %arg10[%c0_7, %c0_8], %5 {strides = array<i32>} : memref<25x672xf32, #tpu.memory_space<vmem>>, vector<1x672xf32>,
    %c0_9 = arith.constant 0 : index
    %c1 = arith.constant 1 : index
    %7 = vector.load %arg9[%c0_9, %c1] : memref<1x788xf32, #tpu.memory_space<vmem>>, vector<1x672xf32>
    %c1_10 = arith.constant 1 : index
    %c0_11 = arith.constant 0 : index
    %8 = vector.load %arg10[%c1_10, %c0_11] : memref<25x672xf32, #tpu.memory_space<vmem>>, vector<1x672xf32>
    tpu.vector_store %arg10[%c1_10, %c0_11], %7 {strides = array<i32>} : memref<25x672xf32, #tpu.memory_space<vmem>>, vector<1x672xf32>,
    %c0_12 = arith.constant 0 : index
    %c2 = arith.constant 2 : index
    %9 = vector.load %arg9[%c0_12, %c2] : memref<1x788xf32, #tpu.memory_space<vmem>>, vector<1x672xf32>
    %c2_13 = arith.constant 2 : index
    %c0_14 = arith.constant 0 : index
    %10 = vector.load %arg10[%c2_13, %c0_14] : memref<25x672xf32, #tpu.memory_space<vmem>>, vector<1x672xf32>
    tpu.vector_store %arg10[%c2_13, %c0_14], %9 {strides = array<i32>} : memref<25x672xf32, #tpu.memory_space<vmem>>, vector<1x672xf32>,
    %c0_15 = arith.constant 0 : index
    %c3 = arith.constant 3 : index
    %11 = vector.load %arg9[%c0_15, %c3] : memref<1x788xf32, #tpu.memory_space<vmem>>, vector<1x672xf32>
    %c3_16 = arith.constant 3 : index
    %c0_17 = arith.constant 0 : index
    %12 = vector.load %arg10[%c3_16, %c0_17] : memref<25x672xf32, #tpu.memory_space<vmem>>, vector<1x672xf32>
    tpu.vector_store %arg10[%c3_16, %c0_17], %11 {strides = array<i32>} : memref<25x672xf32, #tpu.memory_space<vmem>>, vector<1x672xf32>,
    %c0_18 = arith.constant 0 : index
    %c4 = arith.constant 4 : index
    %13 = vector.load %arg9[%c0_18, %c4] : memref<1x788xf32, #tpu.memory_space<vmem>>, vector<1x672xf32>
    %c4_19 = arith.constant 4 : index
    %c0_20 = arith.constant 0 : index
    %14 = vector.load %arg10[%c4_19, %c0_20] : memref<25x672xf32, #tpu.memory_space<vmem>>, vector<1x672xf32>
    tpu.vector_store %arg10[%c4_19, %c0_20], %13 {strides = array<i32>} : memref<25x672xf32, #tpu.memory_space<vmem>>, vector<1x672xf32>,
    %c0_21 = arith.constant 0 : index
    %c28 = arith.constant 28 : index
    %15 = vector.load %arg9[%c0_21, %c28] : memref<1x788xf32, #tpu.memory_space<vmem>>, vector<1x672xf32>
    %c5 = arith.constant 5 : index
    %c0_22 = arith.constant 0 : index
    %16 = vector.load %arg10[%c5, %c0_22] : memref<25x672xf32, #tpu.memory_space<vmem>>, vector<1x672xf32>
    tpu.vector_store %arg10[%c5, %c0_22], %15 {strides = array<i32>} : memref<25x672xf32, #tpu.memory_space<vmem>>, vector<1x672xf32>,
    %c0_23 = arith.constant 0 : index
    %c29 = arith.constant 29 : index
    %17 = vector.load %arg9[%c0_23, %c29] : memref<1x788xf32, #tpu.memory_space<vmem>>, vector<1x672xf32>
    %c6 = arith.constant 6 : index
    %c0_24 = arith.constant 0 : index
    %18 = vector.load %arg10[%c6, %c0_24] : memref<25x672xf32, #tpu.memory_space<vmem>>, vector<1x672xf32>
    tpu.vector_store %arg10[%c6, %c0_24], %17 {strides = array<i32>} : memref<25x672xf32, #tpu.memory_space<vmem>>, vector<1x672xf32>,
    %c0_25 = arith.constant 0 : index
    %c30 = arith.constant 30 : index
    %19 = vector.load %arg9[%c0_25, %c30] : memref<1x788xf32, #tpu.memory_space<vmem>>, vector<1x672xf32>
    %c7 = arith.constant 7 : index
    %c0_26 = arith.constant 0 : index
    %20 = vector.load %arg10[%c7, %c0_26] : memref<25x672xf32, #tpu.memory_space<vmem>>, vector<1x672xf32>
    tpu.vector_store %arg10[%c7, %c0_26], %19 {strides = array<i32>} : memref<25x672xf32, #tpu.memory_space<vmem>>, vector<1x672xf32>,
    %c0_27 = arith.constant 0 : index
    %c31 = arith.constant 31 : index
    %21 = vector.load %arg9[%c0_27, %c31] : memref<1x788xf32, #tpu.memory_space<vmem>>, vector<1x672xf32>
    %c8 = arith.constant 8 : index
    %c0_28 = arith.constant 0 : index
    %22 = vector.load %arg10[%c8, %c0_28] : memref<25x672xf32, #tpu.memory_space<vmem>>, vector<1x672xf32>
    tpu.vector_store %arg10[%c8, %c0_28], %21 {strides = array<i32>} : memref<25x672xf32, #tpu.memory_space<vmem>>, vector<1x672xf32>,
    %c0_29 = arith.constant 0 : index
    %c32 = arith.constant 32 : index
    %23 = vector.load %arg9[%c0_29, %c32] : memref<1x788xf32, #tpu.memory_space<vmem>>, vector<1x672xf32>
    %c9 = arith.constant 9 : index
    %c0_30 = arith.constant 0 : index
    %24 = vector.load %arg10[%c9, %c0_30] : memref<25x672xf32, #tpu.memory_space<vmem>>, vector<1x672xf32>
    tpu.vector_store %arg10[%c9, %c0_30], %23 {strides = array<i32>} : memref<25x672xf32, #tpu.memory_space<vmem>>, vector<1x672xf32>,
    %c0_31 = arith.constant 0 : index
    %c56 = arith.constant 56 : index
    %25 = vector.load %arg9[%c0_31, %c56] : memref<1x788xf32, #tpu.memory_space<vmem>>, vector<1x672xf32>
    %c10 = arith.constant 10 : index
    %c0_32 = arith.constant 0 : index
    %26 = vector.load %arg10[%c10, %c0_32] : memref<25x672xf32, #tpu.memory_space<vmem>>, vector<1x672xf32>
    tpu.vector_store %arg10[%c10, %c0_32], %25 {strides = array<i32>} : memref<25x672xf32, #tpu.memory_space<vmem>>, vector<1x672xf32>,
    %c0_33 = arith.constant 0 : index
    %c57 = arith.constant 57 : index
    %27 = vector.load %arg9[%c0_33, %c57] : memref<1x788xf32, #tpu.memory_space<vmem>>, vector<1x672xf32>
    %c11 = arith.constant 11 : index
    %c0_34 = arith.constant 0 : index
    %28 = vector.load %arg10[%c11, %c0_34] : memref<25x672xf32, #tpu.memory_space<vmem>>, vector<1x672xf32>
    tpu.vector_store %arg10[%c11, %c0_34], %27 {strides = array<i32>} : memref<25x672xf32, #tpu.memory_space<vmem>>, vector<1x672xf32>,
    %c0_35 = arith.constant 0 : index
    %c58 = arith.constant 58 : index
    %29 = vector.load %arg9[%c0_35, %c58] : memref<1x788xf32, #tpu.memory_space<vmem>>, vector<1x672xf32>
    %c12 = arith.constant 12 : index
    %c0_36 = arith.constant 0 : index
    %30 = vector.load %arg10[%c12, %c0_36] : memref<25x672xf32, #tpu.memory_space<vmem>>, vector<1x672xf32>
    tpu.vector_store %arg10[%c12, %c0_36], %29 {strides = array<i32>} : memref<25x672xf32, #tpu.memory_space<vmem>>, vector<1x672xf32>,
    %c0_37 = arith.constant 0 : index
    %c59 = arith.constant 59 : index
    %31 = vector.load %arg9[%c0_37, %c59] : memref<1x788xf32, #tpu.memory_space<vmem>>, vector<1x672xf32>
    %c13 = arith.constant 13 : index
    %c0_38 = arith.constant 0 : index
    %32 = vector.load %arg10[%c13, %c0_38] : memref<25x672xf32, #tpu.memory_space<vmem>>, vector<1x672xf32>
    tpu.vector_store %arg10[%c13, %c0_38], %31 {strides = array<i32>} : memref<25x672xf32, #tpu.memory_space<vmem>>, vector<1x672xf32>,
    %c0_39 = arith.constant 0 : index
    %c60 = arith.constant 60 : index
    %33 = vector.load %arg9[%c0_39, %c60] : memref<1x788xf32, #tpu.memory_space<vmem>>, vector<1x672xf32>
    %c14 = arith.constant 14 : index
    %c0_40 = arith.constant 0 : index
    %34 = vector.load %arg10[%c14, %c0_40] : memref<25x672xf32, #tpu.memory_space<vmem>>, vector<1x672xf32>
    tpu.vector_store %arg10[%c14, %c0_40], %33 {strides = array<i32>} : memref<25x672xf32, #tpu.memory_space<vmem>>, vector<1x672xf32>,
    %c0_41 = arith.constant 0 : index
    %c84 = arith.constant 84 : index
    %35 = vector.load %arg9[%c0_41, %c84] : memref<1x788xf32, #tpu.memory_space<vmem>>, vector<1x672xf32>
    %c15 = arith.constant 15 : index
    %c0_42 = arith.constant 0 : index
    %36 = vector.load %arg10[%c15, %c0_42] : memref<25x672xf32, #tpu.memory_space<vmem>>, vector<1x672xf32>
    tpu.vector_store %arg10[%c15, %c0_42], %35 {strides = array<i32>} : memref<25x672xf32, #tpu.memory_space<vmem>>, vector<1x672xf32>,
    %c0_43 = arith.constant 0 : index
    %c85 = arith.constant 85 : index
    %37 = vector.load %arg9[%c0_43, %c85] : memref<1x788xf32, #tpu.memory_space<vmem>>, vector<1x672xf32>
    %c16 = arith.constant 16 : index
    %c0_44 = arith.constant 0 : index
    %38 = vector.load %arg10[%c16, %c0_44] : memref<25x672xf32, #tpu.memory_space<vmem>>, vector<1x672xf32>
    tpu.vector_store %arg10[%c16, %c0_44], %37 {strides = array<i32>} : memref<25x672xf32, #tpu.memory_space<vmem>>, vector<1x672xf32>,
    %c0_45 = arith.constant 0 : index
    %c86 = arith.constant 86 : index
    %39 = vector.load %arg9[%c0_45, %c86] : memref<1x788xf32, #tpu.memory_space<vmem>>, vector<1x672xf32>
    %c17 = arith.constant 17 : index
    %c0_46 = arith.constant 0 : index
    %40 = vector.load %arg10[%c17, %c0_46] : memref<25x672xf32, #tpu.memory_space<vmem>>, vector<1x672xf32>
    tpu.vector_store %arg10[%c17, %c0_46], %39 {strides = array<i32>} : memref<25x672xf32, #tpu.memory_space<vmem>>, vector<1x672xf32>,
    %c0_47 = arith.constant 0 : index
    %c87 = arith.constant 87 : index
    %41 = vector.load %arg9[%c0_47, %c87] : memref<1x788xf32, #tpu.memory_space<vmem>>, vector<1x672xf32>
    %c18 = arith.constant 18 : index
    %c0_48 = arith.constant 0 : index
    %42 = vector.load %arg10[%c18, %c0_48] : memref<25x672xf32, #tpu.memory_space<vmem>>, vector<1x672xf32>
    tpu.vector_store %arg10[%c18, %c0_48], %41 {strides = array<i32>} : memref<25x672xf32, #tpu.memory_space<vmem>>, vector<1x672xf32>,
    %c0_49 = arith.constant 0 : index
    %c88 = arith.constant 88 : index
    %43 = vector.load %arg9[%c0_49, %c88] : memref<1x788xf32, #tpu.memory_space<vmem>>, vector<1x672xf32>
    %c19 = arith.constant 19 : index
    %c0_50 = arith.constant 0 : index
    %44 = vector.load %arg10[%c19, %c0_50] : memref<25x672xf32, #tpu.memory_space<vmem>>, vector<1x672xf32>
    tpu.vector_store %arg10[%c19, %c0_50], %43 {strides = array<i32>} : memref<25x672xf32, #tpu.memory_space<vmem>>, vector<1x672xf32>,
    %c0_51 = arith.constant 0 : index
    %c112 = arith.constant 112 : index
    %45 = vector.load %arg9[%c0_51, %c112] : memref<1x788xf32, #tpu.memory_space<vmem>>, vector<1x672xf32>
    %c20 = arith.constant 20 : index
    %c0_52 = arith.constant 0 : index
    %46 = vector.load %arg10[%c20, %c0_52] : memref<25x672xf32, #tpu.memory_space<vmem>>, vector<1x672xf32>
    tpu.vector_store %arg10[%c20, %c0_52], %45 {strides = array<i32>} : memref<25x672xf32, #tpu.memory_space<vmem>>, vector<1x672xf32>,
    %c0_53 = arith.constant 0 : index
    %c113 = arith.constant 113 : index
    %47 = vector.load %arg9[%c0_53, %c113] : memref<1x788xf32, #tpu.memory_space<vmem>>, vector<1x672xf32>
    %c21 = arith.constant 21 : index
    %c0_54 = arith.constant 0 : index
    %48 = vector.load %arg10[%c21, %c0_54] : memref<25x672xf32, #tpu.memory_space<vmem>>, vector<1x672xf32>
    tpu.vector_store %arg10[%c21, %c0_54], %47 {strides = array<i32>} : memref<25x672xf32, #tpu.memory_space<vmem>>, vector<1x672xf32>,
    %c0_55 = arith.constant 0 : index
    %c114 = arith.constant 114 : index
    %49 = vector.load %arg9[%c0_55, %c114] : memref<1x788xf32, #tpu.memory_space<vmem>>, vector<1x672xf32>
    %c22 = arith.constant 22 : index
    %c0_56 = arith.constant 0 : index
    %50 = vector.load %arg10[%c22, %c0_56] : memref<25x672xf32, #tpu.memory_space<vmem>>, vector<1x672xf32>
    tpu.vector_store %arg10[%c22, %c0_56], %49 {strides = array<i32>} : memref<25x672xf32, #tpu.memory_space<vmem>>, vector<1x672xf32>,
    %c0_57 = arith.constant 0 : index
    %c115 = arith.constant 115 : index
    %51 = vector.load %arg9[%c0_57, %c115] : memref<1x788xf32, #tpu.memory_space<vmem>>, vector<1x672xf32>
    %c23 = arith.constant 23 : index
    %c0_58 = arith.constant 0 : index
    %52 = vector.load %arg10[%c23, %c0_58] : memref<25x672xf32, #tpu.memory_space<vmem>>, vector<1x672xf32>
    tpu.vector_store %arg10[%c23, %c0_58], %51 {strides = array<i32>} : memref<25x672xf32, #tpu.memory_space<vmem>>, vector<1x672xf32>,
    %c0_59 = arith.constant 0 : index
    %c116 = arith.constant 116 : index
    %53 = vector.load %arg9[%c0_59, %c116] : memref<1x788xf32, #tpu.memory_space<vmem>>, vector<1x672xf32>
    %c24 = arith.constant 24 : index
    %c0_60 = arith.constant 0 : index
    %54 = vector.load %arg10[%c24, %c0_60] : memref<25x672xf32, #tpu.memory_space<vmem>>, vector<1x672xf32>
    tpu.vector_store %arg10[%c24, %c0_60], %53 {strides = array<i32>} : memref<25x672xf32, #tpu.memory_space<vmem>>, vector<1x672xf32>,
    %c0_61 = arith.constant 0 : index
    %c0_62 = arith.constant 0 : index
    %55 = vector.load %arg2[%c0_61, %c0_62] : memref<20x25xbf16, #tpu.memory_space<vmem>>, vector<20x25xbf16>
    %c0_63 = arith.constant 0 : index
    %c0_64 = arith.constant 0 : index
    %56 = vector.load %arg10[%c0_63, %c0_64] : memref<25x672xf32, #tpu.memory_space<vmem>>, vector<25x672xf32>
    %57 = arith.truncf %56 : vector<25x672xf32> to vector<25x672xbf16>
    %cst_65 = arith.constant dense<0.000000e+00> : vector<20x672xf32>
    %58 = tpu.matmul %55, %57, %cst_65 {dimension_numbers = #tpu.dot_dimension_numbers<[1], [0], [0], [1], [0, 0, 1, 1], [], []>} : vector<20x25xbf16>, vector<25x672xbf16>, vector<20x672xf32> -> vector<20x672xf32>
    %c0_66 = arith.constant 0 : index
    %c0_67 = arith.constant 0 : index
    %59 = vector.load %arg3[%c0_66, %c0_67] : memref<20x1xf32, #tpu.memory_space<vmem>>, vector<20x1xf32>
    %60 = vector.broadcast %59 : vector<20x1xf32> to vector<20x672xf32>
    %61 = arith.addf %58, %60 : vector<20x672xf32>
    %c0_68 = arith.constant 0 : index
    %c0_69 = arith.constant 0 : index
    %62 = vector.load %arg11[%c0_68, %c0_69] : memref<20x672xf32, #tpu.memory_space<vmem>>, vector<20x672xf32>
    tpu.vector_store %arg11[%c0_68, %c0_69], %61 {strides = array<i32>} : memref<20x672xf32, #tpu.memory_space<vmem>>, vector<20x672xf32>,
    %c0_70 = arith.constant 0 : index
    %c0_71 = arith.constant 0 : index
    %63 = vector.load %arg11[%c0_70, %c0_71] : memref<20x672xf32, #tpu.memory_space<vmem>>, vector<20x643xf32>
    %c0_72 = arith.constant 0 : index
    %c1_73 = arith.constant 1 : index
    %64 = vector.load %arg11[%c0_72, %c1_73] : memref<20x672xf32, #tpu.memory_space<vmem>>, vector<20x643xf32>
    %65 = arith.maximumf %63, %64 : vector<20x643xf32>
    %c0_74 = arith.constant 0 : index
    %c28_75 = arith.constant 28 : index
    %66 = vector.load %arg11[%c0_74, %c28_75] : memref<20x672xf32, #tpu.memory_space<vmem>>, vector<20x643xf32>
    %c0_76 = arith.constant 0 : index
    %c29_77 = arith.constant 29 : index
    %67 = vector.load %arg11[%c0_76, %c29_77] : memref<20x672xf32, #tpu.memory_space<vmem>>, vector<20x643xf32>
    %68 = arith.maximumf %66, %67 : vector<20x643xf32>
    %69 = arith.maximumf %65, %68 : vector<20x643xf32>
    %70 = arith.truncf %69 : vector<20x643xf32> to vector<20x643xbf16>
    %c0_78 = arith.constant 0 : index
    %c0_79 = arith.constant 0 : index
    %71 = vector.load %arg4[%c0_78, %c0_79] : memref<643x148xbf16, #tpu.memory_space<vmem>>, vector<643x148xbf16>
    %cst_80 = arith.constant dense<0.000000e+00> : vector<20x148xf32>
    %72 = tpu.matmul %70, %71, %cst_80 {dimension_numbers = #tpu.dot_dimension_numbers<[1], [0], [0], [1], [0, 0, 1, 1], [], []>} : vector<20x643xbf16>, vector<643x148xbf16>, vector<20x148xf32> -> vector<20x148xf32>
    %cst_81 = arith.constant 0.000000e+00 : f32
    %73 = vector.broadcast %cst_81 : f32 to vector<20x148xf32>
    %74 = arith.maximumf %72, %73 : vector<20x148xf32>
    %c0_82 = arith.constant 0 : index
    %c0_83 = arith.constant 0 : index
    %75 = vector.load %arg12[%c0_82, %c0_83] : memref<20x148xf32, #tpu.memory_space<vmem>>, vector<20x148xf32>
    tpu.vector_store %arg12[%c0_82, %c0_83], %74 {strides = array<i32>} : memref<20x148xf32, #tpu.memory_space<vmem>>, vector<20x148xf32>,
    %c0_84 = arith.constant 0 : index
    %c0_85 = arith.constant 0 : index
    %76 = vector.load %arg12[%c0_84, %c0_85] : memref<20x148xf32, #tpu.memory_space<vmem>>, vector<20x96xf32>
    %c0_86 = arith.constant 0 : index
    %c0_87 = arith.constant 0 : index
    %77 = vector.load %arg13[%c0_86, %c0_87] : memref<500x96xf32, #tpu.memory_space<vmem>>, vector<20x96xf32>
    tpu.vector_store %arg13[%c0_86, %c0_87], %76 {strides = array<i32>} : memref<500x96xf32, #tpu.memory_space<vmem>>, vector<20x96xf32>,
    %c0_88 = arith.constant 0 : index
    %c1_89 = arith.constant 1 : index
    %78 = vector.load %arg12[%c0_88, %c1_89] : memref<20x148xf32, #tpu.memory_space<vmem>>, vector<20x96xf32>
    %c20_90 = arith.constant 20 : index
    %c0_91 = arith.constant 0 : index
    %79 = vector.load %arg13[%c20_90, %c0_91] : memref<500x96xf32, #tpu.memory_space<vmem>>, vector<20x96xf32>
    tpu.vector_store %arg13[%c20_90, %c0_91], %78 {strides = array<i32>} : memref<500x96xf32, #tpu.memory_space<vmem>>, vector<20x96xf32>,
    %c0_92 = arith.constant 0 : index
    %c2_93 = arith.constant 2 : index
    %80 = vector.load %arg12[%c0_92, %c2_93] : memref<20x148xf32, #tpu.memory_space<vmem>>, vector<20x96xf32>
    %c40 = arith.constant 40 : index
    %c0_94 = arith.constant 0 : index
    %81 = vector.load %arg13[%c40, %c0_94] : memref<500x96xf32, #tpu.memory_space<vmem>>, vector<20x96xf32>
    tpu.vector_store %arg13[%c40, %c0_94], %80 {strides = array<i32>} : memref<500x96xf32, #tpu.memory_space<vmem>>, vector<20x96xf32>,
    %c0_95 = arith.constant 0 : index
    %c3_96 = arith.constant 3 : index
    %82 = vector.load %arg12[%c0_95, %c3_96] : memref<20x148xf32, #tpu.memory_space<vmem>>, vector<20x96xf32>
    %c60_97 = arith.constant 60 : index
    %c0_98 = arith.constant 0 : index
    %83 = vector.load %arg13[%c60_97, %c0_98] : memref<500x96xf32, #tpu.memory_space<vmem>>, vector<20x96xf32>
    tpu.vector_store %arg13[%c60_97, %c0_98], %82 {strides = array<i32>} : memref<500x96xf32, #tpu.memory_space<vmem>>, vector<20x96xf32>,
    %c0_99 = arith.constant 0 : index
    %c4_100 = arith.constant 4 : index
    %84 = vector.load %arg12[%c0_99, %c4_100] : memref<20x148xf32, #tpu.memory_space<vmem>>, vector<20x96xf32>
    %c80 = arith.constant 80 : index
    %c0_101 = arith.constant 0 : index
    %85 = vector.load %arg13[%c80, %c0_101] : memref<500x96xf32, #tpu.memory_space<vmem>>, vector<20x96xf32>
    tpu.vector_store %arg13[%c80, %c0_101], %84 {strides = array<i32>} : memref<500x96xf32, #tpu.memory_space<vmem>>, vector<20x96xf32>,
    %c0_102 = arith.constant 0 : index
    %c12_103 = arith.constant 12 : index
    %86 = vector.load %arg12[%c0_102, %c12_103] : memref<20x148xf32, #tpu.memory_space<vmem>>, vector<20x96xf32>
    %c100 = arith.constant 100 : index
    %c0_104 = arith.constant 0 : index
    %87 = vector.load %arg13[%c100, %c0_104] : memref<500x96xf32, #tpu.memory_space<vmem>>, vector<20x96xf32>
    tpu.vector_store %arg13[%c100, %c0_104], %86 {strides = array<i32>} : memref<500x96xf32, #tpu.memory_space<vmem>>, vector<20x96xf32>,
    %c0_105 = arith.constant 0 : index
    %c13_106 = arith.constant 13 : index
    %88 = vector.load %arg12[%c0_105, %c13_106] : memref<20x148xf32, #tpu.memory_space<vmem>>, vector<20x96xf32>
    %c120 = arith.constant 120 : index
    %c0_107 = arith.constant 0 : index
    %89 = vector.load %arg13[%c120, %c0_107] : memref<500x96xf32, #tpu.memory_space<vmem>>, vector<20x96xf32>
    tpu.vector_store %arg13[%c120, %c0_107], %88 {strides = array<i32>} : memref<500x96xf32, #tpu.memory_space<vmem>>, vector<20x96xf32>,
    %c0_108 = arith.constant 0 : index
    %c14_109 = arith.constant 14 : index
    %90 = vector.load %arg12[%c0_108, %c14_109] : memref<20x148xf32, #tpu.memory_space<vmem>>, vector<20x96xf32>
    %c140 = arith.constant 140 : index
    %c0_110 = arith.constant 0 : index
    %91 = vector.load %arg13[%c140, %c0_110] : memref<500x96xf32, #tpu.memory_space<vmem>>, vector<20x96xf32>
    tpu.vector_store %arg13[%c140, %c0_110], %90 {strides = array<i32>} : memref<500x96xf32, #tpu.memory_space<vmem>>, vector<20x96xf32>,
    %c0_111 = arith.constant 0 : index
    %c15_112 = arith.constant 15 : index
    %92 = vector.load %arg12[%c0_111, %c15_112] : memref<20x148xf32, #tpu.memory_space<vmem>>, vector<20x96xf32>
    %c160 = arith.constant 160 : index
    %c0_113 = arith.constant 0 : index
    %93 = vector.load %arg13[%c160, %c0_113] : memref<500x96xf32, #tpu.memory_space<vmem>>, vector<20x96xf32>
    tpu.vector_store %arg13[%c160, %c0_113], %92 {strides = array<i32>} : memref<500x96xf32, #tpu.memory_space<vmem>>, vector<20x96xf32>,
    %c0_114 = arith.constant 0 : index
    %c16_115 = arith.constant 16 : index
    %94 = vector.load %arg12[%c0_114, %c16_115] : memref<20x148xf32, #tpu.memory_space<vmem>>, vector<20x96xf32>
    %c180 = arith.constant 180 : index
    %c0_116 = arith.constant 0 : index
    %95 = vector.load %arg13[%c180, %c0_116] : memref<500x96xf32, #tpu.memory_space<vmem>>, vector<20x96xf32>
    tpu.vector_store %arg13[%c180, %c0_116], %94 {strides = array<i32>} : memref<500x96xf32, #tpu.memory_space<vmem>>, vector<20x96xf32>,
    %c0_117 = arith.constant 0 : index
    %c24_118 = arith.constant 24 : index
    %96 = vector.load %arg12[%c0_117, %c24_118] : memref<20x148xf32, #tpu.memory_space<vmem>>, vector<20x96xf32>
    %c200 = arith.constant 200 : index
    %c0_119 = arith.constant 0 : index
    %97 = vector.load %arg13[%c200, %c0_119] : memref<500x96xf32, #tpu.memory_space<vmem>>, vector<20x96xf32>
    tpu.vector_store %arg13[%c200, %c0_119], %96 {strides = array<i32>} : memref<500x96xf32, #tpu.memory_space<vmem>>, vector<20x96xf32>,
    %c0_120 = arith.constant 0 : index
    %c25 = arith.constant 25 : index
    %98 = vector.load %arg12[%c0_120, %c25] : memref<20x148xf32, #tpu.memory_space<vmem>>, vector<20x96xf32>
    %c220 = arith.constant 220 : index
    %c0_121 = arith.constant 0 : index
    %99 = vector.load %arg13[%c220, %c0_121] : memref<500x96xf32, #tpu.memory_space<vmem>>, vector<20x96xf32>
    tpu.vector_store %arg13[%c220, %c0_121], %98 {strides = array<i32>} : memref<500x96xf32, #tpu.memory_space<vmem>>, vector<20x96xf32>,
    %c0_122 = arith.constant 0 : index
    %c26 = arith.constant 26 : index
    %100 = vector.load %arg12[%c0_122, %c26] : memref<20x148xf32, #tpu.memory_space<vmem>>, vector<20x96xf32>
    %c240 = arith.constant 240 : index
    %c0_123 = arith.constant 0 : index
    %101 = vector.load %arg13[%c240, %c0_123] : memref<500x96xf32, #tpu.memory_space<vmem>>, vector<20x96xf32>
    tpu.vector_store %arg13[%c240, %c0_123], %100 {strides = array<i32>} : memref<500x96xf32, #tpu.memory_space<vmem>>, vector<20x96xf32>,
    %c0_124 = arith.constant 0 : index
    %c27 = arith.constant 27 : index
    %102 = vector.load %arg12[%c0_124, %c27] : memref<20x148xf32, #tpu.memory_space<vmem>>, vector<20x96xf32>
    %c260 = arith.constant 260 : index
    %c0_125 = arith.constant 0 : index
    %103 = vector.load %arg13[%c260, %c0_125] : memref<500x96xf32, #tpu.memory_space<vmem>>, vector<20x96xf32>
    tpu.vector_store %arg13[%c260, %c0_125], %102 {strides = array<i32>} : memref<500x96xf32, #tpu.memory_space<vmem>>, vector<20x96xf32>,
    %c0_126 = arith.constant 0 : index
    %c28_127 = arith.constant 28 : index
    %104 = vector.load %arg12[%c0_126, %c28_127] : memref<20x148xf32, #tpu.memory_space<vmem>>, vector<20x96xf32>
    %c280 = arith.constant 280 : index
    %c0_128 = arith.constant 0 : index
    %105 = vector.load %arg13[%c280, %c0_128] : memref<500x96xf32, #tpu.memory_space<vmem>>, vector<20x96xf32>
    tpu.vector_store %arg13[%c280, %c0_128], %104 {strides = array<i32>} : memref<500x96xf32, #tpu.memory_space<vmem>>, vector<20x96xf32>,
    %c0_129 = arith.constant 0 : index
    %c36 = arith.constant 36 : index
    %106 = vector.load %arg12[%c0_129, %c36] : memref<20x148xf32, #tpu.memory_space<vmem>>, vector<20x96xf32>
    %c300 = arith.constant 300 : index
    %c0_130 = arith.constant 0 : index
    %107 = vector.load %arg13[%c300, %c0_130] : memref<500x96xf32, #tpu.memory_space<vmem>>, vector<20x96xf32>
    tpu.vector_store %arg13[%c300, %c0_130], %106 {strides = array<i32>} : memref<500x96xf32, #tpu.memory_space<vmem>>, vector<20x96xf32>,
    %c0_131 = arith.constant 0 : index
    %c37 = arith.constant 37 : index
    %108 = vector.load %arg12[%c0_131, %c37] : memref<20x148xf32, #tpu.memory_space<vmem>>, vector<20x96xf32>
    %c320 = arith.constant 320 : index
    %c0_132 = arith.constant 0 : index
    %109 = vector.load %arg13[%c320, %c0_132] : memref<500x96xf32, #tpu.memory_space<vmem>>, vector<20x96xf32>
    tpu.vector_store %arg13[%c320, %c0_132], %108 {strides = array<i32>} : memref<500x96xf32, #tpu.memory_space<vmem>>, vector<20x96xf32>,
    %c0_133 = arith.constant 0 : index
    %c38 = arith.constant 38 : index
    %110 = vector.load %arg12[%c0_133, %c38] : memref<20x148xf32, #tpu.memory_space<vmem>>, vector<20x96xf32>
    %c340 = arith.constant 340 : index
    %c0_134 = arith.constant 0 : index
    %111 = vector.load %arg13[%c340, %c0_134] : memref<500x96xf32, #tpu.memory_space<vmem>>, vector<20x96xf32>
    tpu.vector_store %arg13[%c340, %c0_134], %110 {strides = array<i32>} : memref<500x96xf32, #tpu.memory_space<vmem>>, vector<20x96xf32>,
    %c0_135 = arith.constant 0 : index
    %c39 = arith.constant 39 : index
    %112 = vector.load %arg12[%c0_135, %c39] : memref<20x148xf32, #tpu.memory_space<vmem>>, vector<20x96xf32>
    %c360 = arith.constant 360 : index
    %c0_136 = arith.constant 0 : index
    %113 = vector.load %arg13[%c360, %c0_136] : memref<500x96xf32, #tpu.memory_space<vmem>>, vector<20x96xf32>
    tpu.vector_store %arg13[%c360, %c0_136], %112 {strides = array<i32>} : memref<500x96xf32, #tpu.memory_space<vmem>>, vector<20x96xf32>,
    %c0_137 = arith.constant 0 : index
    %c40_138 = arith.constant 40 : index
    %114 = vector.load %arg12[%c0_137, %c40_138] : memref<20x148xf32, #tpu.memory_space<vmem>>, vector<20x96xf32>
    %c380 = arith.constant 380 : index
    %c0_139 = arith.constant 0 : index
    %115 = vector.load %arg13[%c380, %c0_139] : memref<500x96xf32, #tpu.memory_space<vmem>>, vector<20x96xf32>
    tpu.vector_store %arg13[%c380, %c0_139], %114 {strides = array<i32>} : memref<500x96xf32, #tpu.memory_space<vmem>>, vector<20x96xf32>,
    %c0_140 = arith.constant 0 : index
    %c48 = arith.constant 48 : index
    %116 = vector.load %arg12[%c0_140, %c48] : memref<20x148xf32, #tpu.memory_space<vmem>>, vector<20x96xf32>
    %c400 = arith.constant 400 : index
    %c0_141 = arith.constant 0 : index
    %117 = vector.load %arg13[%c400, %c0_141] : memref<500x96xf32, #tpu.memory_space<vmem>>, vector<20x96xf32>
    tpu.vector_store %arg13[%c400, %c0_141], %116 {strides = array<i32>} : memref<500x96xf32, #tpu.memory_space<vmem>>, vector<20x96xf32>,
    %c0_142 = arith.constant 0 : index
    %c49 = arith.constant 49 : index
    %118 = vector.load %arg12[%c0_142, %c49] : memref<20x148xf32, #tpu.memory_space<vmem>>, vector<20x96xf32>
    %c420 = arith.constant 420 : index
    %c0_143 = arith.constant 0 : index
    %119 = vector.load %arg13[%c420, %c0_143] : memref<500x96xf32, #tpu.memory_space<vmem>>, vector<20x96xf32>
    tpu.vector_store %arg13[%c420, %c0_143], %118 {strides = array<i32>} : memref<500x96xf32, #tpu.memory_space<vmem>>, vector<20x96xf32>,
    %c0_144 = arith.constant 0 : index
    %c50 = arith.constant 50 : index
    %120 = vector.load %arg12[%c0_144, %c50] : memref<20x148xf32, #tpu.memory_space<vmem>>, vector<20x96xf32>
    %c440 = arith.constant 440 : index
    %c0_145 = arith.constant 0 : index
    %121 = vector.load %arg13[%c440, %c0_145] : memref<500x96xf32, #tpu.memory_space<vmem>>, vector<20x96xf32>
    tpu.vector_store %arg13[%c440, %c0_145], %120 {strides = array<i32>} : memref<500x96xf32, #tpu.memory_space<vmem>>, vector<20x96xf32>,
    %c0_146 = arith.constant 0 : index
    %c51 = arith.constant 51 : index
    %122 = vector.load %arg12[%c0_146, %c51] : memref<20x148xf32, #tpu.memory_space<vmem>>, vector<20x96xf32>
    %c460 = arith.constant 460 : index
    %c0_147 = arith.constant 0 : index
    %123 = vector.load %arg13[%c460, %c0_147] : memref<500x96xf32, #tpu.memory_space<vmem>>, vector<20x96xf32>
    tpu.vector_store %arg13[%c460, %c0_147], %122 {strides = array<i32>} : memref<500x96xf32, #tpu.memory_space<vmem>>, vector<20x96xf32>,
    %c0_148 = arith.constant 0 : index
    %c52 = arith.constant 52 : index
    %124 = vector.load %arg12[%c0_148, %c52] : memref<20x148xf32, #tpu.memory_space<vmem>>, vector<20x96xf32>
    %c480 = arith.constant 480 : index
    %c0_149 = arith.constant 0 : index
    %125 = vector.load %arg13[%c480, %c0_149] : memref<500x96xf32, #tpu.memory_space<vmem>>, vector<20x96xf32>
    tpu.vector_store %arg13[%c480, %c0_149], %124 {strides = array<i32>} : memref<500x96xf32, #tpu.memory_space<vmem>>, vector<20x96xf32>,
    %c0_150 = arith.constant 0 : index
    %c0_151 = arith.constant 0 : index
    %126 = vector.load %arg5[%c0_150, %c0_151] : memref<50x500xbf16, #tpu.memory_space<vmem>>, vector<50x500xbf16>
    %c0_152 = arith.constant 0 : index
    %c0_153 = arith.constant 0 : index
    %127 = vector.load %arg13[%c0_152, %c0_153] : memref<500x96xf32, #tpu.memory_space<vmem>>, vector<500x96xf32>
    %128 = arith.truncf %127 : vector<500x96xf32> to vector<500x96xbf16>
    %cst_154 = arith.constant dense<0.000000e+00> : vector<50x96xf32>
    %129 = tpu.matmul %126, %128, %cst_154 {dimension_numbers = #tpu.dot_dimension_numbers<[1], [0], [0], [1], [0, 0, 1, 1], [], []>} : vector<50x500xbf16>, vector<500x96xbf16>, vector<50x96xf32> -> vector<50x96xf32>
    %c0_155 = arith.constant 0 : index
    %c0_156 = arith.constant 0 : index
    %130 = vector.load %arg6[%c0_155, %c0_156] : memref<50x1xf32, #tpu.memory_space<vmem>>, vector<50x1xf32>
    %131 = vector.broadcast %130 : vector<50x1xf32> to vector<50x96xf32>
    %132 = arith.addf %129, %131 : vector<50x96xf32>
    %133 = vector.extract_strided_slice %132 {offsets = [0, 0], sizes = [50, 83], strides = [1, 1]} : vector<50x96xf32> to vector<50x83xf32>
    %134 = vector.extract_strided_slice %132 {offsets = [0, 1], sizes = [50, 83], strides = [1, 1]} : vector<50x96xf32> to vector<50x83xf32>
    %135 = arith.maximumf %133, %134 : vector<50x83xf32>
    %136 = vector.extract_strided_slice %132 {offsets = [0, 12], sizes = [50, 83], strides = [1, 1]} : vector<50x96xf32> to vector<50x83xf32>
    %137 = vector.extract_strided_slice %132 {offsets = [0, 13], sizes = [50, 83], strides = [1, 1]} : vector<50x96xf32> to vector<50x83xf32>
    %138 = arith.maximumf %136, %137 : vector<50x83xf32>
    %139 = arith.maximumf %135, %138 : vector<50x83xf32>
    %140 = arith.truncf %139 : vector<50x83xf32> to vector<50x83xbf16>
    %c0_157 = arith.constant 0 : index
    %c0_158 = arith.constant 0 : index
    %141 = vector.load %arg7[%c0_157, %c0_158] : memref<83x16xbf16, #tpu.memory_space<vmem>>, vector<83x16xbf16>
    %cst_159 = arith.constant dense<0.000000e+00> : vector<50x16xf32>
    %142 = tpu.matmul %140, %141, %cst_159 {dimension_numbers = #tpu.dot_dimension_numbers<[1], [0], [0], [1], [0, 0, 1, 1], [], []>} : vector<50x83xbf16>, vector<83x16xbf16>, vector<50x16xf32> -> vector<50x16xf32>
    %cst_160 = arith.constant 0.000000e+00 : f32
    %143 = vector.broadcast %cst_160 : f32 to vector<50x16xf32>
    %144 = arith.maximumf %142, %143 : vector<50x16xf32>
    %145 = arith.truncf %144 : vector<50x16xf32> to vector<50x16xbf16>
    %c0_161 = arith.constant 0 : index
    %c0_162 = arith.constant 0 : index
    %c0_163 = arith.constant 0 : index
    %146 = vector.load %arg8[%c0_161, %c0_162, %c0_163] : memref<1x50x16xbf16, #tpu.memory_space<vmem>>, vector<1x50x16xbf16>
    %147 = vector.shape_cast %146 : vector<1x50x16xbf16> to vector<50x16xbf16>
    %148 = vector.shape_cast %145 : vector<50x16xbf16> to vector<1x50x16xbf16>
    tpu.vector_store %arg8[%c0_161, %c0_162, %c0_163], %148 {strides = array<i32>} : memref<1x50x16xbf16, #tpu.memory_space<vmem>>, vector<1x50x16xbf16>,
    return
  }
  func.func @transform_0(%arg0: i32) -> (i32, i32, i32) {
    %c0_i32 = arith.constant 0 : i32
    %c0_i32_0 = arith.constant 0 : i32
    %c0_i32_1 = arith.constant 0 : i32
    return %arg0, %c0_i32, %c0_i32_0 : i32, i32, i32
  }
  func.func @transform_1(%arg0: i32) -> (i32, i32) {
    %c0_i32 = arith.constant 0 : i32
    %c0_i32_0 = arith.constant 0 : i32
    %c0_i32_1 = arith.constant 0 : i32
    return %c0_i32, %c0_i32_0 : i32, i32
  }
  func.func @transform_2(%arg0: i32) -> (i32, i32) {
    %c0_i32 = arith.constant 0 : i32
    %c0_i32_0 = arith.constant 0 : i32
    %c0_i32_1 = arith.constant 0 : i32
    return %c0_i32, %c0_i32_0 : i32, i32
  }
  func.func @transform_3(%arg0: i32) -> (i32, i32) {
    %c0_i32 = arith.constant 0 : i32
    %c0_i32_0 = arith.constant 0 : i32
    %c0_i32_1 = arith.constant 0 : i32
    return %c0_i32, %c0_i32_0 : i32, i32
  }
  func.func @transform_4(%arg0: i32) -> (i32, i32) {
    %c0_i32 = arith.constant 0 : i32
    %c0_i32_0 = arith.constant 0 : i32
    %c0_i32_1 = arith.constant 0 : i32
    return %c0_i32, %c0_i32_0 : i32, i32
  }
  func.func @transform_5(%arg0: i32) -> (i32, i32) {
    %c0_i32 = arith.constant 0 : i32
    %c0_i32_0 = arith.constant 0 : i32
    %c0_i32_1 = arith.constant 0 : i32
    return %c0_i32, %c0_i32_0 : i32, i32
  }
  func.func @transform_6(%arg0: i32) -> (i32, i32) {
    %c0_i32 = arith.constant 0 : i32
    %c0_i32_0 = arith.constant 0 : i32
    %c0_i32_1 = arith.constant 0 : i32
    return %c0_i32, %c0_i32_0 : i32, i32
  }
  func.func @transform_7(%arg0: i32) -> (i32, i32, i32) {
    %c0_i32 = arith.constant 0 : i32
    %c0_i32_0 = arith.constant 0 : i32
    %c0_i32_1 = arith.constant 0 : i32
    return %arg0, %c0_i32, %c0_i32_0 : i32, i32, i32
  }
}

module attributes {stable_mosaic.version = 11 : i64} {
  func.func @_mlp_head_kernel(%arg0: i32, %arg1: memref<2x800xbf16, #tpu.memory_space<vmem>>, %arg2: memref<800x512xbf16, #tpu.memory_space<vmem>>, %arg3: memref<1x512xf32, #tpu.memory_space<vmem>>, %arg4: memref<512x128xbf16, #tpu.memory_space<vmem>>, %arg5: memref<1x128xf32, #tpu.memory_space<vmem>>, %arg6: memref<2x10xf32, #tpu.memory_space<vmem>>) attributes {dimension_semantics = [#tpu.dimension_semantics<parallel>], iteration_bounds = array<i64: 1>, scalar_prefetch = 0 : i64, scratch_operands = 0 : i64, tpu.core_type = #tpu.core_type<tc>, window_params = [{transform_indices = @transform_0, window_bounds = array<i64: 2, 800>}, {pipeline_mode = #tpu.pipeline_mode<synchronous>, transform_indices = @transform_1, window_bounds = array<i64: 800, 512>}, {pipeline_mode = #tpu.pipeline_mode<synchronous>, transform_indices = @transform_2, window_bounds = array<i64: 1, 512>}, {pipeline_mode = #tpu.pipeline_mode<synchronous>, transform_indices = @transform_3, window_bounds = array<i64: 512, 128>}, {pipeline_mode = #tpu.pipeline_mode<synchronous>, transform_indices = @transform_4, window_bounds = array<i64: 1, 128>}, {transform_indices = @transform_5, window_bounds = array<i64: 2, 10>}]} {
    %c0 = arith.constant 0 : index
    %c0_0 = arith.constant 0 : index
    %0 = vector.load %arg1[%c0, %c0_0] : memref<2x800xbf16, #tpu.memory_space<vmem>>, vector<2x800xbf16>
    %c0_1 = arith.constant 0 : index
    %c0_2 = arith.constant 0 : index
    %1 = vector.load %arg2[%c0_1, %c0_2] : memref<800x512xbf16, #tpu.memory_space<vmem>>, vector<800x512xbf16>
    %cst = arith.constant dense<0.000000e+00> : vector<2x512xf32>
    %2 = tpu.matmul %0, %1, %cst {dimension_numbers = #tpu.dot_dimension_numbers<[1], [0], [0], [1], [0, 0, 1, 1], [], []>} : vector<2x800xbf16>, vector<800x512xbf16>, vector<2x512xf32> -> vector<2x512xf32>
    %c0_3 = arith.constant 0 : index
    %c0_4 = arith.constant 0 : index
    %3 = vector.load %arg3[%c0_3, %c0_4] : memref<1x512xf32, #tpu.memory_space<vmem>>, vector<1x512xf32>
    %4 = vector.broadcast %3 : vector<1x512xf32> to vector<2x512xf32>
    %5 = arith.addf %2, %4 : vector<2x512xf32>
    %cst_5 = arith.constant 0.000000e+00 : f32
    %6 = vector.broadcast %cst_5 : f32 to vector<2x512xf32>
    %7 = arith.maximumf %5, %6 : vector<2x512xf32>
    %8 = arith.truncf %7 : vector<2x512xf32> to vector<2x512xbf16>
    %c0_6 = arith.constant 0 : index
    %c0_7 = arith.constant 0 : index
    %9 = vector.load %arg4[%c0_6, %c0_7] : memref<512x128xbf16, #tpu.memory_space<vmem>>, vector<512x128xbf16>
    %cst_8 = arith.constant dense<0.000000e+00> : vector<2x128xf32>
    %10 = tpu.matmul %8, %9, %cst_8 {dimension_numbers = #tpu.dot_dimension_numbers<[1], [0], [0], [1], [0, 0, 1, 1], [], []>} : vector<2x512xbf16>, vector<512x128xbf16>, vector<2x128xf32> -> vector<2x128xf32>
    %c0_9 = arith.constant 0 : index
    %c0_10 = arith.constant 0 : index
    %11 = vector.load %arg5[%c0_9, %c0_10] : memref<1x128xf32, #tpu.memory_space<vmem>>, vector<1x128xf32>
    %12 = vector.broadcast %11 : vector<1x128xf32> to vector<2x128xf32>
    %13 = arith.addf %10, %12 : vector<2x128xf32>
    %cst_11 = arith.constant dense<0xFF800000> : vector<2xf32>
    %14 = vector.multi_reduction <maximumf>, %13, %cst_11 [1] : vector<2x128xf32> to vector<2xf32>
    %15 = vector.shape_cast %14 : vector<2xf32> to vector<2x1xf32>
    %16 = vector.broadcast %15 : vector<2x1xf32> to vector<2x128xf32>
    %17 = arith.subf %13, %16 : vector<2x128xf32>
    %18 = math.exp %17 : vector<2x128xf32>
    %cst_12 = arith.constant dense<0.000000e+00> : vector<2xf32>
    %19 = vector.multi_reduction <add>, %18, %cst_12 [1] : vector<2x128xf32> to vector<2xf32>
    %20 = vector.shape_cast %19 : vector<2xf32> to vector<2x1xf32>
    %21 = math.log %20 : vector<2x1xf32>
    %22 = vector.broadcast %21 : vector<2x1xf32> to vector<2x128xf32>
    %23 = arith.subf %17, %22 : vector<2x128xf32>
    %24 = vector.extract_strided_slice %23 {offsets = [0, 0], sizes = [2, 10], strides = [1, 1]} : vector<2x128xf32> to vector<2x10xf32>
    %c0_13 = arith.constant 0 : index
    %c0_14 = arith.constant 0 : index
    %25 = vector.load %arg6[%c0_13, %c0_14] : memref<2x10xf32, #tpu.memory_space<vmem>>, vector<2x10xf32>
    tpu.vector_store %arg6[%c0_13, %c0_14], %24 {strides = array<i32>} : memref<2x10xf32, #tpu.memory_space<vmem>>, vector<2x10xf32>,
    return
  }
  func.func @transform_0(%arg0: i32) -> (i32, i32) {
    %c0_i32 = arith.constant 0 : i32
    %c0_i32_0 = arith.constant 0 : i32
    return %arg0, %c0_i32 : i32, i32
  }
  func.func @transform_1(%arg0: i32) -> (i32, i32) {
    %c0_i32 = arith.constant 0 : i32
    %c0_i32_0 = arith.constant 0 : i32
    %c0_i32_1 = arith.constant 0 : i32
    return %c0_i32, %c0_i32_0 : i32, i32
  }
  func.func @transform_2(%arg0: i32) -> (i32, i32) {
    %c0_i32 = arith.constant 0 : i32
    %c0_i32_0 = arith.constant 0 : i32
    %c0_i32_1 = arith.constant 0 : i32
    return %c0_i32, %c0_i32_0 : i32, i32
  }
  func.func @transform_3(%arg0: i32) -> (i32, i32) {
    %c0_i32 = arith.constant 0 : i32
    %c0_i32_0 = arith.constant 0 : i32
    %c0_i32_1 = arith.constant 0 : i32
    return %c0_i32, %c0_i32_0 : i32, i32
  }
  func.func @transform_4(%arg0: i32) -> (i32, i32) {
    %c0_i32 = arith.constant 0 : i32
    %c0_i32_0 = arith.constant 0 : i32
    %c0_i32_1 = arith.constant 0 : i32
    return %c0_i32, %c0_i32_0 : i32, i32
  }
  func.func @transform_5(%arg0: i32) -> (i32, i32) {
    %c0_i32 = arith.constant 0 : i32
    %c0_i32_0 = arith.constant 0 : i32
    return %arg0, %c0_i32 : i32, i32
  }
}

</mosaic_0001>

<bundles_post_ra>
// kernel: net_forward.2
= control target key start
LH: loop header
LB: loop body
LE: loop exit
PB: predicated region body
PF: predicated region fallthrough
CT: control target
= control target key end

     0   :  { %12 = vsyncpa [#allocation8], 0  ;;  %s4940_s0 = inlined_call_operand.vmem [shape: f32[2,1,784], index: 0, kind: input, shape index: {}]   ;;  %s4941_s1 = inlined_call_operand.hbm [shape: bf16[20,25], index: 1, kind: input, shape index: {}]   ;;  %s4942_s2 = inlined_call_operand.vmem [shape: f32[20,1], index: 2, kind: input, shape index: {}]   ;;  %s4943_s3 = inlined_call_operand.vmem [shape: bf16[643,148], index: 3, kind: input, shape index: {}]   ;;  %s4944_s4 = inlined_call_operand.hbm [shape: bf16[50,500], index: 4, kind: input, shape index: {}]   ;;  %s4945_s5 = inlined_call_operand.vmem [shape: f32[50,1], index: 5, kind: input, shape index: {}]   ;;  %s4946_s6 = inlined_call_operand.vmem [shape: bf16[83,16], index: 6, kind: input, shape index: {}]   ;;  %s4947_s7 = inlined_call_operand.vmem [shape: bf16[2,50,16], index: 7, kind: output, shape index: {}]  }
   0x1   :  { %13 = vsyncpa [#allocation10], 0  ;;  %s3838_s24 = smov 0  }
   0x2 LB: > { %s3746_s25 = smov [#allocation7]   ;;  %s3844_s27 = sadd.s32 4294967295, %s3744_s24   ;;  %s3744_s24 = sphi %s3838_s24, %s19_s24  }
   0x3   : > { %s214_s26 = sshll.u32 %s3746_s25, 4  ;;  %p3049_p0 = scmp.ge.s32.totalorder %s3744_s24, 1  ;;  %s215_s26 = int_to_ptr.vmem [resolvable:$true] %s214_s26 }
   0x4   : > { %p202_p1 = scmp.lt.s32.totalorder %s3744_s24, 3  ;;  %p4948_p3 = scmp.eq.s32.totalorder %s3844_s27, 0 }
   0x5   : > { %s3747_s29 = smov [#allocation9]   ;;  %s3674_s11 = scalar_lea.hbm %s4941_s1, 192 }
   0x6   : > { %p3848_p2 = pnand %p3049_p0, %p202_p1  ;;  %s233_s30 = sshll.u32 %s3747_s29, 4  ;;  %s3861_s30 = int_to_ptr.vmem [resolvable:$true] %s233_s30 }
   0x7   : > { %p3675_p6 = scmp.ne.s32.totalorder %s4941_s1, %s3674_s11  ;;  %p3681_p10 = scmp.lt.u32.totalorder %s3674_s11, %s4941_s1 }
   0x8   : > { %s4954_s28 = scalar_select %p3848_p2, 1, 0 }
   0x9   : > { %p3334_p4 = pneg %p3848_p2 }
   0xb   : > { %p3857_p5 = pnand %p4948_p3, %p3334_p4 }
   0xd   : > { %p3676_p7 = pneg %p3857_p5 }
   0xf   : > { %p3677_p8 = pnand %p3676_p7, %p3675_p6 }
  0x11   : > { %p3678_p9 = pneg %p3677_p8 }
  0x13   : > { %p3683_p11 = pnand %p3681_p10, %p3678_p9 }
  0x15   : > { %3686 = shalt.err (!%p3683_p11)
}
  0x16   : > { %s3687_s16 = scalar_lea.vmem %s215_s26, 192  ;;  %p3695_p1 = scmp.lt.s32.totalorder %s215_s26, %s215_s26 }
  0x17   : > { %p3688_p12 = scmp.ne.s32.totalorder %s215_s26, %s3687_s16  ;;  %p3696_p4 = scmp.lt.s32.totalorder %s3687_s16, %s3687_s16 }
  0x19   : > { %p3690_p13 = pnand %p3688_p12, %p3676_p7  ;;  %p3697_p3 = por %p3696_p4, %p3695_p1 }
  0x1b   : > { %p3691_p0 = pneg %p3690_p13 }
  0x1d   : > { %p3698_p2 = pnand %p3697_p3, %p3691_p0 }
  0x1f   : > { %3701 = shalt.err (!%p3698_p2)
}
  0x20   : > { %s3748_s17 = smov 64   ;;  %s3749_s18 = smov 4  }
  0x21   : > { %3337 = dma.hbm_to_vmem [thread:$0]  (!%p3857_p5), %s4941_s1, 192, %s215_s26, [#allocation8], %s3748_s17, %s3748_s17, %s3749_s18  }
  0x22   : > { %s3702_s23 = scalar_lea.hbm %s4944_s4, 1792 }
  0x23   : > { %p3703_p6 = scmp.ne.s32.totalorder %s4944_s4, %s3702_s23  ;;  %p3709_p8 = scmp.lt.u32.totalorder %s3702_s23, %s4944_s4 }
  0x25   : > { %p3705_p2 = pnand %p3703_p6, %p3676_p7 }
  0x27   : > { %p3706_p3 = pneg %p3705_p2 }
  0x29   : > { %p3711_p9 = pnand %p3709_p8, %p3706_p3 }
  0x2b   : > { %3714 = shalt.err (!%p3711_p9)
}
  0x2c   : > { %s3715_s26 = scalar_lea.vmem %s3861_s30, 1792  ;;  %p3723_p13 = scmp.lt.s32.totalorder %s3861_s30, %s3861_s30 }
  0x2d   : > { %p3716_p10 = scmp.ne.s32.totalorder %s3861_s30, %s3715_s26  ;;  %p3724_p0 = scmp.lt.s32.totalorder %s3715_s26, %s3715_s26 }
  0x2f   : > { %p3718_p11 = pnand %p3716_p10, %p3676_p7  ;;  %p3725_p1 = por %p3724_p0, %p3723_p13 }
  0x31   : > { %p3719_p12 = pneg %p3718_p11 }
  0x33   : > { %p3726_p4 = pnand %p3725_p1, %p3719_p12 }
  0x35   : > { %3729 = shalt.err (!%p3726_p4)
}
  0x36   : > { %s3750_s11 = smov 256   ;;  %s3751_s12 = smov 16  }
  0x37   : > { %3340 = dma.hbm_to_vmem [thread:$0]  (!%p3857_p5), %s4944_s4, 1792, %s3861_s30, [#allocation10], %s3750_s11, %s3750_s11, %s3751_s12  }
  0x38   : > { %p4956_p6 = scmp.ne.s32.totalorder %s4954_s28, 0 }
  0x39   : > { %p4957_p7 = scmp.eq.s32.totalorder (!%p4956_p6), %s3844_s27, 0 }
  0x3a   : > { %262 = sbr.rel (%p4956_p6) target bundleno = 2118 (0x846), region = 48 }
  0x41   : > { %3735 = dma.done.wait (%p4957_p7), [#allocation8], 192   ;;  %p4958_p2 = pmov %p4957_p7 }
  0x43   : > { %3737 = vsyncadd (%p4958_p2), [#allocation8], 4294967104  ;;  %p4959_p3 = pmov %p4958_p2 }
  0x44   : > { %p4960_p8 = pmov %p4958_p2 }
  0x45   : > { %3739 = dma.done.wait (%p4959_p3), [#allocation10], 1792  }
  0x46   : > { %3741 = vsyncadd (%p4960_p8), [#allocation10], 4294965504  ;;  %p297_p9 = scmp.lt.s32.totalorder %s3844_s27, 1  ;;  %v308_v0 = vlaneseq  ;;  %v3752_v2 = vmov 0.0   ;;  %s3753_s16 = smov 125   ;;  %v3777_v29 = vmov 0  }
  0x47   : > { %s3754_s17 = smov 127   ;;  %s3755_s18 = smov 124   ;;  %712 = vmatprep.mubr.bf16.mxu0 %v3777_v29  ;;  %722 = vmatprep.mubr.bf16.mxu1 %v3777_v29  ;;  %v626_v30 = vld [vmem:[%s4942_s2 + $0x8] sm:$0xff]  ;;  %v625_v31 = vld [vmem:[%s4942_s2] sm:$0xff]  ;;  %v627_v32 = vld [vmem:[%s4942_s2 + $0x10] sm:$0xf] }
  0x48   : > { %s4966_s27 = smov (!%p297_p9, %s3844_s27), 1  ;;  %vm313_vm0 = vcmp.ge.s32.totalorder %v308_v0, 16  ;;  %vm314_vm1 = vcmp.lt.s32.totalorder %v308_v0, 20  ;;  %vm310_vm2 = vcmp.lt.s32.totalorder %v308_v0, 784  ;;  %s3756_s19 = smov 126   ;;  %vm3932_vm4 = vcmp.lt.s32.totalorder %v308_v0, 672  ;;  %3406 = vset.pattern.permute.xlu1 %v3777_v29  ;;  %3405 = vset.pattern.permute.xlu0 %v3777_v29 }
  0x49   : > { %s3324_s28 = smul.u32 7, %s4966_s27  ;;  %vm315_vm3 = vmand %vm313_vm0, %vm314_vm1  ;;  %s3757_s20 = smov 99   ;;  %vm349_vm5 = vcmask 1022976   ;;  %vm327_vm6 = vcmask 1039360   ;;  %vm360_vm7 = vcmask 1014784   ;;  %vm338_vm8 = vcmask 1031168  }
  0x4a   : > { %s4950_s21 = smov 100   ;;  %s3759_s22 = smov 97   ;;  %vm382_vm9 = vcmask 809984   ;;  %vm371_vm10 = vcmask 818176   ;;  %vm404_vm11 = vcmask 793600   ;;  %vm393_vm12 = vcmask 801792  }
  0x4b   : > { %s300_s15 = scalar_lea.vmem %s4940_s0, %s3324_s28  ;;  %s3760_s23 = smov 98   ;;  %vm426_vm13 = vcmask 588800   ;;  %vm415_vm14 = vcmask 785408   ;;  %vm448_vm15 = vcmask 572416   ;;  %vm437_vm0 = vcmask 580608  }
  0x4c   : > { %v307_v1 = vld [vmem:[%s300_s15] sm:$0x7f]  ;;  %s3761_s25 = smov 72   ;;  %s3762_s29 = smov 96   ;;  %vm470_vm1 = vcmask 556032  }
  0x4d   : > { %312 = vst.msk [vmem:[#allocation2] sm:$0x7f] %vm310_vm2, %v307_v1  ;;  %s3763_s9 = smov 70   ;;  %s3764_s10 = smov 71   ;;  %vm459_vm2 = vcmask 564224  }
  0x4e   : > { %316 = vst.msk [vmem:[#allocation2 + $0x6] sm:$0x1] %vm315_vm3, %v3752_v2  ;;  %s3765_s26 = smov 68   ;;  %s3766_s11 = smov 69   ;;  %vm492_vm3 = vcmask 351232  }
  0x4f   : > { %s3767_s12 = smov 43   ;;  %s3768_s13 = smov 44  }
  0x50   : > { %s3769_s14 = smov 41   ;;  %s3770_s28 = smov 42  }
  0x51   : > { %s3771_s30 = smov 40   ;;  %s3772_s8 = smov 16  }
  0x52   : > { %s3773_s15 = smov 15  }
  0x54   : > { %v344_v3 = vld [vmem:[#allocation2] sm:$0x3f] }
  0x55   : > { %v322_v4 = vld [vmem:[#allocation2] sm:$0x3f]  ;;  %346 = vrot.lane.b32.xlu1 %v344_v3, %s3753_s16 }
  0x56   : > { %324 = vrot.lane.b32.xlu0 %v322_v4, %s3754_s17  ;;  %v355_v5 = vld [vmem:[#allocation2] sm:$0x3f] }
  0x57   : > { %v333_v6 = vld [vmem:[#allocation2] sm:$0x3f] }
  0x58   : > { %v377_v7 = vld [vmem:[#allocation2] sm:$0x3f] }
  0x59   : > { %357 = vrot.lane.b32.xlu1 %v355_v5, %s3755_s18  ;;  %v366_v8 = vld [vmem:[#allocation2] sm:$0x3f] }
  0x5a   : > { %335 = vrot.lane.b32.xlu0 %v333_v6, %s3756_s19  ;;  %v399_v10 = vld [vmem:[#allocation2] sm:$0x3f] }
  0x5b   : > { %v388_v11 = vld [vmem:[#allocation2] sm:$0x3f] }
  0x5c   : > { %v317_v12 = vld [vmem:[#allocation2] sm:$0x3f] }
  0x5d   : > { %379 = vrot.lane.b32.xlu1 %v377_v7, %s3757_s20  ;;  %320 = vst.msk [vmem:[#allocation3] ss:$8 sm:$0xf] %vm3932_vm4, %v317_v12  ;;  %321 = vst.msk [vmem:[#allocation3] ss:$8 sm:$0x30] %vm3932_vm4, %v317_v12 }
  0x5e   : > { %368 = vrot.lane.b32.xlu0 %v366_v8, %s4950_s21  ;;  %v421_v13 = vld [vmem:[#allocation2] sm:$0x3f]  ;;  %s3774_s20 = smov 14  }
  0x5f   : > { %v410_v14 = vld [vmem:[#allocation2] sm:$0x3f] }
  0x60   : > { %v443_v15 = vld [vmem:[#allocation2] sm:$0x3f] }
  0x61   : > { %401 = vrot.lane.b32.xlu1 %v399_v10, %s3759_s22  ;;  %v432_v16 = vld [vmem:[#allocation2] sm:$0x3f]  ;;  %s3775_s22 = smov 13  }
  0x62   : > { %390 = vrot.lane.b32.xlu0 %v388_v11, %s3760_s23  ;;  %v465_v17 = vld [vmem:[#allocation2] sm:$0x3f]  ;;  %s3776_s23 = smov 12  }
  0x63   : > { %v454_v18 = vld [vmem:[#allocation2] sm:$0x3f] }
  0x64   : > { %v487_v19 = vld [vmem:[#allocation2] sm:$0x3f] }
  0x65   : > { %423 = vrot.lane.b32.xlu1 %v421_v13, %s3761_s25  ;;  %v476_v20 = vld [vmem:[#allocation2] sm:$0x3f]  ;;  %s3787_s25 = smov 115  }
  0x66   : > { %412 = vrot.lane.b32.xlu0 %v410_v14, %s3762_s29  ;;  %v509_v21 = vld [vmem:[#allocation2] sm:$0x3f]  ;;  %s3788_s29 = smov 101  }
  0x67   : > { %v498_v22 = vld [vmem:[#allocation2] sm:$0x3f] }
  0x68   : > { %v520_v23 = vld [vmem:[#allocation2] sm:$0x3f] }
  0x69   : > { %445 = vrot.lane.b32.xlu1 %v443_v15, %s3763_s9  ;;  %v531_v24 = vld [vmem:[#allocation2] sm:$0x7f]  ;;  %s3789_s9 = smov 80  }
  0x6a   : > { %434 = vrot.lane.b32.xlu0 %v432_v16, %s3764_s10  ;;  %v542_v25 = vld [vmem:[#allocation2] sm:$0x7f]  ;;  %s3790_s10 = smov 79  }
  0x6b   : > { %v553_v26 = vld [vmem:[#allocation2] sm:$0x7f] }
  0x6c   : > { %v564_v27 = vld [vmem:[#allocation2] sm:$0x7f] }
  0x6d   : > { %467 = vrot.lane.b32.xlu1 %v465_v17, %s3765_s26  ;;  %v575_v28 = vld [vmem:[#allocation2] sm:$0x7f]  ;;  %s3791_s26 = smov 92  }
  0x6e   : > { %456 = vrot.lane.b32.xlu0 %v454_v18, %s3766_s11  ;;  %s3792_s11 = smov 78  }
  0x71   : > { %489 = vrot.lane.b32.xlu1 %v487_v19, %s3767_s12  ;;  %s3793_s12 = smov 77  }
  0x72   : > { %478 = vrot.lane.b32.xlu0 %v476_v20, %s3768_s13  ;;  %s3794_s13 = smov 91  }
  0x75   : > { %511 = vrot.lane.b32.xlu1 %v509_v21, %s3769_s14  ;;  %s3779_s14 = smov 114  }
  0x76   : > { %500 = vrot.lane.b32.xlu0 %v498_v22, %s3770_s28  ;;  %s3780_s28 = smov 113  }
  0x79   : > { %533 = vrot.lane.b32.xlu1 %v531_v24, %s3772_s8  ;;  %s3782_s8 = smov 103  }
  0x7a   : > { %522 = vrot.lane.b32.xlu0 %v520_v23, %s3771_s30  ;;  %s3781_s30 = smov 112  }
  0x7d   : > { %555 = vrot.lane.b32.xlu1 %v553_v26, %s3774_s20  ;;  %s3784_s20 = smov 104  }
  0x7e   : > { %544 = vrot.lane.b32.xlu0 %v542_v25, %s3773_s15  ;;  %s3783_s15 = smov 116  }
  0x81   : > { %577 = vrot.lane.b32.xlu1 %v575_v28, %s3776_s23  ;;  %s3786_s23 = smov 88  }
  0x82   : > { %566 = vrot.lane.b32.xlu0 %v564_v27, %s3775_s22  ;;  %s3785_s22 = smov 102  }
  0x85   : > { %635 = vperm.xlu1 %3406, %v626_v30  }
  0x86   : > { %630 = vperm.xlu0 %3405, %v625_v31  }
  0x89   : > { %640 = vperm.xlu1 %3406, %v627_v32  }
  0xc7   : > { %v347_v33 = vpop.permute.xlu1 %346 }
  0xc8   : > { %v325_v34 = vpop.permute.xlu0 %324  ;;  %v348_v35 = vrot.slane %v347_v33, 1 }
  0xc9   : > { %v326_v36 = vrot.slane %v325_v34, 1 }
  0xca   : > { %v350_v37 = vsel %vm349_vm5, %v347_v33, %v348_v35  ;;  %vm481_vm5 = vcmask 359424  }
  0xcb   : > { %v328_v38 = vsel %vm327_vm6, %v325_v34, %v326_v36  ;;  %353 = vst.msk [vmem:[#allocation3 + $0x3] ss:$8 sm:$0xf] %vm3932_vm4, %v350_v37  ;;  %354 = vst.msk [vmem:[#allocation3 + $0x3] ss:$8 sm:$0x30] %vm3932_vm4, %v350_v37  ;;  %v358_v39 = vpop.permute.xlu1 %357 }
  0xcc   : > { %331 = vst.msk [vmem:[#allocation3 + $0x1] ss:$8 sm:$0xf] %vm3932_vm4, %v328_v38  ;;  %332 = vst.msk [vmem:[#allocation3 + $0x1] ss:$8 sm:$0x30] %vm3932_vm4, %v328_v38  ;;  %v336_v40 = vpop.permute.xlu0 %335 }
  0xcd   : > { %v359_v41 = vrot.slane %v358_v39, 1  ;;  %v337_v42 = vrot.slane %v336_v40, 1 }
  0xcf   : > { %v361_v43 = vsel %vm360_vm7, %v358_v39, %v359_v41  ;;  %v339_v44 = vsel %vm338_vm8, %v336_v40, %v337_v42  ;;  %v380_v45 = vpop.permute.xlu1 %379  ;;  %vm514_vm7 = vcmask 334848   ;;  %vm503_vm8 = vcmask 343040  }
  0xd0   : > { %364 = vst.msk [vmem:[#allocation3 + $0x4] ss:$8 sm:$0xf] %vm3932_vm4, %v361_v43  ;;  %365 = vst.msk [vmem:[#allocation3 + $0x4] ss:$8 sm:$0x30] %vm3932_vm4, %v361_v43  ;;  %v369_v46 = vpop.permute.xlu0 %368 }
  0xd1   : > { %342 = vst.msk [vmem:[#allocation3 + $0x2] ss:$8 sm:$0xf] %vm3932_vm4, %v339_v44  ;;  %343 = vst.msk [vmem:[#allocation3 + $0x2] ss:$8 sm:$0x30] %vm3932_vm4, %v339_v44 }
  0xd2   : > { %v381_v47 = vrot.slane %v380_v45, 1  ;;  %v370_v48 = vrot.slane %v369_v46, 1 }
  0xd3   : > { %v402_v51 = vpop.permute.xlu1 %401 }
  0xd4   : > { %v383_v49 = vsel %vm382_vm9, %v380_v45, %v381_v47  ;;  %v372_v50 = vsel %vm371_vm10, %v369_v46, %v370_v48  ;;  %v391_v52 = vpop.permute.xlu0 %390  ;;  %v403_v53 = vrot.slane %v402_v51, 1  ;;  %vm525_vm9 = vcmask 326656  }
  0xd5   : > { %386 = vst.msk [vmem:[#allocation3 + $0x6] ss:$8 sm:$0xf] %vm3932_vm4, %v383_v49  ;;  %387 = vst.msk [vmem:[#allocation3 + $0x6] ss:$8 sm:$0x30] %vm3932_vm4, %v383_v49 }
  0xd6   : > { %375 = vst.msk [vmem:[#allocation3 + $0x5] ss:$8 sm:$0xf] %vm3932_vm4, %v372_v50  ;;  %376 = vst.msk [vmem:[#allocation3 + $0x5] ss:$8 sm:$0x30] %vm3932_vm4, %v372_v50  ;;  %v405_v55 = vsel %vm404_vm11, %v402_v51, %v403_v53 }
  0xd7   : > { %v392_v54 = vrot.slane %v391_v52, 1  ;;  %408 = vst.msk [vmem:[#allocation3 + $0x30] ss:$8 sm:$0xf] %vm3932_vm4, %v405_v55  ;;  %v424_v57 = vpop.permute.xlu1 %423  ;;  %vm536_vm11 = vcmask 130048   ;;  %v3778_v49 = vmov 65535  }
  0xd8   : > { %409 = vst.msk [vmem:[#allocation3 + $0x30] ss:$8 sm:$0x30] %vm3932_vm4, %v405_v55  ;;  %v413_v58 = vpop.permute.xlu0 %412  ;;  %v425_v59 = vrot.slane %v424_v57, 1 }
  0xd9   : > { %v394_v56 = vsel %vm393_vm12, %v391_v52, %v392_v54  ;;  %v414_v60 = vrot.slane %v413_v58, 1  ;;  %vm547_vm12 = vcmask 121856  }
  0xda   : > { %397 = vst.msk [vmem:[#allocation3 + $0x7] ss:$8 sm:$0xf] %vm3932_vm4, %v394_v56  ;;  %398 = vst.msk [vmem:[#allocation3 + $0x7] ss:$8 sm:$0x30] %vm3932_vm4, %v394_v56  ;;  %v427_v61 = vsel %vm426_vm13, %v424_v57, %v425_v59 }
  0xdb   : > { %v416_v62 = vsel %vm415_vm14, %v413_v58, %v414_v60  ;;  %430 = vst.msk [vmem:[#allocation3 + $0x32] ss:$8 sm:$0xf] %vm3932_vm4, %v427_v61  ;;  %431 = vst.msk [vmem:[#allocation3 + $0x32] ss:$8 sm:$0x30] %vm3932_vm4, %v427_v61  ;;  %v446_v63 = vpop.permute.xlu1 %445 }
  0xdc   : > { %419 = vst.msk [vmem:[#allocation3 + $0x31] ss:$8 sm:$0xf] %vm3932_vm4, %v416_v62  ;;  %420 = vst.msk [vmem:[#allocation3 + $0x31] ss:$8 sm:$0x30] %vm3932_vm4, %v416_v62  ;;  %v435_v0 = vpop.permute.xlu0 %434 }
  0xdd   : > { %v447_v1 = vrot.slane %v446_v63, 1  ;;  %v436_v2 = vrot.slane %v435_v0, 1  ;;  %vm558_vm13 = vcmask 113664  }
  0xdf   : > { %v449_v3 = vsel %vm448_vm15, %v446_v63, %v447_v1  ;;  %v438_v4 = vsel %vm437_vm0, %v435_v0, %v436_v2  ;;  %v468_v5 = vpop.permute.xlu1 %467  ;;  %vm569_vm15 = vcmask 105472   ;;  %vm580_vm0 = vcmask 97280   ;;  %v3522_v2 = vld [vmem:[#allocation7] sm:$0xff]  }
  0xe0   : > { %452 = vst.msk [vmem:[#allocation3 + $0x34] ss:$8 sm:$0xf] %vm3932_vm4, %v449_v3  ;;  %453 = vst.msk [vmem:[#allocation3 + $0x34] ss:$8 sm:$0x30] %vm3932_vm4, %v449_v3  ;;  %v457_v6 = vpop.permute.xlu0 %456 }
  0xe1   : > { %441 = vst.msk [vmem:[#allocation3 + $0x33] ss:$8 sm:$0xf] %vm3932_vm4, %v438_v4  ;;  %442 = vst.msk [vmem:[#allocation3 + $0x33] ss:$8 sm:$0x30] %vm3932_vm4, %v438_v4 }
  0xe2   : > { %v469_v7 = vrot.slane %v468_v5, 1  ;;  %v458_v8 = vrot.slane %v457_v6, 1  ;;  %v590_v28 = vld [vmem:[#allocation3 + $0x8] sm:$0xff]  ;;  %v589_v33 = vld [vmem:[#allocation3] sm:$0xff]  ;;  %v592_v0 = vld [vmem:[#allocation3 + $0x18] sm:$0xff] }
  0xe3   : > { %v490_v12 = vpop.permute.xlu1 %489  ;;  %v594_v1 = vld [vmem:[#allocation3 + $0x28] sm:$0xff]  ;;  %v3523_v3 = vld [vmem:[#allocation7 + $0x8] ss:$0 sps:$4 sm:$0x33]  }
  0xe4   : > { %v471_v10 = vsel %vm470_vm1, %v468_v5, %v469_v7  ;;  %v460_v11 = vsel %vm459_vm2, %v457_v6, %v458_v8  ;;  %v479_v13 = vpop.permute.xlu0 %478  ;;  %v491_v14 = vrot.slane %v490_v12, 1  ;;  %vm658_vm1 = vcmask 1043456  }
  0xe5   : > { %474 = vst.msk [vmem:[#allocation3 + $0x36] ss:$8 sm:$0xf] %vm3932_vm4, %v471_v10  ;;  %475 = vst.msk [vmem:[#allocation3 + $0x36] ss:$8 sm:$0x30] %vm3932_vm4, %v471_v10 }
  0xe6   : > { %463 = vst.msk [vmem:[#allocation3 + $0x35] ss:$8 sm:$0xf] %vm3932_vm4, %v460_v11  ;;  %464 = vst.msk [vmem:[#allocation3 + $0x35] ss:$8 sm:$0x30] %vm3932_vm4, %v460_v11  ;;  %v493_v16 = vsel %vm492_vm3, %v490_v12, %v491_v14 }
  0xe7   : > { %v480_v15 = vrot.slane %v479_v13, 1  ;;  %496 = vst.msk [vmem:[#allocation3 + $0x60] ss:$8 sm:$0xf] %vm3932_vm4, %v493_v16  ;;  %v512_v18 = vpop.permute.xlu1 %511  ;;  %vm659_vm2 = vcmask 1044480   ;;  %v660_v50 = vsel %vm658_vm1, 4294967295, %v3778_v49 }
  0xe8   : > { %497 = vst.msk [vmem:[#allocation3 + $0x60] ss:$8 sm:$0x30] %vm3932_vm4, %v493_v16  ;;  %v501_v19 = vpop.permute.xlu0 %500  ;;  %v513_v20 = vrot.slane %v512_v18, 1  ;;  %v661_v54 = vsel %vm659_vm2, %v660_v50, 0  ;;  %v591_v16 = vld [vmem:[#allocation3 + $0x10] sm:$0xff] }
  0xe9   : > { %v482_v17 = vsel %vm481_vm5, %v479_v13, %v480_v15  ;;  %v502_v21 = vrot.slane %v501_v19, 1  ;;  %vm838_vm3 = vcmask 261120   ;;  %vm851_vm5 = vcmask 257024  }
  0xea   : > { %485 = vst.msk [vmem:[#allocation3 + $0x37] ss:$8 sm:$0xf] %vm3932_vm4, %v482_v17  ;;  %486 = vst.msk [vmem:[#allocation3 + $0x37] ss:$8 sm:$0x30] %vm3932_vm4, %v482_v17  ;;  %v515_v22 = vsel %vm514_vm7, %v512_v18, %v513_v20 }
  0xeb   : > { %v504_v23 = vsel %vm503_vm8, %v501_v19, %v502_v21  ;;  %518 = vst.msk [vmem:[#allocation3 + $0x62] ss:$8 sm:$0xf] %vm3932_vm4, %v515_v22  ;;  %519 = vst.msk [vmem:[#allocation3 + $0x62] ss:$8 sm:$0x30] %vm3932_vm4, %v515_v22  ;;  %v534_v25 = vpop.permute.xlu1 %533 }
  0xec   : > { %507 = vst.msk [vmem:[#allocation3 + $0x61] ss:$8 sm:$0xf] %vm3932_vm4, %v504_v23  ;;  %508 = vst.msk [vmem:[#allocation3 + $0x61] ss:$8 sm:$0x30] %vm3932_vm4, %v504_v23  ;;  %v523_v24 = vpop.permute.xlu0 %522 }
  0xed   : > { %v524_v26 = vrot.slane %v523_v24, 1  ;;  %v535_v27 = vrot.slane %v534_v25, 1  ;;  %v593_v17 = vld [vmem:[#allocation3 + $0x20] sm:$0xff]  ;;  %vm1587_vm7 = vcmask 1041408   ;;  %vm1579_vm8 = vcmask 23552  }
  0xee   : > { %vm2318_vm1 = vcmask 629760   ;;  %vm2080_vm2 = vcmask 744448  }
  0xef   : > { %v526_v30 = vsel %vm525_vm9, %v523_v24, %v524_v26  ;;  %v537_v31 = vsel %vm536_vm11, %v534_v25, %v535_v27  ;;  %v556_v36 = vpop.permute.xlu1 %555  ;;  %vm1761_vm9 = vcmask 158720   ;;  %vm1768_vm11 = vcmask 781312  }
  0xf0   : > { %529 = vst.msk [vmem:[#allocation3 + $0x63] ss:$8 sm:$0xf] %vm3932_vm4, %v526_v30  ;;  %530 = vst.msk [vmem:[#allocation3 + $0x63] ss:$8 sm:$0x30] %vm3932_vm4, %v526_v30  ;;  %v545_v35 = vpop.permute.xlu0 %544 }
  0xf1   : > { %v596_v32 = vld [vmem:[#allocation3 + $0x38] sm:$0xff]  ;;  %v595_v34 = vld [vmem:[#allocation3 + $0x30] sm:$0xff]  ;;  %540 = vst.msk [vmem:[#allocation3 + $0x64] ss:$8 sm:$0xf] %vm3932_vm4, %v537_v31  ;;  %v546_v39 = vrot.slane %v545_v35, 1 }
  0xf2   : > { %541 = vst.msk [vmem:[#allocation3 + $0x64] ss:$8 sm:$0x30] %vm3932_vm4, %v537_v31  ;;  %v614_v37 = vpack.c.bf16 %v596_v32, %v590_v28  ;;  %v613_v38 = vpack.c.bf16 %v595_v34, %v589_v33  ;;  %v557_v40 = vrot.slane %v556_v36, 1  ;;  %v598_v51 = vld [vmem:[#allocation3 + $0x48] sm:$0xff]  ;;  %v600_v58 = vld [vmem:[#allocation3 + $0x58] sm:$0xff] }
  0xf3   : > { %v548_v41 = vsel %vm547_vm12, %v545_v35, %v546_v39  ;;  %v578_v44 = vpop.permute.xlu1 %577  ;;  %v616_v5 = vpack.c.bf16 %v598_v51, %v592_v0  ;;  %v597_v6 = vld [vmem:[#allocation3 + $0x40] sm:$0xff]  ;;  %v599_v7 = vld [vmem:[#allocation3 + $0x50] sm:$0xff]  ;;  %v618_v10 = vpack.c.bf16 %v600_v58, %v594_v1  ;;  %vm2216_vm12 = vcmask 654336  }
  0xf4   : > { %680 = vmatprep.subr.bf16.mxu0 %v614_v37  ;;  %3305 = vmatprep.subr.bf16.mxu1 %v614_v37  ;;  %v559_v42 = vsel %vm558_vm13, %v556_v36, %v557_v40  ;;  %551 = vst.msk [vmem:[#allocation3 + $0x65] ss:$8 sm:$0xf] %vm3932_vm4, %v548_v41  ;;  %552 = vst.msk [vmem:[#allocation3 + $0x65] ss:$8 sm:$0x30] %vm3932_vm4, %v548_v41  ;;  %v567_v43 = vpop.permute.xlu0 %566  ;;  %v615_v18 = vpack.c.bf16 %v597_v6, %v591_v16 }
  0xf5   : > { %681 = vmatpush1.bf16.msra.mxu0 %v613_v38  ;;  %3307 = vmatpush1.bf16.msra.mxu1 %v613_v38  ;;  %562 = vst.msk [vmem:[#allocation3 + $0x66] ss:$8 sm:$0xf] %vm3932_vm4, %v559_v42  ;;  %563 = vst.msk [vmem:[#allocation3 + $0x66] ss:$8 sm:$0x30] %vm3932_vm4, %v559_v42  ;;  %v617_v19 = vpack.c.bf16 %v599_v7, %v593_v17 }
  0xf6   : > { %v568_v45 = vrot.slane %v567_v43, 1  ;;  %v579_v46 = vrot.slane %v578_v44, 1  ;;  %vm2250_vm13 = vcmask 646144  }
  0xf8   : > { %v570_v47 = vsel %vm569_vm15, %v567_v43, %v568_v45  ;;  %v581_v48 = vsel %vm580_vm0, %v578_v44, %v579_v46  ;;  %vm2046_vm15 = vcmask 752640   ;;  %vm2284_vm0 = vcmask 637952  }
  0xf9   : > { %573 = vst.msk [vmem:[#allocation3 + $0x67] ss:$8 sm:$0xf] %vm3932_vm4, %v570_v47  ;;  %574 = vst.msk [vmem:[#allocation3 + $0x67] ss:$8 sm:$0x30] %vm3932_vm4, %v570_v47 }
  0xfa   : > { %584 = vst.msk [vmem:[#allocation3 + $0x90] ss:$8 sm:$0xf] %vm3932_vm4, %v581_v48  ;;  %585 = vst.msk [vmem:[#allocation3 + $0x90] ss:$8 sm:$0x30] %vm3932_vm4, %v581_v48 }
  0xfb   : > { %vm651_vm4 = vcmask 203776  }
 0x100   : > { %v602_v52 = vld [vmem:[#allocation3 + $0x68] sm:$0xff]  ;;  %v601_v55 = vld [vmem:[#allocation3 + $0x60] sm:$0xff]  ;;  %v604_v59 = vld [vmem:[#allocation3 + $0x78] sm:$0xff] }
 0x101   : > { %v608_v53 = vld [vmem:[#allocation3 + $0x98] sm:$0x1]  ;;  %v607_v57 = vld [vmem:[#allocation3 + $0x90] sm:$0x1]  ;;  %v610_v61 = vld [vmem:[#allocation3 + $0xa8] sm:$0x1] }
 0x102   : > { %v620_v56 = vpack.c.bf16 %v608_v53, %v602_v52  ;;  %v619_v60 = vpack.c.bf16 %v607_v57, %v601_v55  ;;  %v606_v62 = vld [vmem:[#allocation3 + $0x88] sm:$0xff]  ;;  %v612_v63 = vld [vmem:[#allocation3 + $0xb8] sm:$0x1]  ;;  %v603_v8 = vld [vmem:[#allocation3 + $0x70] sm:$0xff]  ;;  %v622_v11 = vpack.c.bf16 %v610_v61, %v604_v59 }
 0x103   : > { %v624_v12 = vpack.c.bf16 %v612_v63, %v606_v62  ;;  %v609_v13 = vld [vmem:[#allocation3 + $0xa0] sm:$0x1]  ;;  %v611_v15 = vld [vmem:[#allocation3 + $0xb0] sm:$0x1] }
 0x104   : > { %v666_v9 = vand.u32 %v661_v54, %v620_v56  ;;  %v663_v4 = vand.u32 %v661_v54, %v619_v60  ;;  %v605_v14 = vld [vmem:[#allocation3 + $0x80] sm:$0xff]  ;;  %v621_v20 = vpack.c.bf16 %v609_v13, %v603_v8  ;;  %v672_v22 = vand.u32 %v661_v54, %v622_v11  ;;  %v636_v26 = vpop.permute.xlu1 %635 }
 0x105   : > { %v623_v21 = vpack.c.bf16 %v611_v15, %v605_v14  ;;  %v678_v23 = vand.u32 %v661_v54, %v624_v12  ;;  %v631_v28 = vpop.permute.xlu0 %630  ;;  %v3524_v12 = vld [vmem:[%s4943_s3] ss:$8 sps:$4 sm:$0xff]   ;;  %v3526_v13 = vld [vmem:[%s4943_s3 + $0x4] ss:$8 sps:$4 sm:$0xff]   ;;  %v3529_v14 = vld [vmem:[%s4943_s3 + $0x14] ss:$8 sps:$4 sm:$0xff]  }
 0x106   : > { %682 = vmatprep.subr.bf16.mxu0 %v666_v9  ;;  %3306 = vmatprep.subr.bf16.mxu1 %v666_v9  ;;  %v669_v24 = vand.u32 %v661_v54, %v621_v20  ;;  %v3527_v20 = vld [vmem:[%s4943_s3 + $0x10] ss:$8 sps:$4 sm:$0xff]  }
 0x107   : > { %683 = vmatpush1.bf16.msra.mxu0 %v663_v4  ;;  %3308 = vmatpush1.bf16.msra.mxu1 %v663_v4  ;;  %v675_v25 = vand.u32 %v661_v54, %v623_v21 }
 0x108   : > { %731 = vmatprep.subr.bf16.mxu1 %v616_v5  ;;  %782 = vmatprep.subr.bf16.mxu0 %v618_v10  ;;  %v641_v27 = vpop.permute.xlu1 %640 }
 0x10a   : > { %3059 = vmatmul.mubr.msk.bf16.vlgmr.msra.gmra.mrb[0].mxu0 %vm651_vm4, %v3522_v2  ;;  %3060 = vmatmul.mubr.msk.bf16.vlgmr.msra.gmra.mrb[0].mxu1 %vm651_vm4, %v3523_v3 }
 0x10b   : > { %732 = vmatpush1.bf16.msra.mxu1 %v615_v18  ;;  %783 = vmatpush1.bf16.msra.mxu0 %v617_v19 }
 0x10c   : > { %733 = vmatprep.subr.bf16.mxu1 %v672_v22  ;;  %784 = vmatprep.subr.bf16.mxu0 %v678_v23  ;;  %v3532_v22 = vld [vmem:[%s4943_s3 + $0x24] ss:$8 sps:$4 sm:$0xff]   ;;  %v3530_v23 = vld [vmem:[%s4943_s3 + $0x20] ss:$8 sps:$4 sm:$0xff]  }
 0x10d   : > { %763 = vmatprep.mubr.bf16.mxu1 %v3777_v29  ;;  %814 = vmatprep.mubr.bf16.mxu0 %v3777_v29 }
 0x10f   : > { %734 = vmatpush1.bf16.msra.mxu1 %v669_v24  ;;  %785 = vmatpush1.bf16.msra.mxu0 %v675_v25  ;;  %v3535_v24 = vld [vmem:[%s4943_s3 + $0x34] ss:$8 sps:$4 sm:$0xff]   ;;  %v3533_v25 = vld [vmem:[%s4943_s3 + $0x30] ss:$8 sps:$4 sm:$0xff]  }
 0x110   : > { %1596 = vmatprep.subr.bf16.mxu1 %v3526_v13 }
 0x112   : > { %3061 = vmatmul.mubr.msk.bf16.vlgmr.msra.gmra.mrb[4].mxu1 %vm651_vm4, %v3522_v2  ;;  %3063 = vmatmul.mubr.msk.bf16.vlgmr.msra.gmra.mrb[4].mxu0 %vm651_vm4, %v3522_v2 }
 0x113   : > { %773 = vmatprep.mubr.bf16.mxu1 %v3777_v29  ;;  %824 = vmatprep.mubr.bf16.mxu0 %v3777_v29 }
 0x114   : > { %1597 = vmatpush1.bf16.msra.mxu1 %v3524_v12 }
 0x115   : > { %1598 = vmatprep.subr.bf16.mxu1 %v3529_v14 }
 0x118   : > { %1599 = vmatpush1.bf16.msra.mxu1 %v3527_v20 }
 0x119   : > { %1600 = vmatprep.subr.bf16.mxu1 %v3532_v22 }
 0x11a   : > { %3062 = vmatmul.mubr.msk.bf16.gmra.mrb[8].mxu1 %vm651_vm4, %v3523_v3  ;;  %3064 = vmatmul.mubr.msk.bf16.gmra.mrb[8].mxu0 %vm651_vm4, %v3523_v3  ;;  %vm2114_vm4 = vcmask 736256  }
 0x11c   : > { %1601 = vmatpush1.bf16.msra.mxu1 %v3530_v23 }
 0x11d   : > { %1602 = vmatprep.subr.bf16.mxu1 %v3535_v24 }
 0x120   : > { %1603 = vmatpush1.bf16.msra.mxu1 %v3533_v25 }
 0x1dd   : > { %v724_v30 = vpop.f32.mrb[0].mxu1  ;;  %v714_v31 = vpop.f32.mrb[0].mxu0 }
 0x1de   : > { %v725_v32 = vadd.f32 %v724_v30, %v641_v27  ;;  %v726_v33 = vpop.f32.mrb[1].mxu1  ;;  %v716_v34 = vpop.f32.mrb[1].mxu0  ;;  %v4064_v35 = vadd.f32 %v714_v31, %v631_v28  ;;  %v3539_v30 = vld [vmem:[%s4943_s3 + $0x50] ss:$8 sps:$4 sm:$0xff]   ;;  %v3544_v31 = vld [vmem:[%s4943_s3 + $0x64] ss:$8 sps:$4 sm:$0xff]  }
 0x1df   : > { %v727_v36 = vadd.f32 %v726_v33, %v641_v27  ;;  %v728_v37 = vpop.f32.mrb[2].mxu1  ;;  %v718_v38 = vpop.f32.mrb[2].mxu0  ;;  %v4066_v39 = vadd.f32 %v716_v34, %v631_v28  ;;  %v3547_v33 = vld [vmem:[%s4943_s3 + $0x74] ss:$8 sps:$4 sm:$0xff]   ;;  %v3545_v34 = vld [vmem:[%s4943_s3 + $0x70] ss:$8 sps:$4 sm:$0xff]  }
 0x1e0   : > { %846 = vst [vmem:[#allocation4 + $0x60] sm:$0xf] %v725_v32  ;;  %v729_v29 = vpop.f32.mrb[3].mxu1  ;;  %v4068_v40 = vadd.f32 %v718_v38, %v636_v26  ;;  %v720_v41 = vpop.f32.mrb[3].mxu0  ;;  %v3542_v32 = vld [vmem:[%s4943_s3 + $0x60] ss:$8 sps:$4 sm:$0xff]  }
 0x1e1   : > { %847 = vst [vmem:[#allocation4 + $0x68] sm:$0xf] %v727_v36  ;;  %v4070_v42 = vadd.f32 %v720_v41, %v636_v26  ;;  %v3550_v36 = vld [vmem:[%s4943_s3 + $0x84] ss:$8 sps:$4 sm:$0xff]   ;;  %v3548_v37 = vld [vmem:[%s4943_s3 + $0x80] ss:$8 sps:$4 sm:$0xff]  }
 0x1e2   : > { %v3422_v0 = vpack.i.bf16 %v4068_v40, %v4064_v35  ;;  %v3553_v38 = vld [vmem:[%s4943_s3 + $0x94] ss:$8 sps:$4 sm:$0xff]   ;;  %v3551_v29 = vld [vmem:[%s4943_s3 + $0x90] ss:$8 sps:$4 sm:$0xff]   ;;  %v3556_v41 = vld [vmem:[%s4943_s3 + $0xa4] ss:$8 sps:$4 sm:$0xff]  }
 0x1e5   : > { %v765_v43 = vpop.f32.mrb[4].mxu1  ;;  %v816_v44 = vpop.f32.mrb[4].mxu0 }
 0x1e6   : > { %v4072_v45 = vadd.f32 %v765_v43, %v631_v28  ;;  %v4074_v46 = vadd.f32 %v816_v44, %v631_v28  ;;  %v767_v47 = vpop.f32.mrb[5].mxu1  ;;  %v818_v48 = vpop.f32.mrb[5].mxu0  ;;  %v3554_v43 = vld [vmem:[%s4943_s3 + $0xa0] ss:$8 sps:$4 sm:$0xff]   ;;  %v3559_v44 = vld [vmem:[%s4943_s3 + $0xb4] ss:$8 sps:$4 sm:$0xff]  }
 0x1e7   : > { %v4076_v50 = vadd.f32 %v767_v47, %v631_v28  ;;  %v819_v51 = vadd.f32 %v818_v48, %v631_v28  ;;  %v769_v52 = vpop.f32.mrb[6].mxu1  ;;  %v820_v53 = vpop.f32.mrb[6].mxu0  ;;  %v4111_v18 = vld [vmem:[#allocation4 + $0x60] sm:$0xf]  ;;  %v3541_v28 = vld [vmem:[%s4943_s3 + $0x54] ss:$8 sps:$4 sm:$0xff]  }
 0x1e8   : > { %v4078_v54 = vadd.f32 %v769_v52, %v636_v26  ;;  %v4080_v55 = vadd.f32 %v820_v53, %v636_v26  ;;  %v771_v56 = vpop.f32.mrb[7].mxu1  ;;  %v822_v57 = vpop.f32.mrb[7].mxu0  ;;  %v3407_v58 = vpack.i.bf16 %v4072_v45, %v4066_v39  ;;  %v4105_v15 = vld [vmem:[#allocation4 + $0x68] sm:$0xf] }
 0x1e9   : > { %839 = vst.msk [vmem:[#allocation4 + $0x28] sm:$0xff] %vm838_vm3, %v819_v51  ;;  %v4084_v59 = vadd.f32 %v771_v56, %v636_v26  ;;  %v823_v60 = vadd.f32 %v822_v57, %v636_v26  ;;  %v3412_v61 = vpack.i.bf16 %v4070_v42, %v4076_v50  ;;  %v3538_v26 = vld [vmem:[%s4943_s3 + $0x44] ss:$8 sps:$4 sm:$0xff]   ;;  %v3557_v47 = vld [vmem:[%s4943_s3 + $0xb0] ss:$8 sps:$4 sm:$0xff]  }
 0x1ea   : > { %3408 = vrot.lane.b32.xlu0 %v3407_v58, %s3754_s17  ;;  %1604 = vmatprep.subr.bf16.mxu1 %v3538_v26  ;;  %v3562_v48 = vld [vmem:[%s4943_s3 + $0xc4] ss:$8 sps:$4 sm:$0xff]   ;;  %v3560_v51 = vld [vmem:[%s4943_s3 + $0xc0] ss:$8 sps:$4 sm:$0xff]   ;;  %v3565_v56 = vld [vmem:[%s4943_s3 + $0xd4] ss:$8 sps:$4 sm:$0xff]  }
 0x1eb   : > { %845 = vst.msk [vmem:[#allocation4 + $0x58] sm:$0xff] %vm838_vm3, %v823_v60  ;;  %3413 = vrot.lane.b32.xlu1 %v3412_v61, %s3754_s17  ;;  %v3417_v62 = vpack.i.bf16 %v4084_v59, %v4078_v54  ;;  %v3563_v57 = vld [vmem:[%s4943_s3 + $0xd0] ss:$8 sps:$4 sm:$0xff]   ;;  %vm2182_vm3 = vcmask 719872  }
 0x1ed   : > { %v775_v63 = vpop.f32.mrb[8].mxu1  ;;  %v826_v9 = vpop.f32.mrb[8].mxu0 }
 0x1ee   : > { %v776_v1 = vadd.f32 %v775_v63, %v641_v27  ;;  %v827_v2 = vadd.f32 %v826_v9, %v641_v27  ;;  %v777_v3 = vpop.f32.mrb[9].mxu1  ;;  %v828_v4 = vpop.f32.mrb[9].mxu0  ;;  %3418 = vrot.lane.b32.xlu0 %v3417_v62, %s3754_s17 }
 0x1ef   : > { %v778_v5 = vadd.f32 %v777_v3, %v641_v27  ;;  %v829_v6 = vadd.f32 %v828_v4, %v641_v27  ;;  %3423 = vrot.lane.b32.xlu1 %v3422_v0, %s3754_s17  ;;  %v779_v7 = vpop.f32.mrb[10].mxu1  ;;  %v830_v8 = vpop.f32.mrb[10].mxu0  ;;  %v3536_v27 = vld [vmem:[%s4943_s3 + $0x40] ss:$8 sps:$4 sm:$0xff]  }
 0x1f0   : > { %848 = vst [vmem:[#allocation4 + $0x70] sm:$0xf] %v776_v1  ;;  %850 = vst [vmem:[#allocation4 + $0x80] sm:$0xf] %v827_v2  ;;  %v780_v10 = vpop.f32.mrb[11].mxu1  ;;  %v831_v11 = vpop.f32.mrb[11].mxu0  ;;  %1605 = vmatpush1.bf16.msra.mxu1 %v3536_v27 }
 0x1f1   : > { %849 = vst [vmem:[#allocation4 + $0x78] sm:$0xf] %v778_v5  ;;  %852 = vst.msk [vmem:[#allocation4 + $0x88] sm:$0xf] %vm851_vm5, %v829_v6  ;;  %1606 = vmatprep.subr.bf16.mxu1 %v3541_v28  ;;  %v3568_v2 = vld [vmem:[%s4943_s3 + $0xe4] ss:$8 sps:$4 sm:$0xff]  }
 0x1f2   : > { %v3566_v5 = vld [vmem:[%s4943_s3 + $0xe0] ss:$8 sps:$4 sm:$0xff]   ;;  %v4240_v23 = vld [vmem:[#allocation4 + $0x28] sm:$0xff]  ;;  %vm2352_vm5 = vcmask 621568  }
 0x1f3   : > { %v3452_v24 = vpack.i.bf16 %v4240_v23, %v4074_v46 }
 0x1f4   : > { %1607 = vmatpush1.bf16.msra.mxu1 %v3539_v30 }
 0x1f5   : > { %1608 = vmatprep.subr.bf16.mxu1 %v3544_v31 }
 0x1f7   : > { %v4107_v16 = vld [vmem:[#allocation4 + $0x70] sm:$0xf]  ;;  %v4254_v26 = vld [vmem:[#allocation4 + $0x80] sm:$0xf] }
 0x1f8   : > { %v3427_v17 = vpack.i.bf16 %v4107_v16, %v4105_v15  ;;  %v4113_v19 = vld [vmem:[#allocation4 + $0x78] sm:$0xf]  ;;  %1609 = vmatpush1.bf16.msra.mxu1 %v3542_v32  ;;  %v4256_v27 = vld [vmem:[#allocation4 + $0x88] sm:$0xf] }
 0x1f9   : > { %v3432_v21 = vpack.i.bf16 %v4111_v18, %v4113_v19  ;;  %1610 = vmatprep.subr.bf16.mxu1 %v3547_v33  ;;  %v3462_v33 = vpack.i.bf16 %v4256_v27, %v4254_v26 }
 0x1fa   : > { %3428 = vrot.lane.b32.xlu0 %v3427_v17, %s3754_s17 }
 0x1fb   : > { %3433 = vrot.lane.b32.xlu1 %v3432_v21, %s3754_s17  ;;  %v3569_v21 = vld [vmem:[%s4943_s3 + $0xf0] ss:$8 sps:$4 sm:$0xff]  }
 0x1fc   : > { %1611 = vmatpush1.bf16.msra.mxu1 %v3545_v34 }
 0x1fd   : > { %1612 = vmatprep.subr.bf16.mxu1 %v3550_v36 }
 0x200   : > { %1613 = vmatpush1.bf16.msra.mxu1 %v3548_v37 }
 0x201   : > { %1614 = vmatprep.subr.bf16.mxu1 %v3553_v38 }
 0x204   : > { %1615 = vmatpush1.bf16.msra.mxu1 %v3551_v29 }
 0x205   : > { %1616 = vmatprep.subr.bf16.mxu1 %v3556_v41 }
 0x208   : > { %1617 = vmatpush1.bf16.msra.mxu1 %v3554_v43  ;;  %v3574_v43 = vld [vmem:[%s4943_s3 + $0x104] ss:$8 sps:$4 sm:$0xff]  }
 0x209   : > { %1618 = vmatprep.subr.bf16.mxu1 %v3559_v44  ;;  %v3595_v44 = vld [vmem:[%s4943_s3 + $0x204] ss:$8 sps:$4 sm:$0xff]  }
 0x20a   : > { %1698 = vmatprep.subr.bf16.mxu0 %v3595_v44 }
 0x20c   : > { %1619 = vmatpush1.bf16.msra.mxu1 %v3557_v47  ;;  %v3601_v47 = vld [vmem:[%s4943_s3 + $0x214] ss:$8 sps:$4 sm:$0xff]  }
 0x20d   : > { %1620 = vmatprep.subr.bf16.mxu1 %v3562_v48  ;;  %v3605_v48 = vld [vmem:[%s4943_s3 + $0x220] ss:$8 sps:$4 sm:$0xff]  }
 0x210   : > { %1621 = vmatpush1.bf16.msra.mxu1 %v3560_v51  ;;  %v3607_v51 = vld [vmem:[%s4943_s3 + $0x224] ss:$8 sps:$4 sm:$0xff]  }
 0x211   : > { %1622 = vmatprep.subr.bf16.mxu1 %v3565_v56  ;;  %v3613_v56 = vld [vmem:[%s4943_s3 + $0x234] ss:$8 sps:$4 sm:$0xff]  }
 0x214   : > { %1623 = vmatpush1.bf16.msra.mxu1 %v3563_v57  ;;  %v3617_v57 = vld [vmem:[%s4943_s3 + $0x240] ss:$8 sps:$4 sm:$0xff]  }
 0x215   : > { %1624 = vmatprep.subr.bf16.mxu1 %v3568_v2 }
 0x218   : > { %1625 = vmatpush1.bf16.msra.mxu1 %v3566_v5 }
 0x25c   : > { %v3409_v52 = vpop.permute.xlu0 %3408 }
 0x25d   : > { %v4188_v53 = vpop.permute.xlu1 %3413  ;;  %v3411_v58 = vunpack.i.h.bf16 %v3409_v52  ;;  %v3410_v60 = vunpack.i.l.bf16 %v3409_v52  ;;  %v3611_v52 = vld [vmem:[%s4943_s3 + $0x230] ss:$8 sps:$4 sm:$0xff]  }
 0x25e   : > { %v3415_v61 = vunpack.i.l.bf16 %v4188_v53  ;;  %v3416_v63 = vunpack.i.h.bf16 %v4188_v53 }
 0x25f   : > { %v926_v8 = vsel %vm327_vm6, %v3410_v60, %v3411_v58 }
 0x260   : > { %v4197_v62 = vpop.permute.xlu0 %3418  ;;  %v927_v10 = vsel %vm327_vm6, %v3411_v58, %v3415_v61  ;;  %v3619_v58 = vld [vmem:[%s4943_s3 + $0x244] ss:$8 sps:$4 sm:$0xff]  }
 0x261   : > { %v3421_v9 = vunpack.i.h.bf16 %v4197_v62  ;;  %v3420_v0 = vunpack.i.l.bf16 %v4197_v62  ;;  %v3424_v1 = vpop.permute.xlu1 %3423 }
 0x262   : > { %v3426_v3 = vunpack.i.h.bf16 %v3424_v1  ;;  %v3425_v4 = vunpack.i.l.bf16 %v3424_v1 }
 0x263   : > { %v931_v6 = vsel %vm327_vm6, %v3416_v63, %v3420_v0  ;;  %v932_v7 = vsel %vm327_vm6, %v3420_v0, %v3421_v9 }
 0x264   : > { %v4217_v11 = vmax.f32 %v4070_v42, %v931_v6  ;;  %v4220_v12 = vmax.f32 %v4078_v54, %v932_v7  ;;  %v925_v13 = vsel %vm327_vm6, %v3425_v4, %v3410_v60  ;;  %v930_v14 = vsel %vm327_vm6, %v3426_v3, %v3416_v63  ;;  %v3571_v42 = vld [vmem:[%s4943_s3 + $0xf4] ss:$8 sps:$4 sm:$0xff]   ;;  %v3623_v60 = vld [vmem:[%s4943_s3 + $0x250] ss:$8 sps:$4 sm:$0xff]   ;;  %v3629_v6 = vld [vmem:[%s4943_s3 + $0x260] ss:$8 sps:$4 sm:$0xff]  }
 0x265   : > { %v4225_v17 = vmax.f32 %v4064_v35, %v925_v13  ;;  %v4228_v20 = vmax.f32 %v4068_v40, %v930_v14  ;;  %v4243_v35 = vmax.f32 %v4066_v39, %v926_v8  ;;  %v4246_v40 = vmax.f32 %v4072_v45, %v927_v10  ;;  %1626 = vmatprep.subr.bf16.mxu1 %v3571_v42  ;;  %v4259_v45 = vld [vmem:[#allocation4 + $0x58] sm:$0xff] }
 0x266   : > { %v3447_v54 = vpack.i.bf16 %v4220_v12, %v4217_v11  ;;  %1627 = vmatpush1.bf16.msra.mxu1 %v3569_v21  ;;  %v3457_v34 = vpack.i.bf16 %v4259_v45, %v4080_v55  ;;  %v3625_v63 = vld [vmem:[%s4943_s3 + $0x254] ss:$8 sps:$4 sm:$0xff]   ;;  %v3631_v7 = vld [vmem:[%s4943_s3 + $0x264] ss:$8 sps:$4 sm:$0xff]  }
 0x267   : > { %v3437_v22 = vpack.i.bf16 %v4228_v20, %v4225_v17  ;;  %v3442_v25 = vpack.i.bf16 %v4246_v40, %v4243_v35  ;;  %1647 = vmatprep.subr.bf16.mxu1 %v3574_v43 }
 0x268   : > { %3448 = vrot.lane.b32.xlu1 %v3447_v54, %s4950_s21 }
 0x269   : > { %3438 = vrot.lane.b32.xlu0 %v3437_v22, %s4950_s21 }
 0x26c   : > { %v3429_v39 = vpop.permute.xlu0 %3428  ;;  %3453 = vrot.lane.b32.xlu1 %v3452_v24, %s3754_s17 }
 0x26d   : > { %v3431_v28 = vunpack.i.h.bf16 %v3429_v39  ;;  %v3430_v30 = vunpack.i.l.bf16 %v3429_v39  ;;  %v4261_v31 = vpop.permute.xlu1 %3433  ;;  %3443 = vrot.lane.b32.xlu0 %v3442_v25, %s4950_s21  ;;  %v3637_v39 = vld [vmem:[%s4943_s3 + $0x274] ss:$8 sps:$4 sm:$0xff]  }
 0x26e   : > { %v3435_v32 = vunpack.i.l.bf16 %v4261_v31  ;;  %v3436_v0 = vunpack.i.h.bf16 %v4261_v31 }
 0x26f   : > { %v936_v36 = vsel %vm327_vm6, %v3430_v30, %v3431_v28 }
 0x270   : > { %3463 = vrot.lane.b32.xlu1 %v3462_v33, %s3754_s17  ;;  %v937_v37 = vsel %vm327_vm6, %v3431_v28, %v3435_v32  ;;  %v4275_v38 = vmax.f32 %v4105_v15, %v936_v36  ;;  %v3593_v15 = vld [vmem:[%s4943_s3 + $0x200] ss:$8 sps:$4 sm:$0xff]   ;;  %v935_v13 = vsel %vm327_vm6, %v3436_v0, %v3430_v30  ;;  %v3635_v36 = vld [vmem:[%s4943_s3 + $0x270] ss:$8 sps:$4 sm:$0xff]  }
 0x271   : > { %3458 = vrot.lane.b32.xlu0 %v3457_v34, %s3754_s17  ;;  %v4279_v29 = vmax.f32 %v4107_v16, %v937_v37  ;;  %1699 = vmatpush1.bf16.msra.mxu0 %v3593_v15  ;;  %v3599_v16 = vld [vmem:[%s4943_s3 + $0x210] ss:$8 sps:$4 sm:$0xff]   ;;  %v4351_v33 = vmax.f32 %v4111_v18, %v935_v13 }
 0x272   : > { %1700 = vmatprep.subr.bf16.mxu0 %v3601_v47 }
 0x273   : > { %v3467_v41 = vpack.i.bf16 %v4279_v29, %v4275_v38 }
 0x275   : > { %3468 = vrot.lane.b32.xlu0 %v3467_v41, %s4950_s21  ;;  %1701 = vmatpush1.bf16.msra.mxu0 %v3599_v16 }
 0x276   : > { %1702 = vmatprep.subr.bf16.mxu0 %v3607_v51 }
 0x279   : > { %1703 = vmatpush1.bf16.msra.mxu0 %v3605_v48  ;;  %v1173_v48 = vld [vmem:[%s4943_s3 + $0x280] sm:$0x33] }
 0x27a   : > { %1704 = vmatprep.subr.bf16.mxu0 %v3613_v56 }
 0x27d   : > { %1705 = vmatpush1.bf16.msra.mxu0 %v3611_v52 }
 0x27e   : > { %1706 = vmatprep.subr.bf16.mxu0 %v3619_v58 }
 0x281   : > { %1707 = vmatpush1.bf16.msra.mxu0 %v3617_v57 }
 0x282   : > { %1708 = vmatprep.subr.bf16.mxu0 %v3625_v63 }
 0x285   : > { %1709 = vmatpush1.bf16.msra.mxu0 %v3623_v60 }
 0x286   : > { %1710 = vmatprep.subr.bf16.mxu0 %v3631_v7 }
 0x289   : > { %1711 = vmatpush1.bf16.msra.mxu0 %v3629_v6  ;;  %v3580_v6 = vld [vmem:[%s4943_s3 + $0x124] ss:$8 sps:$4 sm:$0xff]  }
 0x28a   : > { %1712 = vmatprep.subr.bf16.mxu0 %v3637_v39  ;;  %v3586_v39 = vld [vmem:[%s4943_s3 + $0x144] ss:$8 sps:$4 sm:$0xff]  }
 0x28d   : > { %1713 = vmatpush1.bf16.msra.mxu0 %v3635_v36  ;;  %v3590_v36 = vld [vmem:[%s4943_s3 + $0x160] ss:$8 sps:$4 sm:$0xff]  }
 0x2da   : > { %v4324_v1 = vpop.permute.xlu1 %3448 }
 0x2db   : > { %v3451_v2 = vunpack.i.h.bf16 %v4324_v1  ;;  %v3450_v3 = vunpack.i.l.bf16 %v4324_v1  ;;  %v3439_v4 = vpop.permute.xlu0 %3438 }
 0x2dc   : > { %v3441_v5 = vunpack.i.h.bf16 %v3439_v4  ;;  %v3440_v22 = vunpack.i.l.bf16 %v3439_v4 }
 0x2dd   : > { %v1036_v14 = vsel %vm371_vm10, %v3450_v3, %v3451_v2 }
 0x2de   : > { %v1035_v8 = vsel %vm371_vm10, %v3441_v5, %v3450_v3  ;;  %v3454_v10 = vpop.permute.xlu1 %3453  ;;  %v1070_v34 = vmax.f32 %v4217_v11, %v1036_v14  ;;  %v3146_v5 = vcombine.high %v1173_v48, %v1173_v48 }
 0x2df   : > { %v3456_v21 = vunpack.i.h.bf16 %v3454_v10  ;;  %v3455_v42 = vunpack.i.l.bf16 %v3454_v10  ;;  %v4339_v54 = vpop.permute.xlu0 %3443  ;;  %v1069_v28 = vmax.f32 %v4228_v20, %v1035_v8 }
 0x2e0   : > { %v3446_v24 = vunpack.i.h.bf16 %v4339_v54  ;;  %v3445_v25 = vunpack.i.l.bf16 %v4339_v54 }
 0x2e1   : > { %v928_v30 = vsel %vm327_vm6, %v3415_v61, %v3455_v42  ;;  %v929_v18 = vsel %vm327_vm6, %v3455_v42, %v3456_v21  ;;  %v4384_v57 = vmax.f32 %v4240_v23, %v3456_v21 }
 0x2e2   : > { %v1030_v37 = vsel %vm371_vm10, %v3440_v22, %v3445_v25  ;;  %v4358_v41 = vpop.permute.xlu1 %3463  ;;  %v4361_v43 = vmax.f32 %v4076_v50, %v928_v30  ;;  %v1031_v53 = vsel %vm371_vm10, %v3445_v25, %v3446_v24  ;;  %v4392_v31 = vmax.f32 %v4074_v46, %v929_v18  ;;  %v3578_v22 = vld [vmem:[%s4943_s3 + $0x120] ss:$8 sps:$4 sm:$0xff]   ;;  %v3581_v25 = vld [vmem:[%s4943_s3 + $0x130] ss:$8 sps:$4 sm:$0xff]  }
 0x2e3   : > { %v1063_v61 = vmax.f32 %v4225_v17, %v1030_v37  ;;  %v3466_v11 = vunpack.i.h.bf16 %v4358_v41  ;;  %v3465_v20 = vunpack.i.l.bf16 %v4358_v41  ;;  %v3459_v15 = vpop.permute.xlu0 %3458  ;;  %v1064_v44 = vmax.f32 %v4243_v35, %v1031_v53  ;;  %v3572_v35 = vld [vmem:[%s4943_s3 + $0x100] ss:$8 sps:$4 sm:$0xff]   ;;  %v3587_v30 = vld [vmem:[%s4943_s3 + $0x150] ss:$8 sps:$4 sm:$0xff]   ;;  %v3598_v37 = vld [vmem:[%s4943_s3 + $0x174] ss:$8 sps:$4 sm:$0xff]  }
 0x2e4   : > { %v3461_v16 = vunpack.i.h.bf16 %v3459_v15  ;;  %v3460_v50 = vunpack.i.l.bf16 %v3459_v15  ;;  %v3472_v47 = vpack.i.bf16 %v4361_v43, %v4351_v33  ;;  %v3596_v41 = vld [vmem:[%s4943_s3 + $0x170] ss:$8 sps:$4 sm:$0xff]   ;;  %v3604_v53 = vld [vmem:[%s4943_s3 + $0x184] ss:$8 sps:$4 sm:$0xff]   ;;  %v3602_v18 = vld [vmem:[%s4943_s3 + $0x180] ss:$8 sps:$4 sm:$0xff]  }
 0x2e5   : > { %v1081_v51 = vpack.c.bf16 %v1069_v28, %v1063_v61  ;;  %v1082_v52 = vpack.c.bf16 %v1070_v34, %v1064_v44  ;;  %v938_v17 = vsel %vm327_vm6, %v3435_v32, %v3465_v20  ;;  %v939_v56 = vsel %vm327_vm6, %v3465_v20, %v3466_v11  ;;  %v3577_v32 = vld [vmem:[%s4943_s3 + $0x114] ss:$8 sps:$4 sm:$0xff]   ;;  %v3584_v28 = vld [vmem:[%s4943_s3 + $0x140] ss:$8 sps:$4 sm:$0xff]   ;;  %v3592_v34 = vld [vmem:[%s4943_s3 + $0x164] ss:$8 sps:$4 sm:$0xff]  }
 0x2e6   : > { %3473 = vrot.lane.b32.xlu1 %v3472_v47, %s4950_s21  ;;  %v934_v58 = vsel %vm327_vm6, %v3460_v50, %v3461_v16  ;;  %v933_v60 = vsel %vm327_vm6, %v3421_v9, %v3460_v50  ;;  %v4406_v62 = vmax.f32 %v4113_v19, %v938_v17  ;;  %v3145_v9 = vcombine.low %v1173_v48, %v1173_v48  ;;  %v3575_v19 = vld [vmem:[%s4943_s3 + $0x110] ss:$8 sps:$4 sm:$0xff]   ;;  %v3610_v61 = vld [vmem:[%s4943_s3 + $0x194] ss:$8 sps:$4 sm:$0xff]   ;;  %v3616_v20 = vld [vmem:[%s4943_s3 + $0x1a4] ss:$8 sps:$4 sm:$0xff]  }
 0x2e7   : > { %v4397_v63 = vpop.permute.xlu0 %3468  ;;  %1628 = vmatprep.mubr.bf16.mxu1 %v1082_v52  ;;  %v4400_v23 = vmax.f32 %v4080_v55, %v934_v58  ;;  %v4403_v0 = vmax.f32 %v4084_v59, %v933_v60  ;;  %v4411_v4 = vmax.f32 %v4254_v26, %v939_v56  ;;  %vm1586_vm6 = vcmask 1040384   ;;  %v3614_v15 = vld [vmem:[%s4943_s3 + $0x1a0] ss:$8 sps:$4 sm:$0xff]   ;;  %v3622_v44 = vld [vmem:[%s4943_s3 + $0x1b4] ss:$8 sps:$4 sm:$0xff]  }
 0x2e8   : > { %v3471_v46 = vunpack.i.h.bf16 %v4397_v63  ;;  %v3470_v3 = vunpack.i.l.bf16 %v4397_v63  ;;  %1629 = vmatmul.mubr.bf16.vlgmr.msra.gmra.mrb[12].mxu1 %v1081_v51  ;;  %v1588_v7 = vsel %vm1586_vm6, 4294967295, %v3778_v49  ;;  %v4440_v42 = vmax.f32 %v4259_v45, %v3461_v16  ;;  %v3620_v16 = vld [vmem:[%s4943_s3 + $0x1b0] ss:$8 sps:$4 sm:$0xff]   ;;  %v3628_v50 = vld [vmem:[%s4943_s3 + $0x1c4] ss:$8 sps:$4 sm:$0xff]  }
 0x2e9   : > { %v3482_v55 = vpack.i.bf16 %v4384_v57, %v4400_v23  ;;  %v3477_v59 = vpack.i.bf16 %v4403_v0, %v4392_v31  ;;  %1648 = vmatpush1.bf16.msra.mxu1 %v3572_v35  ;;  %v4433_v10 = vsel %vm1587_vm7, %v1588_v7, 0  ;;  %v3487_v21 = vpack.i.bf16 %v4411_v4, %v4406_v62  ;;  %v3626_v47 = vld [vmem:[%s4943_s3 + $0x1c0] ss:$8 sps:$4 sm:$0xff]   ;;  %v3634_v48 = vld [vmem:[%s4943_s3 + $0x1d4] ss:$8 sps:$4 sm:$0xff]  }
 0x2ea   : > { %v1041_v26 = vsel %vm371_vm10, %v3470_v3, %v3471_v46  ;;  %1649 = vmatprep.subr.bf16.mxu1 %v3577_v32  ;;  %v1594_v13 = vand.u32 %v3146_v5, %v4433_v10  ;;  %v1591_v14 = vand.u32 %v3145_v9, %v4433_v10  ;;  %v4452_v45 = vmax.f32 %v4256_v27, %v3466_v11  ;;  %v3589_v27 = vld [vmem:[%s4943_s3 + $0x154] ss:$8 sps:$4 sm:$0xff]   ;;  %v3608_v11 = vld [vmem:[%s4943_s3 + $0x190] ss:$8 sps:$4 sm:$0xff]   ;;  %v3640_v52 = vld [vmem:[%s4943_s3 + $0x1e4] ss:$8 sps:$4 sm:$0xff]  }
 0x2eb   : > { %3483 = vrot.lane.b32.xlu1 %v3482_v55, %s4950_s21  ;;  %3478 = vrot.lane.b32.xlu0 %v3477_v59, %s4950_s21  ;;  %v1076_v8 = vmax.f32 %v4275_v38, %v1041_v26  ;;  %v3583_v38 = vld [vmem:[%s4943_s3 + $0x134] ss:$8 sps:$4 sm:$0xff]   ;;  %v3632_v51 = vld [vmem:[%s4943_s3 + $0x1d0] ss:$8 sps:$4 sm:$0xff]   ;;  %vm2583_vm6 = vcmask 949248  }
 0x2ec   : > { %1714 = vmatprep.subr.bf16.mxu0 %v1594_v13  ;;  %v3638_v17 = vld [vmem:[%s4943_s3 + $0x1e0] ss:$8 sps:$4 sm:$0xff]   ;;  %v3645_v56 = vld [vmem:[%s4943_s3 + $0x1f4] ss:$8 sps:$4 sm:$0xff]   ;;  %v3643_v35 = vld [vmem:[%s4943_s3 + $0x1f0] ss:$8 sps:$4 sm:$0xff]  }
 0x2ed   : > { %v1088_v49 = vpack.c.bf16 %v1076_v8, %v1076_v8  ;;  %1650 = vmatpush1.bf16.msra.mxu1 %v3575_v19  ;;  %1715 = vmatpush1.bf16.msra.mxu0 %v1591_v14 }
 0x2ee   : > { %1651 = vmatprep.subr.bf16.mxu1 %v3580_v6 }
 0x2ef   : > { %3488 = vrot.lane.b32.xlu1 %v3487_v21, %s4950_s21  ;;  %1016 = vrot.lane.b32.xlu0 %v4440_v42, %s4950_s21 }
 0x2f0   : > { %1638 = vmatprep.mubr.bf16.mxu1 %v1088_v49 }
 0x2f1   : > { %1652 = vmatpush1.bf16.msra.mxu1 %v3578_v22 }
 0x2f2   : > { %1653 = vmatprep.subr.bf16.mxu1 %v3583_v38 }
 0x2f3   : > { %1028 = vrot.lane.b32.xlu0 %v4452_v45, %s4950_s21 }
 0x2f5   : > { %1654 = vmatpush1.bf16.msra.mxu1 %v3581_v25 }
 0x2f6   : > { %1655 = vmatprep.subr.bf16.mxu1 %v3586_v39 }
 0x2f9   : > { %1656 = vmatpush1.bf16.msra.mxu1 %v3584_v28 }
 0x2fa   : > { %1657 = vmatprep.subr.bf16.mxu1 %v3589_v27 }
 0x2fd   : > { %1658 = vmatpush1.bf16.msra.mxu1 %v3587_v30 }
 0x2fe   : > { %1659 = vmatprep.subr.bf16.mxu1 %v3592_v34 }
 0x301   : > { %1660 = vmatpush1.bf16.msra.mxu1 %v3590_v36 }
 0x302   : > { %1661 = vmatprep.subr.bf16.mxu1 %v3598_v37 }
 0x305   : > { %1662 = vmatpush1.bf16.msra.mxu1 %v3596_v41 }
 0x306   : > { %1663 = vmatprep.subr.bf16.mxu1 %v3604_v53 }
 0x309   : > { %1664 = vmatpush1.bf16.msra.mxu1 %v3602_v18 }
 0x30a   : > { %1665 = vmatprep.subr.bf16.mxu1 %v3610_v61 }
 0x30d   : > { %1666 = vmatpush1.bf16.msra.mxu1 %v3608_v11 }
 0x30e   : > { %1667 = vmatprep.subr.bf16.mxu1 %v3616_v20 }
 0x311   : > { %1668 = vmatpush1.bf16.msra.mxu1 %v3614_v15 }
 0x312   : > { %1669 = vmatprep.subr.bf16.mxu1 %v3622_v44 }
 0x315   : > { %1670 = vmatpush1.bf16.msra.mxu1 %v3620_v16 }
 0x316   : > { %1671 = vmatprep.subr.bf16.mxu1 %v3628_v50 }
 0x319   : > { %1672 = vmatpush1.bf16.msra.mxu1 %v3626_v47 }
 0x31a   : > { %1673 = vmatprep.subr.bf16.mxu1 %v3634_v48 }
 0x31d   : > { %1674 = vmatpush1.bf16.msra.mxu1 %v3632_v51 }
 0x31e   : > { %1675 = vmatprep.subr.bf16.mxu1 %v3640_v52 }
 0x321   : > { %1676 = vmatpush1.bf16.msra.mxu1 %v3638_v17 }
 0x322   : > { %1677 = vmatprep.subr.bf16.mxu1 %v3645_v56 }
 0x325   : > { %1678 = vmatpush1.bf16.msra.mxu1 %v3643_v35 }
 0x358   : > { %v3474_v58 = vpop.permute.xlu1 %3473 }
 0x359   : > { %v3475_v60 = vunpack.i.l.bf16 %v3474_v58  ;;  %v3476_v5 = vunpack.i.h.bf16 %v3474_v58 }
 0x35b   : > { %v1040_v32 = vsel %vm371_vm10, %v3475_v60, %v3470_v3 }
 0x35c   : > { %v1075_v9 = vmax.f32 %v4351_v33, %v1040_v32  ;;  %v1032_v33 = vsel %vm371_vm10, %v3446_v24, %v3476_v5 }
 0x35d   : > { %v3484_v55 = vpop.permute.xlu1 %3483  ;;  %v3479_v59 = vpop.permute.xlu0 %3478  ;;  %v1065_v36 = vmax.f32 %v4246_v40, %v1032_v33 }
 0x35e   : > { %v3486_v19 = vunpack.i.h.bf16 %v3484_v55  ;;  %v3485_v26 = vunpack.i.l.bf16 %v3484_v55  ;;  %v3481_v6 = vunpack.i.h.bf16 %v3479_v59  ;;  %v3480_v7 = vunpack.i.l.bf16 %v3479_v59 }
 0x35f   : > { %v1087_v8 = vpack.c.bf16 %v1075_v9, %v1075_v9 }
 0x360   : > { %v1037_v13 = vsel %vm371_vm10, %v3451_v2, %v3481_v6  ;;  %v1034_v14 = vsel %vm371_vm10, %v3480_v7, %v3486_v19  ;;  %v1033_v21 = vsel %vm371_vm10, %v3476_v5, %v3480_v7  ;;  %v1068_v3 = vmax.f32 %v4384_v57, %v3486_v19 }
 0x361   : > { %1639 = vmatmul.mubr.bf16.gmra.mrb[16].mxu1 %v1087_v8  ;;  %v3489_v49 = vpop.permute.xlu1 %3488  ;;  %v1017_v22 = vpop.permute.xlu0 %1016  ;;  %v1038_v38 = vsel %vm371_vm10, %v3481_v6, %v3485_v26  ;;  %v1066_v1 = vmax.f32 %v4361_v43, %v1033_v21  ;;  %v1071_v27 = vmax.f32 %v4220_v12, %v1037_v13  ;;  %v1067_v54 = vmax.f32 %v4392_v31, %v1034_v14 }
 0x362   : > { %v3491_v25 = vunpack.i.h.bf16 %v3489_v49  ;;  %v3490_v2 = vunpack.i.l.bf16 %v3489_v49  ;;  %v1039_v39 = vsel %vm371_vm10, %v3485_v26, %v1017_v22  ;;  %v1074_v28 = vmax.f32 %v4440_v42, %v1017_v22 }
 0x363   : > { %v1073_v24 = vmax.f32 %v4400_v23, %v1039_v39  ;;  %v1072_v57 = vmax.f32 %v4403_v0, %v1038_v38  ;;  %v1083_v31 = vpack.c.bf16 %v1071_v27, %v1065_v36 }
 0x364   : > { %v1086_v30 = vpack.c.bf16 %v1074_v28, %v1068_v3  ;;  %v1043_v34 = vsel %vm371_vm10, %v3490_v2, %v3491_v25  ;;  %v1042_v40 = vsel %vm371_vm10, %v3471_v46, %v3490_v2 }
 0x365   : > { %v1085_v43 = vpack.c.bf16 %v1073_v24, %v1067_v54  ;;  %v1029_v37 = vpop.permute.xlu0 %1028  ;;  %v1084_v41 = vpack.c.bf16 %v1072_v57, %v1066_v1  ;;  %v1078_v53 = vmax.f32 %v4406_v62, %v1043_v34  ;;  %v1077_v62 = vmax.f32 %v4279_v29, %v1042_v40 }
 0x366   : > { %v1044_v42 = vsel %vm371_vm10, %v3491_v25, %v1029_v37  ;;  %v1080_v12 = vmax.f32 %v4452_v45, %v1029_v37  ;;  %3147 = vmatprep.mubr.msk.bf16.mxu0 %vm1579_vm8, %v1086_v30  ;;  %vm1756_vm10 = vcmask 162816  }
 0x367   : > { %1679 = vmatprep.mubr.bf16.mxu1 %v1084_v41  ;;  %1731 = vmatmul.mubr.bf16.vlgmr.msra.gmra.mrb[12].mxu0 %v1085_v43  ;;  %v1090_v23 = vpack.c.bf16 %v1078_v53, %v1078_v53  ;;  %v1079_v18 = vmax.f32 %v4411_v4, %v1044_v42  ;;  %v1089_v61 = vpack.c.bf16 %v1077_v62, %v1077_v62 }
 0x368   : > { %v1092_v0 = vpack.c.bf16 %v1080_v12, %v1080_v12 }
 0x369   : > { %1680 = vmatmul.mubr.bf16.vlgmr.msra.gmra.mrb[12].mxu1 %v1083_v31  ;;  %v1091_v45 = vpack.c.bf16 %v1079_v18, %v1079_v18 }
 0x36a   : > { %1689 = vmatprep.mubr.bf16.mxu1 %v1090_v23  ;;  %3148 = vmatprep.mubr.msk.bf16.mxu0 %vm1579_vm8, %v1092_v0  ;;  %vm2148_vm8 = vcmask 728064  }
 0x36f   : > { %1741 = vmatmul.mubr.bf16.gmra.mrb[16].mxu0 %v1091_v45 }
 0x371   : > { %1690 = vmatmul.mubr.bf16.gmra.mrb[16].mxu1 %v1089_v61 }
 0x43a   : > { %v1732_v11 = vpop.f32.mrb[12].mxu0 }
 0x43b   : > { %v1734_v20 = vpop.f32.mrb[13].mxu0 }
 0x43c   : > { %v1681_v15 = vpop.f32.mrb[12].mxu1  ;;  %v1736_v44 = vpop.f32.mrb[14].mxu0 }
 0x43d   : > { %v3309_v16 = vadd.f32 %v1732_v11, %v1681_v15  ;;  %v1683_v63 = vpop.f32.mrb[13].mxu1  ;;  %v1738_v50 = vpop.f32.mrb[15].mxu0  ;;  %v3648_v15 = vld [vmem:[#allocation9 + $0x4] ss:$16 sps:$4 sm:$0xff]  }
 0x43e   : > { %v3310_v46 = vadd.f32 %v1734_v20, %v1683_v63  ;;  %v1685_v47 = vpop.f32.mrb[14].mxu1  ;;  %2631 = vmatprep.mubr.bf16.mxu0 %v3648_v15  ;;  %v2476_v15 = vld [vmem:[%s4945_s5 + $0x28] sm:$0xff] }
 0x43f   : > { %v4564_v48 = vmax.f32 %v3309_v16, 0.0  ;;  %v3311_v4 = vadd.f32 %v1736_v44, %v1685_v47  ;;  %v1687_v51 = vpop.f32.mrb[15].mxu1 }
 0x440   : > { %v1750_v52 = vmax.f32 %v3310_v46, 0.0  ;;  %v3312_v29 = vadd.f32 %v1738_v50, %v1687_v51 }
 0x441   : > { %1766 = vst.msk [vmem:[#allocation6] sm:$0xff] %vm415_vm14, %v4564_v48  ;;  %v4568_v17 = vmax.f32 %v3311_v4, 0.0  ;;  %1884 = vrot.lane.b32.xlu1 %v4564_v48, %s3779_s14  ;;  %1776 = vrot.lane.b32.xlu0 %v4564_v48, %s3754_s17 }
 0x442   : > { %1757 = vst.msk [vmem:[#allocation5 + $0x8] sm:$0xff] %vm1756_vm10, %v1750_v52  ;;  %v1752_v56 = vmax.f32 %v3312_v29, 0.0  ;;  %v1742_v35 = vpop.f32.mrb[16].mxu0 }
 0x443   : > { %1767 = vst.msk [vmem:[#allocation6 + $0x8] sm:$0xff] %vm415_vm14, %v4568_v17  ;;  %v1744_v58 = vpop.f32.mrb[17].mxu0 }
 0x444   : > { %1759 = vst.msk [vmem:[#allocation5 + $0x18] sm:$0xff] %vm1756_vm10, %v1752_v56  ;;  %v1691_v60 = vpop.f32.mrb[16].mxu1  ;;  %v1746_v32 = vpop.f32.mrb[18].mxu0  ;;  %vm2968_vm10 = vcmask 122880  }
 0x445   : > { %v3313_v9 = vadd.f32 %v1742_v35, %v1691_v60  ;;  %v1693_v5 = vpop.f32.mrb[17].mxu1  ;;  %v1747_v55 = vpop.f32.mrb[19].mxu0  ;;  %1794 = vrot.lane.b32.xlu1 %v4564_v48, %s3756_s19  ;;  %1902 = vrot.lane.b32.xlu0 %v4564_v48, %s3780_s28 }
 0x446   : > { %v3314_v59 = vadd.f32 %v1744_v58, %v1693_v5  ;;  %v1695_v19 = vpop.f32.mrb[18].mxu1 }
 0x447   : > { %v1753_v26 = vmax.f32 %v3313_v9, 0.0  ;;  %v1696_v6 = vpop.f32.mrb[19].mxu1 }
 0x448   : > { %v1754_v7 = vmax.f32 %v3314_v59, 0.0 }
 0x449   : > { %1760 = vst [vmem:[#allocation5 + $0x20] sm:$0xf] %v1753_v26  ;;  %1920 = vrot.lane.b32.xlu1 %v4564_v48, %s3781_s30  ;;  %1956 = vrot.lane.b32.xlu0 %v4564_v48, %s3782_s8  ;;  %v4601_v13 = vld [vmem:[#allocation5 + $0x8] sm:$0xff] }
 0x44a   : > { %1762 = vst.msk [vmem:[#allocation5 + $0x28] sm:$0xf] %vm1761_vm9, %v1754_v7 }
 0x44b   : > { %v4659_v14 = vld [vmem:[#allocation5 + $0x18] sm:$0xff] }
 0x44d   : > { %1812 = vrot.lane.b32.xlu1 %v4564_v48, %s3753_s16  ;;  %1848 = vrot.lane.b32.xlu0 %v4564_v48, %s3783_s15 }
 0x450   : > { %v1765_v8 = vld [vmem:[#allocation5 + $0x20] sm:$0xf] }
 0x451   : > { %1769 = vst.msk [vmem:[#allocation6 + $0x10] sm:$0xf] %vm1768_vm11, %v1765_v8  ;;  %1938 = vrot.lane.b32.xlu1 %v4564_v48, %s3784_s20  ;;  %1974 = vrot.lane.b32.xlu0 %v4564_v48, %s3785_s22  ;;  %v1862_v21 = vld [vmem:[#allocation5 + $0x20] sm:$0xf]  ;;  %v2197_v6 = vld [vmem:[#allocation5 + $0x28] sm:$0xf] }
 0x452   : > { %v1772_v33 = vld [vmem:[#allocation5 + $0x20] sm:$0xf]  ;;  %v2163_v7 = vld [vmem:[#allocation5 + $0x28] sm:$0xf] }
 0x453   : > { %v1898_v22 = vld [vmem:[#allocation5 + $0x20] sm:$0xf] }
 0x454   : > { %v1790_v25 = vld [vmem:[#allocation5 + $0x20] sm:$0xf] }
 0x455   : > { %1830 = vrot.lane.b32.xlu1 %v4564_v48, %s3755_s18  ;;  %2170 = vrot.lane.b32.xlu0 %v4564_v48, %s3786_s23  ;;  %v1880_v28 = vld [vmem:[#allocation5 + $0x20] sm:$0xf] }
 0x456   : > { %v1916_v27 = vld [vmem:[#allocation5 + $0x20] sm:$0xf] }
 0x457   : > { %v1808_v57 = vld [vmem:[#allocation5 + $0x20] sm:$0xf] }
 0x458   : > { %v1952_v30 = vld [vmem:[#allocation5 + $0x20] sm:$0xf] }
 0x459   : > { %1866 = vrot.lane.b32.xlu1 %v4564_v48, %s3787_s25  ;;  %2010 = vrot.lane.b32.xlu0 %v4564_v48, %s4950_s21  ;;  %s4952_s21 = smov 90   ;;  %v1934_v43 = vld [vmem:[#allocation5 + $0x20] sm:$0xf] }
 0x45a   : > { %v1844_v37 = vld [vmem:[#allocation5 + $0x20] sm:$0xf] }
 0x45b   : > { %v1826_v42 = vld [vmem:[#allocation5 + $0x20] sm:$0xf] }
 0x45c   : > { %v2162_v12 = vld [vmem:[#allocation5 + $0x20] sm:$0xf] }
 0x45d   : > { %1992 = vrot.lane.b32.xlu1 %v4564_v48, %s3788_s29  ;;  %2206 = vrot.lane.b32.xlu0 %v4601_v13, %s3789_s9  ;;  %v1988_v0 = vld [vmem:[#allocation5 + $0x20] sm:$0xf] }
 0x45e   : > { %v1970_v40 = vld [vmem:[#allocation5 + $0x20] sm:$0xf] }
 0x45f   : > { %v2196_v45 = vld [vmem:[#allocation5 + $0x20] sm:$0xf] }
 0x460   : > { %v2006_v61 = vld [vmem:[#allocation5 + $0x20] sm:$0xf] }
 0x461   : > { %2204 = vrot.lane.b32.xlu1 %v4564_v48, %s3789_s9  ;;  %2240 = vrot.lane.b32.xlu0 %v4601_v13, %s3790_s10  ;;  %v2230_v16 = vld [vmem:[#allocation5 + $0x20] sm:$0xf] }
 0x462   : > { %v2026_v47 = vld [vmem:[#allocation5 + $0x20] sm:$0xf] }
 0x463   : > { %v2264_v29 = vld [vmem:[#allocation5 + $0x20] sm:$0xf] }
 0x464   : > { %v2298_v60 = vld [vmem:[#allocation5 + $0x20] sm:$0xf] }
 0x465   : > { %2238 = vrot.lane.b32.xlu1 %v4564_v48, %s3790_s10  ;;  %2036 = vrot.lane.b32.xlu0 %v4601_v13, %s3791_s26  ;;  %v2060_v55 = vld [vmem:[#allocation5 + $0x20] sm:$0xf] }
 0x469   : > { %2034 = vrot.lane.b32.xlu1 %v4564_v48, %s3791_s26  ;;  %2274 = vrot.lane.b32.xlu0 %v4601_v13, %s3792_s11 }
 0x46d   : > { %2272 = vrot.lane.b32.xlu1 %v4564_v48, %s3792_s11  ;;  %2308 = vrot.lane.b32.xlu0 %v4601_v13, %s3793_s12 }
 0x471   : > { %2306 = vrot.lane.b32.xlu1 %v4564_v48, %s3793_s12  ;;  %2070 = vrot.lane.b32.xlu0 %v4601_v13, %s3794_s13 }
 0x475   : > { %2068 = vrot.lane.b32.xlu1 %v4564_v48, %s3794_s13  ;;  %2104 = vrot.lane.b32.xlu0 %v4601_v13, %s4952_s21 }
 0x479   : > { %2102 = vrot.lane.b32.xlu1 %v4564_v48, %s4952_s21  ;;  %1886 = vrot.lane.b32.xlu0 %v4568_v17, %s3779_s14  ;;  %s4963_s21 = smov 100  }
 0x47d   : > { %2172 = vrot.lane.b32.xlu1 %v4601_v13, %s3786_s23  ;;  %1922 = vrot.lane.b32.xlu0 %v4568_v17, %s3781_s30 }
 0x481   : > { %1868 = vrot.lane.b32.xlu1 %v4568_v17, %s3787_s25  ;;  %1814 = vrot.lane.b32.xlu0 %v4568_v17, %s3753_s16 }
 0x485   : > { %1940 = vrot.lane.b32.xlu0 %v4568_v17, %s3784_s20  ;;  %1778 = vrot.lane.b32.xlu1 %v4568_v17, %s3754_s17 }
 0x489   : > { %1832 = vrot.lane.b32.xlu0 %v4568_v17, %s3755_s18  ;;  %1904 = vrot.lane.b32.xlu1 %v4568_v17, %s3780_s28 }
 0x48d   : > { %2174 = vrot.lane.b32.xlu0 %v4568_v17, %s3786_s23  ;;  %1796 = vrot.lane.b32.xlu1 %v4568_v17, %s3756_s19 }
 0x491   : > { %1994 = vrot.lane.b32.xlu0 %v4568_v17, %s3788_s29  ;;  %1958 = vrot.lane.b32.xlu1 %v4568_v17, %s3782_s8 }
 0x495   : > { %1850 = vrot.lane.b32.xlu1 %v4568_v17, %s3783_s15  ;;  %2210 = vrot.lane.b32.xlu0 %v4659_v14, %s3789_s9 }
 0x499   : > { %1976 = vrot.lane.b32.xlu1 %v4568_v17, %s3785_s22  ;;  %2244 = vrot.lane.b32.xlu0 %v4659_v14, %s3790_s10 }
 0x49d   : > { %2208 = vrot.lane.b32.xlu1 %v4568_v17, %s3789_s9  ;;  %2040 = vrot.lane.b32.xlu0 %v4659_v14, %s3791_s26 }
 0x4a1   : > { %2242 = vrot.lane.b32.xlu1 %v4568_v17, %s3790_s10  ;;  %2278 = vrot.lane.b32.xlu0 %v4659_v14, %s3792_s11 }
 0x4a5   : > { %2012 = vrot.lane.b32.xlu1 %v4568_v17, %s4963_s21  ;;  %2074 = vrot.lane.b32.xlu0 %v4659_v14, %s3794_s13 }
 0x4a9   : > { %2038 = vrot.lane.b32.xlu1 %v4568_v17, %s3791_s26  ;;  %2312 = vrot.lane.b32.xlu0 %v4659_v14, %s3793_s12 }
 0x4ad   : > { %2276 = vrot.lane.b32.xlu1 %v4568_v17, %s3792_s11  ;;  %1870 = vrot.lane.b32.xlu0 %v1862_v21, %s3787_s25 }
 0x4b1   : > { %2072 = vrot.lane.b32.xlu1 %v4568_v17, %s3794_s13  ;;  %1780 = vrot.lane.b32.xlu0 %v1772_v33, %s3754_s17 }
 0x4b3   : > { %v1885_v3 = vpop.permute.xlu1 %1884  ;;  %v1777_v49 = vpop.permute.xlu0 %1776 }
 0x4b4   : > { %1893 = vst.msk [vmem:[#allocation6 + $0x8c] sm:$0xff] %vm415_vm14, %v1885_v3  ;;  %1785 = vst.msk [vmem:[#allocation6 + $0x14] sm:$0xff] %vm415_vm14, %v1777_v49 }
 0x4b5   : > { %2310 = vrot.lane.b32.xlu1 %v4568_v17, %s3793_s12  ;;  %1906 = vrot.lane.b32.xlu0 %v1898_v22, %s3780_s28  ;;  %v2027_v22 = vld [vmem:[#allocation5 + $0x28] sm:$0xf] }
 0x4b7   : > { %v1795_v38 = vpop.permute.xlu1 %1794  ;;  %v1903_v1 = vpop.permute.xlu0 %1902 }
 0x4b8   : > { %1803 = vst.msk [vmem:[#allocation6 + $0x28] sm:$0xff] %vm415_vm14, %v1795_v38  ;;  %1911 = vst.msk [vmem:[#allocation6 + $0xa0] sm:$0xff] %vm415_vm14, %v1903_v1 }
 0x4b9   : > { %2176 = vrot.lane.b32.xlu1 %v4659_v14, %s3786_s23  ;;  %1798 = vrot.lane.b32.xlu0 %v1790_v25, %s3756_s19  ;;  %s3797_s19 = smov 89   ;;  %v2265_v25 = vld [vmem:[#allocation5 + $0x28] sm:$0xf] }
 0x4bb   : > { %v1921_v2 = vpop.permute.xlu1 %1920  ;;  %v1957_v39 = vpop.permute.xlu0 %1956 }
 0x4bc   : > { %1929 = vst.msk [vmem:[#allocation6 + $0xb4] sm:$0xff] %vm415_vm14, %v1921_v2  ;;  %1965 = vst.msk [vmem:[#allocation6 + $0xdc] sm:$0xff] %vm415_vm14, %v1957_v39 }
 0x4bd   : > { %1888 = vrot.lane.b32.xlu1 %v1880_v28, %s3779_s14  ;;  %1924 = vrot.lane.b32.xlu0 %v1916_v27, %s3781_s30  ;;  %v2094_v28 = vld [vmem:[#allocation5 + $0x20] sm:$0xf]  ;;  %v2299_v27 = vld [vmem:[#allocation5 + $0x28] sm:$0xf] }
 0x4bf   : > { %v1813_v54 = vpop.permute.xlu1 %1812  ;;  %v1849_v24 = vpop.permute.xlu0 %1848 }
 0x4c0   : > { %1821 = vst.msk [vmem:[#allocation6 + $0x3c] sm:$0xff] %vm415_vm14, %v1813_v54  ;;  %1857 = vst.msk [vmem:[#allocation6 + $0x64] sm:$0xff] %vm415_vm14, %v1849_v24 }
 0x4c1   : > { %1816 = vrot.lane.b32.xlu1 %v1808_v57, %s3753_s16  ;;  %1960 = vrot.lane.b32.xlu0 %v1952_v30, %s3782_s8  ;;  %s4964_s16 = smov 90   ;;  %v2061_v57 = vld [vmem:[#allocation5 + $0x28] sm:$0xf] }
 0x4c3   : > { %v1939_v34 = vpop.permute.xlu1 %1938  ;;  %v1975_v36 = vpop.permute.xlu0 %1974 }
 0x4c4   : > { %1947 = vst.msk [vmem:[#allocation6 + $0xc8] sm:$0xff] %vm415_vm14, %v1939_v34  ;;  %1983 = vst.msk [vmem:[#allocation6 + $0xf0] sm:$0xff] %vm415_vm14, %v1975_v36  ;;  %v2332_v36 = vld [vmem:[#allocation5 + $0x20] sm:$0xf] }
 0x4c5   : > { %1942 = vrot.lane.b32.xlu1 %v1934_v43, %s3784_s20  ;;  %1852 = vrot.lane.b32.xlu0 %v1844_v37, %s3783_s15  ;;  %v2095_v43 = vld [vmem:[#allocation5 + $0x28] sm:$0xf] }
 0x4c7   : > { %v1831_v41 = vpop.permute.xlu1 %1830  ;;  %v4713_v53 = vpop.permute.xlu0 %2170 }
 0x4c8   : > { %1839 = vst.msk [vmem:[#allocation6 + $0x50] sm:$0xff] %vm415_vm14, %v1831_v41 }
 0x4c9   : > { %1834 = vrot.lane.b32.xlu1 %v1826_v42, %s3755_s18  ;;  %2178 = vrot.lane.b32.xlu0 %v2162_v12, %s3786_s23  ;;  %s3796_s18 = smov 76   ;;  %v2128_v12 = vld [vmem:[#allocation5 + $0x20] sm:$0xf] }
 0x4cb   : > { %v1867_v31 = vpop.permute.xlu1 %1866  ;;  %v2011_v23 = vpop.permute.xlu0 %2010 }
 0x4cc   : > { %1875 = vst.msk [vmem:[#allocation6 + $0x78] sm:$0xff] %vm415_vm14, %v1867_v31  ;;  %2019 = vst.msk [vmem:[#allocation6 + $0x118] sm:$0xff] %vm415_vm14, %v2011_v23  ;;  %v2129_v31 = vld [vmem:[#allocation5 + $0x28] sm:$0xf] }
 0x4cd   : > { %1996 = vrot.lane.b32.xlu1 %v1988_v0, %s3788_s29  ;;  %1978 = vrot.lane.b32.xlu0 %v1970_v40, %s3785_s22  ;;  %v2471_v23 = vld [vmem:[%s4945_s5] sm:$0xff] }
 0x4cf   : > { %v1993_v18 = vpop.permute.xlu1 %1992  ;;  %v2207_v62 = vpop.permute.xlu0 %2206 }
 0x4d0   : > { %2001 = vst.msk [vmem:[#allocation6 + $0x104] sm:$0xff] %vm415_vm14, %v1993_v18  ;;  %v2473_v18 = vld [vmem:[%s4945_s5 + $0x10] sm:$0xff] }
 0x4d1   : > { %2212 = vrot.lane.b32.xlu1 %v2196_v45, %s3789_s9  ;;  %2014 = vrot.lane.b32.xlu0 %v2006_v61, %s4963_s21 }
 0x4d3   : > { %v2205_v11 = vpop.permute.xlu1 %2204  ;;  %v2241_v20 = vpop.permute.xlu0 %2240 }
 0x4d4   : > { %v2217_v44 = vsel %vm2216_vm12, %v2205_v11, %v2207_v62  ;;  %v2474_v62 = vld [vmem:[%s4945_s5 + $0x18] sm:$0xff] }
 0x4d5   : > { %2223 = vst.msk [vmem:[#allocation6 + $0x190] sm:$0xff] %vm415_vm14, %v2217_v44  ;;  %2246 = vrot.lane.b32.xlu1 %v2230_v16, %s3790_s10  ;;  %2108 = vrot.lane.b32.xlu0 %v4659_v14, %s4964_s16 }
 0x4d7   : > { %v2239_v63 = vpop.permute.xlu1 %2238  ;;  %v2037_v50 = vpop.permute.xlu0 %2036 }
 0x4d8   : > { %v2251_v46 = vsel %vm2250_vm13, %v2239_v63, %v2241_v20  ;;  %v2475_v20 = vld [vmem:[%s4945_s5 + $0x20] sm:$0xff] }
 0x4d9   : > { %2257 = vst.msk [vmem:[#allocation6 + $0x1a4] sm:$0xff] %vm415_vm14, %v2251_v46  ;;  %2042 = vrot.lane.b32.xlu1 %v2026_v47, %s3791_s26  ;;  %2342 = vrot.lane.b32.xlu0 %v4601_v13, %s3796_s18 }
 0x4db   : > { %v2035_v4 = vpop.permute.xlu1 %2034  ;;  %v2275_v51 = vpop.permute.xlu0 %2274 }
 0x4dc   : > { %v2047_v52 = vsel %vm2046_vm15, %v2035_v4, %v2037_v50  ;;  %v2477_v50 = vld [vmem:[%s4945_s5 + $0x30] sm:$0x3] }
 0x4dd   : > { %2053 = vst.msk [vmem:[#allocation6 + $0x12c] sm:$0xff] %vm415_vm14, %v2047_v52  ;;  %2280 = vrot.lane.b32.xlu1 %v2264_v29, %s3792_s11  ;;  %2346 = vrot.lane.b32.xlu0 %v4659_v14, %s3796_s18 }
 0x4df   : > { %v2273_v56 = vpop.permute.xlu1 %2272  ;;  %v2309_v35 = vpop.permute.xlu0 %2308 }
 0x4e0   : > { %v2285_v58 = vsel %vm2284_vm0, %v2273_v56, %v2275_v51 }
 0x4e1   : > { %2291 = vst.msk [vmem:[#allocation6 + $0x1b8] sm:$0xff] %vm415_vm14, %v2285_v58  ;;  %2314 = vrot.lane.b32.xlu1 %v2298_v60, %s3793_s12  ;;  %2138 = vrot.lane.b32.xlu0 %v4601_v13, %s3797_s19 }
 0x4e3   : > { %v2307_v32 = vpop.permute.xlu1 %2306  ;;  %v2071_v9 = vpop.permute.xlu0 %2070 }
 0x4e4   : > { %v2319_v5 = vsel %vm2318_vm1, %v2307_v32, %v2309_v35 }
 0x4e5   : > { %2325 = vst.msk [vmem:[#allocation6 + $0x1cc] sm:$0xff] %vm415_vm14, %v2319_v5  ;;  %2076 = vrot.lane.b32.xlu1 %v2060_v55, %s3794_s13  ;;  %2142 = vrot.lane.b32.xlu0 %v4659_v14, %s3797_s19  ;;  %v2231_v14 = vld [vmem:[#allocation5 + $0x28] sm:$0xf] }
 0x4e7   : > { %v2069_v59 = vpop.permute.xlu1 %2068  ;;  %v2105_v19 = vpop.permute.xlu0 %2104 }
 0x4e8   : > { %v2081_v26 = vsel %vm2080_vm2, %v2069_v59, %v2071_v9  ;;  %v2377_v9 = vld [vmem:[#allocation6 + $0x8] sm:$0xff] }
 0x4e9   : > { %2087 = vst.msk [vmem:[#allocation6 + $0x140] sm:$0xff] %vm415_vm14, %v2081_v26  ;;  %2214 = vrot.lane.b32.xlu0 %v2197_v6, %s3789_s9  ;;  %2180 = vrot.lane.b32.xlu1 %v2163_v7, %s3786_s23  ;;  %v2376_v7 = vld [vmem:[#allocation6] sm:$0xff] }
 0x4eb   : > { %v2103_v8 = vpop.permute.xlu1 %2102  ;;  %v1887_v13 = vpop.permute.xlu0 %1886 }
 0x4ec   : > { %v2115_v21 = vsel %vm2114_vm4, %v2103_v8, %v2105_v19  ;;  %1894 = vst.msk [vmem:[#allocation6 + $0x94] sm:$0xff] %vm415_vm14, %v1887_v13  ;;  %v2439_v8 = vpack.c.bf16 %v2377_v9, %v2376_v7  ;;  %v2391_v7 = vld [vmem:[#allocation6 + $0x78] sm:$0xff] }
 0x4ed   : > { %2121 = vst.msk [vmem:[#allocation6 + $0x154] sm:$0xff] %vm415_vm14, %v2115_v21  ;;  %2248 = vrot.lane.b32.xlu0 %v2231_v14, %s3790_s10  ;;  %2106 = vrot.lane.b32.xlu1 %v4568_v17, %s4964_s16 }
 0x4ef   : > { %v2173_v33 = vpop.permute.xlu1 %2172  ;;  %v1923_v3 = vpop.permute.xlu0 %1922 }
 0x4f0   : > { %v2183_v49 = vsel %vm2182_vm3, %v4713_v53, %v2173_v33  ;;  %1930 = vst.msk [vmem:[#allocation6 + $0xbc] sm:$0xff] %vm415_vm14, %v1923_v3 }
 0x4f1   : > { %2189 = vst.msk [vmem:[#allocation6 + $0x17c] sm:$0xff] %vm415_vm14, %v2183_v49  ;;  %2340 = vrot.lane.b32.xlu1 %v4564_v48, %s3796_s18  ;;  %2044 = vrot.lane.b32.xlu0 %v2027_v22, %s3791_s26 }
 0x4f3   : > { %v1869_v38 = vpop.permute.xlu1 %1868  ;;  %v1815_v1 = vpop.permute.xlu0 %1814 }
 0x4f4   : > { %1876 = vst.msk [vmem:[#allocation6 + $0x80] sm:$0xff] %vm415_vm14, %v1869_v38  ;;  %1822 = vst.msk [vmem:[#allocation6 + $0x44] sm:$0xff] %vm415_vm14, %v1815_v1 }
 0x4f5   : > { %2344 = vrot.lane.b32.xlu1 %v4568_v17, %s3796_s18  ;;  %2282 = vrot.lane.b32.xlu0 %v2265_v25, %s3792_s11 }
 0x4f7   : > { %v1941_v2 = vpop.permute.xlu0 %1940  ;;  %v1779_v39 = vpop.permute.xlu1 %1778 }
 0x4f8   : > { %1948 = vst.msk [vmem:[#allocation6 + $0xd0] sm:$0xff] %vm415_vm14, %v1941_v2  ;;  %1786 = vst.msk [vmem:[#allocation6 + $0x1c] sm:$0xff] %vm415_vm14, %v1779_v39  ;;  %v2394_v2 = vld [vmem:[#allocation6 + $0x90] sm:$0xff] }
 0x4f9   : > { %2110 = vrot.lane.b32.xlu1 %v2094_v28, %s4964_s16  ;;  %2316 = vrot.lane.b32.xlu0 %v2299_v27, %s3793_s12 }
 0x4fb   : > { %v1833_v54 = vpop.permute.xlu0 %1832  ;;  %v1905_v24 = vpop.permute.xlu1 %1904  ;;  %v2392_v59 = vld [vmem:[#allocation6 + $0x80] sm:$0xff] }
 0x4fc   : > { %1840 = vst.msk [vmem:[#allocation6 + $0x58] sm:$0xff] %vm415_vm14, %v1833_v54  ;;  %1912 = vst.msk [vmem:[#allocation6 + $0xa8] sm:$0xff] %vm415_vm14, %v1905_v24  ;;  %v2378_v54 = vld [vmem:[#allocation6 + $0x10] sm:$0xff] }
 0x4fd   : > { %2136 = vrot.lane.b32.xlu1 %v4564_v48, %s3797_s19  ;;  %2078 = vrot.lane.b32.xlu0 %v2061_v57, %s3794_s13  ;;  %v2333_v48 = vld [vmem:[#allocation5 + $0x28] sm:$0xf]  ;;  %v2396_v57 = vld [vmem:[#allocation6 + $0xa0] sm:$0xff] }
 0x4ff   : > { %v4781_v30 = vpop.permute.xlu0 %2174  ;;  %v1797_v34 = vpop.permute.xlu1 %1796  ;;  %v2379_v38 = vld [vmem:[#allocation6 + $0x18] sm:$0xff] }
 0x500   : > { %1804 = vst.msk [vmem:[#allocation6 + $0x30] sm:$0xff] %vm415_vm14, %v1797_v34  ;;  %v2440_v24 = vpack.c.bf16 %v2379_v38, %v2378_v54 }
 0x501   : > { %2348 = vrot.lane.b32.xlu1 %v2332_v36, %s3796_s18  ;;  %2112 = vrot.lane.b32.xlu0 %v2095_v43, %s4964_s16 }
 0x503   : > { %v1995_v37 = vpop.permute.xlu0 %1994  ;;  %v1959_v41 = vpop.permute.xlu1 %1958  ;;  %v2397_v28 = vld [vmem:[#allocation6 + $0xa8] sm:$0xff] }
 0x504   : > { %2002 = vst.msk [vmem:[#allocation6 + $0x10c] sm:$0xff] %vm415_vm14, %v1995_v37  ;;  %1966 = vst.msk [vmem:[#allocation6 + $0xe4] sm:$0xff] %vm415_vm14, %v1959_v41  ;;  %v2381_v41 = vld [vmem:[#allocation6 + $0x28] sm:$0xff] }
 0x505   : > { %2140 = vrot.lane.b32.xlu1 %v4568_v17, %s3797_s19  ;;  %2350 = vrot.lane.b32.xlu0 %v2333_v48, %s3796_s18  ;;  %v2472_v17 = vld [vmem:[%s4945_s5 + $0x8] sm:$0xff] }
 0x507   : > { %v1851_v53 = vpop.permute.xlu1 %1850  ;;  %v2211_v42 = vpop.permute.xlu0 %2210 }
 0x508   : > { %1858 = vst.msk [vmem:[#allocation6 + $0x6c] sm:$0xff] %vm415_vm14, %v1851_v53  ;;  %v2399_v53 = vld [vmem:[#allocation6 + $0xb8] sm:$0xff] }
 0x509   : > { %2144 = vrot.lane.b32.xlu1 %v2128_v12, %s3797_s19  ;;  %2146 = vrot.lane.b32.xlu0 %v2129_v31, %s3797_s19 }
 0x50b   : > { %v1977_v0 = vpop.permute.xlu1 %1976  ;;  %v2245_v40 = vpop.permute.xlu0 %2244 }
 0x50c   : > { %1984 = vst.msk [vmem:[#allocation6 + $0xf8] sm:$0xff] %vm415_vm14, %v1977_v0  ;;  %v2382_v0 = vld [vmem:[#allocation6 + $0x30] sm:$0xff] }
 0x50d   : > { %2480 = vperm.xlu1 %3406, %v2471_v23   ;;  %2485 = vperm.xlu0 %3405, %v2472_v17  }
 0x50f   : > { %v2209_v45 = vpop.permute.xlu1 %2208  ;;  %v2041_v61 = vpop.permute.xlu0 %2040  ;;  %v2389_v9 = vld [vmem:[#allocation6 + $0x68] sm:$0xff] }
 0x510   : > { %v2218_v11 = vsel %vm2216_vm12, %v2209_v45, %v2211_v42 }
 0x511   : > { %2224 = vst.msk [vmem:[#allocation6 + $0x198] sm:$0xff] %vm415_vm14, %v2218_v11  ;;  %2490 = vperm.xlu1 %3406, %v2473_v18   ;;  %2495 = vperm.xlu0 %3405, %v2474_v62   ;;  %v2401_v18 = vld [vmem:[#allocation6 + $0xc8] sm:$0xff] }
 0x513   : > { %v2243_v44 = vpop.permute.xlu1 %2242  ;;  %v2279_v16 = vpop.permute.xlu0 %2278 }
 0x514   : > { %v2252_v63 = vsel %vm2250_vm13, %v2243_v44, %v2245_v40 }
 0x515   : > { %2258 = vst.msk [vmem:[#allocation6 + $0x1ac] sm:$0xff] %vm415_vm14, %v2252_v63  ;;  %2500 = vperm.xlu1 %3406, %v2475_v20   ;;  %2505 = vperm.xlu0 %3405, %v2476_v15   ;;  %v2384_v15 = vld [vmem:[#allocation6 + $0x40] sm:$0xff] }
 0x517   : > { %v2013_v46 = vpop.permute.xlu1 %2012  ;;  %v2075_v47 = vpop.permute.xlu0 %2074 }
 0x518   : > { %2020 = vst.msk [vmem:[#allocation6 + $0x120] sm:$0xff] %vm415_vm14, %v2013_v46 }
 0x519   : > { %2510 = vperm.xlu1 %3406, %v2477_v50   ;;  %v2387_v50 = vld [vmem:[#allocation6 + $0x58] sm:$0xff] }
 0x51b   : > { %v2039_v4 = vpop.permute.xlu1 %2038  ;;  %v2313_v51 = vpop.permute.xlu0 %2312 }
 0x51c   : > { %v2048_v52 = vsel %vm2046_vm15, %v2039_v4, %v2041_v61 }
 0x51d   : > { %2054 = vst.msk [vmem:[#allocation6 + $0x134] sm:$0xff] %vm415_vm14, %v2048_v52 }
 0x51f   : > { %v2277_v29 = vpop.permute.xlu1 %2276  ;;  %v1871_v56 = vpop.permute.xlu0 %1870 }
 0x520   : > { %v2286_v35 = vsel %vm2284_vm0, %v2277_v29, %v2279_v16  ;;  %1877 = vst.msk [vmem:[#allocation6 + $0x88] sm:$0xf] %vm1768_vm11, %v1871_v56  ;;  %v2402_v16 = vld [vmem:[#allocation6 + $0xd0] sm:$0xff]  ;;  %v2404_v29 = vld [vmem:[#allocation6 + $0xe0] sm:$0xff] }
 0x521   : > { %2292 = vst.msk [vmem:[#allocation6 + $0x1c0] sm:$0xff] %vm415_vm14, %v2286_v35 }
 0x523   : > { %v2073_v58 = vpop.permute.xlu1 %2072  ;;  %v1781_v60 = vpop.permute.xlu0 %1780 }
 0x524   : > { %v2082_v32 = vsel %vm2080_vm2, %v2073_v58, %v2075_v47  ;;  %1787 = vst.msk [vmem:[#allocation6 + $0x24] sm:$0xf] %vm1768_vm11, %v1781_v60 }
 0x525   : > { %2088 = vst.msk [vmem:[#allocation6 + $0x148] sm:$0xff] %vm415_vm14, %v2082_v32  ;;  %v2407_v32 = vld [vmem:[#allocation6 + $0xf8] sm:$0xff] }
 0x527   : > { %v2311_v5 = vpop.permute.xlu1 %2310  ;;  %v1907_v55 = vpop.permute.xlu0 %1906  ;;  %v2393_v19 = vld [vmem:[#allocation6 + $0x88] sm:$0xff] }
 0x528   : > { %v2320_v26 = vsel %vm2318_vm1, %v2311_v5, %v2313_v51  ;;  %1913 = vst.msk [vmem:[#allocation6 + $0xb0] sm:$0xf] %vm1768_vm11, %v1907_v55  ;;  %v2447_v6 = vpack.c.bf16 %v2393_v19, %v2392_v59  ;;  %v2386_v51 = vld [vmem:[#allocation6 + $0x50] sm:$0xff] }
 0x529   : > { %2326 = vst.msk [vmem:[#allocation6 + $0x1d4] sm:$0xff] %vm415_vm14, %v2320_v26  ;;  %v2444_v52 = vpack.c.bf16 %v2387_v50, %v2386_v51  ;;  %v2406_v55 = vld [vmem:[#allocation6 + $0xf0] sm:$0xff] }
 0x52a   : > { %3195 = vmatprep.subr.bf16.mxu0 %v2447_v6  ;;  %v2454_v59 = vpack.c.bf16 %v2407_v32, %v2406_v55  ;;  %v3659_v51 = vld [vmem:[#allocation9 + $0xc] ss:$16 sps:$4 sm:$0xff]  }
 0x52b   : > { %v2177_v13 = vpop.permute.xlu1 %2176  ;;  %3196 = vmatpush3.bf16.msra.mxu0 %v2439_v8  ;;  %v1799_v21 = vpop.permute.xlu0 %1798  ;;  %v2380_v34 = vld [vmem:[#allocation6 + $0x20] sm:$0xff] }
 0x52c   : > { %v2184_v14 = vsel %vm2182_vm3, %v4781_v30, %v2177_v13  ;;  %1805 = vst.msk [vmem:[#allocation6 + $0x38] sm:$0xf] %vm1768_vm11, %v1799_v21  ;;  %v2449_v30 = vpack.c.bf16 %v2397_v28, %v2396_v57  ;;  %v2441_v48 = vpack.c.bf16 %v2381_v41, %v2380_v34  ;;  %v3646_v13 = vld [vmem:[#allocation9] ss:$16 sps:$4 sm:$0xff]  }
 0x52d   : > { %2190 = vst.msk [vmem:[#allocation6 + $0x184] sm:$0xff] %vm415_vm14, %v2184_v14  ;;  %v2374_v57 = vld [vmem:[#allocation9 + $0x60] sm:$0x11] }
 0x52f   : > { %v1889_v33 = vpop.permute.xlu1 %1888  ;;  %v1925_v3 = vpop.permute.xlu0 %1924  ;;  %v2398_v37 = vld [vmem:[#allocation6 + $0xb0] sm:$0xff] }
 0x530   : > { %1895 = vst.msk [vmem:[#allocation6 + $0x9c] sm:$0xf] %vm1768_vm11, %v1889_v33  ;;  %1931 = vst.msk [vmem:[#allocation6 + $0xc4] sm:$0xf] %vm1768_vm11, %v1925_v3  ;;  %v2450_v42 = vpack.c.bf16 %v2399_v53, %v2398_v37  ;;  %v3649_v33 = vld [vmem:[#allocation9 + $0x24] ss:$16 sps:$4 sm:$0xff]   ;;  %v3162_v37 = vcombine.high %v2374_v57, %v2374_v57 }
 0x533   : > { %v1817_v49 = vpop.permute.xlu1 %1816  ;;  %v1961_v22 = vpop.permute.xlu0 %1960  ;;  %v2383_v12 = vld [vmem:[#allocation6 + $0x38] sm:$0xff] }
 0x534   : > { %1823 = vst.msk [vmem:[#allocation6 + $0x4c] sm:$0xf] %vm1768_vm11, %v1817_v49  ;;  %1967 = vst.msk [vmem:[#allocation6 + $0xec] sm:$0xf] %vm1768_vm11, %v1961_v22  ;;  %v2442_v40 = vpack.c.bf16 %v2383_v12, %v2382_v0  ;;  %v3651_v22 = vld [vmem:[#allocation9 + $0x20] ss:$16 sps:$4 sm:$0xff]  }
 0x535   : > { %v2424_v53 = vld [vmem:[#allocation6 + $0x180] sm:$0xff]  ;;  %v2427_v12 = vld [vmem:[#allocation6 + $0x198] sm:$0xff]  ;;  %v2426_v0 = vld [vmem:[#allocation6 + $0x190] sm:$0xff] }
 0x537   : > { %v1943_v1 = vpop.permute.xlu1 %1942  ;;  %v1853_v25 = vpop.permute.xlu0 %1852  ;;  %v2395_v39 = vld [vmem:[#allocation6 + $0x98] sm:$0xff]  ;;  %v2400_v17 = vld [vmem:[#allocation6 + $0xc0] sm:$0xff] }
 0x538   : > { %1949 = vst.msk [vmem:[#allocation6 + $0xd8] sm:$0xf] %vm1768_vm11, %v1943_v1  ;;  %1859 = vst.msk [vmem:[#allocation6 + $0x74] sm:$0xf] %vm1768_vm11, %v1853_v25  ;;  %v2448_v27 = vpack.c.bf16 %v2395_v39, %v2394_v2  ;;  %v2451_v62 = vpack.c.bf16 %v2401_v18, %v2400_v17  ;;  %v3652_v25 = vld [vmem:[#allocation9 + $0x44] ss:$16 sps:$4 sm:$0xff]  }
 0x53a   : > { %3197 = vmatprep.subr.bf16.mxu0 %v2448_v27 }
 0x53b   : > { %v1835_v36 = vpop.permute.xlu1 %1834  ;;  %v4842_v43 = vpop.permute.xlu0 %2178  ;;  %3198 = vmatpush3.bf16.msra.mxu0 %v2440_v24  ;;  %v2385_v45 = vld [vmem:[#allocation6 + $0x48] sm:$0xff] }
 0x53c   : > { %1841 = vst.msk [vmem:[#allocation6 + $0x60] sm:$0xf] %vm1768_vm11, %v1835_v36  ;;  %3199 = vmatprep.subr.bf16.mxu0 %v2449_v30  ;;  %v2443_v44 = vpack.c.bf16 %v2385_v45, %v2384_v15  ;;  %v2405_v4 = vld [vmem:[#allocation6 + $0xe8] sm:$0xff]  ;;  %v3654_v30 = vld [vmem:[#allocation9 + $0x40] ss:$16 sps:$4 sm:$0xff]   ;;  %v2411_v15 = vld [vmem:[#allocation6 + $0x118] sm:$0xff] }
 0x53d   : > { %v2453_v56 = vpack.c.bf16 %v2405_v4, %v2404_v29 }
 0x53f   : > { %v1997_v31 = vpop.permute.xlu1 %1996  ;;  %v1979_v23 = vpop.permute.xlu0 %1978  ;;  %3200 = vmatpush3.bf16.msra.mxu0 %v2441_v48  ;;  %v2403_v20 = vld [vmem:[#allocation6 + $0xd8] sm:$0xff]  ;;  %v2390_v19 = vld [vmem:[#allocation6 + $0x70] sm:$0xff] }
 0x540   : > { %2003 = vst.msk [vmem:[#allocation6 + $0x114] sm:$0xf] %vm1768_vm11, %v1997_v31  ;;  %1985 = vst.msk [vmem:[#allocation6 + $0x100] sm:$0xf] %vm1768_vm11, %v1979_v23  ;;  %3201 = vmatprep.subr.bf16.mxu0 %v2450_v42  ;;  %v2452_v63 = vpack.c.bf16 %v2403_v20, %v2402_v16  ;;  %v2446_v8 = vpack.c.bf16 %v2391_v7, %v2390_v19  ;;  %v2409_v23 = vld [vmem:[#allocation6 + $0x108] sm:$0xff]  ;;  %v2432_v7 = vld [vmem:[#allocation6 + $0x1c0] sm:$0xff] }
 0x541   : > { %v2429_v16 = vld [vmem:[#allocation6 + $0x1a8] sm:$0xff] }
 0x543   : > { %v2213_v61 = vpop.permute.xlu1 %2212  ;;  %v2015_v11 = vpop.permute.xlu0 %2014  ;;  %3202 = vmatpush3.bf16.msra.mxu0 %v2442_v40  ;;  %v2388_v35 = vld [vmem:[#allocation6 + $0x60] sm:$0xff] }
 0x544   : > { %2021 = vst.msk [vmem:[#allocation6 + $0x128] sm:$0xf] %vm1768_vm11, %v2015_v11  ;;  %3203 = vmatprep.subr.bf16.mxu0 %v2451_v62  ;;  %v2445_v5 = vpack.c.bf16 %v2389_v9, %v2388_v35  ;;  %v2464_v62 = vpack.c.bf16 %v2427_v12, %v2426_v0  ;;  %v3657_v0 = vld [vmem:[#allocation9 + $0x8] ss:$16 sps:$4 sm:$0xff]  }
 0x547   : > { %v2247_v46 = vpop.permute.xlu1 %2246  ;;  %v2109_v47 = vpop.permute.xlu0 %2108  ;;  %3204 = vmatpush3.bf16.msra.mxu0 %v2443_v44  ;;  %v2410_v45 = vld [vmem:[#allocation6 + $0x110] sm:$0xff] }
 0x548   : > { %3205 = vmatprep.subr.bf16.mxu0 %v2452_v63  ;;  %v2456_v44 = vpack.c.bf16 %v2411_v15, %v2410_v45  ;;  %v3161_v63 = vcombine.low %v2374_v57, %v2374_v57  ;;  %v2375_v45 = vld [vmem:[#allocation9 + $0x68] sm:$0x11] }
 0x54b   : > { %v2043_v58 = vpop.permute.xlu1 %2042  ;;  %v2343_v60 = vpop.permute.xlu0 %2342  ;;  %3206 = vmatpush3.bf16.msra.mxu0 %v2444_v52  ;;  %v2413_v4 = vld [vmem:[#allocation6 + $0x128] sm:$0xff] }
 0x54c   : > { %3207 = vmatprep.subr.bf16.mxu0 %v2453_v56  ;;  %v2412_v56 = vld [vmem:[#allocation6 + $0x120] sm:$0xff] }
 0x54d   : > { %v2457_v35 = vpack.c.bf16 %v2413_v4, %v2412_v56 }
 0x54f   : > { %v2281_v26 = vpop.permute.xlu1 %2280  ;;  %v2347_v6 = vpop.permute.xlu0 %2346  ;;  %3208 = vmatpush3.bf16.msra.mxu0 %v2445_v5 }
 0x550   : > { %3209 = vmatprep.subr.bf16.mxu0 %v2454_v59 }
 0x553   : > { %v4848_v21 = vpop.permute.xlu1 %2314  ;;  %v4850_v14 = vpop.permute.xlu0 %2138  ;;  %3210 = vmatpush3.bf16.msra.mxu0 %v2446_v8 }
 0x556   : > { %2632 = vmatmul.mubr.bf16.vlgmr.msra.gmra.mrb[20].mxu0 %v3646_v13 }
 0x557   : > { %v4852_v3 = vpop.permute.xlu1 %2076  ;;  %v4854_v49 = vpop.permute.xlu0 %2142  ;;  %2639 = vmatprep.mubr.bf16.mxu0 %v3649_v33  ;;  %v2417_v33 = vld [vmem:[#allocation6 + $0x148] sm:$0xff] }
 0x55b   : > { %v2215_v38 = vpop.permute.xlu0 %2214  ;;  %v2181_v1 = vpop.permute.xlu1 %2180 }
 0x55c   : > { %v2219_v2 = vsel %vm2216_vm12, %v2213_v61, %v2215_v38  ;;  %v2185_v39 = vsel %vm2182_vm3, %v4842_v43, %v2181_v1  ;;  %v2408_v43 = vld [vmem:[#allocation6 + $0x100] sm:$0xff]  ;;  %v2434_v1 = vld [vmem:[#allocation6 + $0x1d0] sm:$0xff] }
 0x55d   : > { %2225 = vst.msk [vmem:[#allocation6 + $0x1a0] sm:$0xf] %vm1768_vm11, %v2219_v2  ;;  %2191 = vst.msk [vmem:[#allocation6 + $0x18c] sm:$0xf] %vm1768_vm11, %v2185_v39  ;;  %v2455_v17 = vpack.c.bf16 %v2409_v23, %v2408_v43 }
 0x55e   : > { %2640 = vmatmul.mubr.bf16.gmra.mrb[24].mxu0 %v3651_v22 }
 0x55f   : > { %v2249_v28 = vpop.permute.xlu0 %2248  ;;  %v2107_v27 = vpop.permute.xlu1 %2106  ;;  %2647 = vmatprep.mubr.bf16.mxu0 %v3652_v25 }
 0x560   : > { %v2253_v54 = vsel %vm2250_vm13, %v2247_v46, %v2249_v28  ;;  %v2116_v24 = vsel %vm2114_vm4, %v2107_v27, %v2109_v47 }
 0x561   : > { %2259 = vst.msk [vmem:[#allocation6 + $0x1b4] sm:$0xf] %vm1768_vm11, %v2253_v54 }
 0x562   : > { %2122 = vst.msk [vmem:[#allocation6 + $0x15c] sm:$0xff] %vm415_vm14, %v2116_v24 }
 0x563   : > { %v2341_v34 = vpop.permute.xlu1 %2340  ;;  %v2045_v36 = vpop.permute.xlu0 %2044 }
 0x564   : > { %v2353_v41 = vsel %vm2352_vm5, %v2341_v34, %v2343_v60  ;;  %v2049_v48 = vsel %vm2046_vm15, %v2043_v58, %v2045_v36  ;;  %v2425_v42 = vld [vmem:[#allocation6 + $0x188] sm:$0xff]  ;;  %v2428_v20 = vld [vmem:[#allocation6 + $0x1a0] sm:$0xff]  ;;  %v2431_v58 = vld [vmem:[#allocation6 + $0x1b8] sm:$0xff] }
 0x565   : > { %2359 = vst.msk [vmem:[#allocation6 + $0x1e0] sm:$0xff] %vm415_vm14, %v2353_v41  ;;  %v2463_v31 = vpack.c.bf16 %v2425_v42, %v2424_v53  ;;  %v2465_v47 = vpack.c.bf16 %v2429_v16, %v2428_v20  ;;  %v3163_v20 = vcombine.low %v2375_v45, %v2375_v45 }
 0x566   : > { %2055 = vst.msk [vmem:[#allocation6 + $0x13c] sm:$0xf] %vm1768_vm11, %v2049_v48  ;;  %2648 = vmatmul.mubr.bf16.gmra.mrb[28].mxu0 %v3654_v30 }
 0x567   : > { %3235 = vmatprep.subr.bf16.mxu0 %v2463_v31  ;;  %v2345_v40 = vpop.permute.xlu1 %2344  ;;  %v2283_v18 = vpop.permute.xlu0 %2282  ;;  %2655 = vmatprep.mubr.bf16.mxu0 %v3162_v37 }
 0x568   : > { %v2354_v61 = vsel %vm2352_vm5, %v2345_v40, %v2347_v6  ;;  %v2287_v11 = vsel %vm2284_vm0, %v2281_v26, %v2283_v18  ;;  %3236 = vmatpush3.bf16.msra.mxu0 %v2455_v17  ;;  %v2430_v29 = vld [vmem:[#allocation6 + $0x1b0] sm:$0xff]  ;;  %v3662_v18 = vld [vmem:[#allocation9 + $0x28] ss:$16 sps:$4 sm:$0xff]  }
 0x569   : > { %2360 = vst.msk [vmem:[#allocation6 + $0x1e8] sm:$0xff] %vm415_vm14, %v2354_v61  ;;  %3237 = vmatprep.subr.bf16.mxu0 %v2464_v62  ;;  %v2466_v9 = vpack.c.bf16 %v2431_v58, %v2430_v29  ;;  %v2414_v26 = vld [vmem:[#allocation6 + $0x130] sm:$0xff]  ;;  %v2419_v24 = vld [vmem:[#allocation6 + $0x158] sm:$0xff] }
 0x56a   : > { %2293 = vst.msk [vmem:[#allocation6 + $0x1c8] sm:$0xf] %vm1768_vm11, %v2287_v11  ;;  %v3660_v40 = vld [vmem:[#allocation9 + $0x2c] ss:$16 sps:$4 sm:$0xff]   ;;  %v3665_v61 = vld [vmem:[#allocation9 + $0x48] ss:$16 sps:$4 sm:$0xff]   ;;  %v3164_v11 = vcombine.high %v2375_v45, %v2375_v45 }
 0x56b   : > { %v2111_v50 = vpop.permute.xlu1 %2110  ;;  %v2317_v46 = vpop.permute.xlu0 %2316  ;;  %v3663_v62 = vld [vmem:[#allocation9 + $0x4c] ss:$16 sps:$4 sm:$0xff]  }
 0x56c   : > { %v2321_v52 = vsel %vm2318_vm1, %v4848_v21, %v2317_v46  ;;  %3238 = vmatpush3.bf16.msra.mxu0 %v2456_v44  ;;  %v2436_v34 = vld [vmem:[#allocation6 + $0x1e0] sm:$0xff] }
 0x56d   : > { %2327 = vst.msk [vmem:[#allocation6 + $0x1dc] sm:$0xf] %vm1768_vm11, %v2321_v52  ;;  %3239 = vmatprep.subr.bf16.mxu0 %v2465_v47  ;;  %v2415_v5 = vld [vmem:[#allocation6 + $0x138] sm:$0xff] }
 0x56e   : > { %2656 = vmatmul.mubr.bf16.gmra.mrb[32].mxu0 %v3161_v63  ;;  %v2458_v6 = vpack.c.bf16 %v2415_v5, %v2414_v26 }
 0x56f   : > { %v2137_v60 = vpop.permute.xlu1 %2136  ;;  %v2079_v32 = vpop.permute.xlu0 %2078  ;;  %3165 = vmatprep.mubr.msk.bf16.mxu0 %vm2583_vm6, %v3659_v51 }
 0x570   : > { %v2149_v55 = vsel %vm2148_vm8, %v2137_v60, %v4850_v14  ;;  %v2083_v59 = vsel %vm2080_vm2, %v4852_v3, %v2079_v32  ;;  %3240 = vmatpush3.bf16.msra.mxu0 %v2457_v35  ;;  %v2416_v3 = vld [vmem:[#allocation6 + $0x140] sm:$0xff]  ;;  %v2437_v57 = vld [vmem:[#allocation6 + $0x1e8] sm:$0xff] }
 0x571   : > { %v2433_v19 = vld [vmem:[#allocation6 + $0x1c8] sm:$0xff]  ;;  %2155 = vst.msk [vmem:[#allocation6 + $0x168] sm:$0xff] %vm415_vm14, %v2149_v55  ;;  %3241 = vmatprep.subr.bf16.mxu0 %v2466_v9  ;;  %v2459_v38 = vpack.c.bf16 %v2417_v33, %v2416_v3  ;;  %v2469_v37 = vpack.c.bf16 %v2437_v57, %v2436_v34 }
 0x572   : > { %2089 = vst.msk [vmem:[#allocation6 + $0x150] sm:$0xf] %vm1768_vm11, %v2083_v59  ;;  %v2467_v21 = vpack.c.bf16 %v2433_v19, %v2432_v7 }
 0x573   : > { %v2349_v8 = vpop.permute.xlu1 %2348  ;;  %v2113_v13 = vpop.permute.xlu0 %2112 }
 0x574   : > { %v2117_v22 = vsel %vm2114_vm4, %v2111_v50, %v2113_v13  ;;  %3242 = vmatpush3.bf16.msra.mxu0 %v2458_v6  ;;  %v2435_v14 = vld [vmem:[#allocation6 + $0x1d8] sm:$0xff] }
 0x575   : > { %2123 = vst.msk [vmem:[#allocation6 + $0x164] sm:$0xf] %vm1768_vm11, %v2117_v22  ;;  %3243 = vmatprep.subr.bf16.mxu0 %v2467_v21  ;;  %v2468_v39 = vpack.c.bf16 %v2435_v14, %v2434_v1 }
 0x577   : > { %v2141_v25 = vpop.permute.xlu1 %2140  ;;  %v2351_v2 = vpop.permute.xlu0 %2350 }
 0x578   : > { %v2150_v28 = vsel %vm2148_vm8, %v2141_v25, %v4854_v49  ;;  %v2355_v27 = vsel %vm2352_vm5, %v2349_v8, %v2351_v2  ;;  %3244 = vmatpush3.bf16.msra.mxu0 %v2459_v38  ;;  %v2421_v48 = vld [vmem:[#allocation6 + $0x168] sm:$0xff] }
 0x579   : > { %v2418_v54 = vld [vmem:[#allocation6 + $0x150] sm:$0xff]  ;;  %2156 = vst.msk [vmem:[#allocation6 + $0x170] sm:$0xff] %vm415_vm14, %v2150_v28  ;;  %3245 = vmatprep.subr.bf16.mxu0 %v2468_v39  ;;  %vm2845_vm14 = vcmask 678912  }
 0x57a   : > { %2361 = vst.msk [vmem:[#allocation6 + $0x1f0] sm:$0xf] %vm1768_vm11, %v2355_v27  ;;  %v2460_v30 = vpack.c.bf16 %v2419_v24, %v2418_v54 }
 0x57b   : > { %v2145_v36 = vpop.permute.xlu1 %2144  ;;  %v2147_v43 = vpop.permute.xlu0 %2146 }
 0x57c   : > { %v2151_v41 = vsel %vm2148_vm8, %v2145_v36, %v2147_v43  ;;  %3246 = vmatpush3.bf16.msra.mxu0 %v2460_v30  ;;  %v2420_v49 = vld [vmem:[#allocation6 + $0x160] sm:$0xff] }
 0x57d   : > { %2157 = vst.msk [vmem:[#allocation6 + $0x178] sm:$0xf] %vm1768_vm11, %v2151_v41  ;;  %3247 = vmatprep.subr.bf16.mxu0 %v2469_v37  ;;  %v2461_v53 = vpack.c.bf16 %v2421_v48, %v2420_v49 }
 0x580   : > { %3248 = vmatpush3.bf16.msra.mxu0 %v2461_v53  ;;  %v2422_v31 = vld [vmem:[#allocation6 + $0x170] sm:$0xff] }
 0x581   : > { %v2438_v42 = vld [vmem:[#allocation6 + $0x1f0] sm:$0xf] }
 0x582   : > { %v2470_v12 = vpack.c.bf16 %v2438_v42, %v2438_v42 }
 0x584   : > { %3323 = vmatprep.subr.msk.bf16.mxu0 %vm1587_vm7, %v2470_v12  ;;  %v2423_v23 = vld [vmem:[#allocation6 + $0x178] sm:$0xff]  ;;  %vm2961_vm7 = vcmask 125952  }
 0x585   : > { %v2462_v17 = vpack.c.bf16 %v2423_v23, %v2422_v31 }
 0x587   : > { %3250 = vmatpush3.bf16.msra.mxu0 %v2462_v17 }
 0x58a   : > { %2696 = vmatmul.mubr.bf16.vlgmr.msra.gmra.mrb[36].mxu0 %v3657_v0 }
 0x58b   : > { %3166 = vmatprep.mubr.msk.bf16.mxu0 %vm2583_vm6, %v3660_v40 }
 0x58c   : > { %v2481_v8 = vpop.permute.xlu1 %2480  ;;  %v2486_v14 = vpop.permute.xlu0 %2485 }
 0x590   : > { %v2491_v27 = vpop.permute.xlu1 %2490  ;;  %v2496_v34 = vpop.permute.xlu0 %2495 }
 0x592   : > { %2704 = vmatmul.mubr.bf16.gmra.mrb[40].mxu0 %v3662_v18  ;;  %v3668_v18 = vld [vmem:[%s4946_s6] sm:$0xff]  }
 0x593   : > { %3167 = vmatprep.mubr.msk.bf16.mxu0 %vm2583_vm6, %v3663_v62  ;;  %v3669_v62 = vld [vmem:[%s4946_s6 + $0x8] sm:$0xff]   ;;  %3285 = vmatprep.subr.bf16.mxu0 %v3668_v18 }
 0x594   : > { %v2501_v42 = vpop.permute.xlu1 %2500  ;;  %v2506_v0 = vpop.permute.xlu0 %2505  ;;  %3286 = vmatpush3.bf16.msra.mxu0 %v3668_v18 }
 0x595   : > { %3287 = vmatprep.subr.bf16.mxu0 %v3669_v62 }
 0x598   : > { %3288 = vmatpush3.bf16.msra.mxu0 %v3669_v62 }
 0x59a   : > { %2712 = vmatmul.mubr.bf16.gmra.mrb[44].mxu0 %v3665_v61 }
 0x59b   : > { %3168 = vmatprep.mubr.msk.bf16.mxu0 %vm2583_vm6, %v3164_v11 }
 0x5a2   : > { %2720 = vmatmul.mubr.bf16.gmra.mrb[48].mxu0 %v3163_v20 }
 0x629   : > { %v3211_v15 = vpop.f32.mrb[20].mxu0 }
 0x62a   : > { %v3212_v44 = vpop.f32.mrb[21].mxu0 }
 0x62b   : > { %v3213_v16 = vadd.f32 %v3212_v44, %v3211_v15  ;;  %v3214_v63 = vpop.f32.mrb[22].mxu0  ;;  %v3670_v15 = vld [vmem:[%s4946_s6 + $0x10] sm:$0xff]  }
 0x62c   : > { %v3215_v50 = vpop.f32.mrb[23].mxu0  ;;  %3289 = vmatprep.subr.bf16.mxu0 %v3670_v15 }
 0x62d   : > { %v3216_v46 = vadd.f32 %v3215_v50, %v3214_v63  ;;  %v2634_v21 = vadd.f32 %v3213_v16, %v2481_v8  ;;  %v2511_v63 = vpop.permute.xlu1 %2510  ;;  %3290 = vmatpush3.bf16.msra.mxu0 %v3670_v15 }
 0x62f   : > { %v2637_v38 = vadd.f32 %v3216_v46, %v2486_v14 }
 0x631   : > { %v3217_v47 = vpop.f32.mrb[24].mxu0 }
 0x632   : > { %v3218_v4 = vpop.f32.mrb[25].mxu0 }
 0x633   : > { %v3219_v51 = vadd.f32 %v3218_v4, %v3217_v47  ;;  %v3220_v52 = vpop.f32.mrb[26].mxu0 }
 0x634   : > { %v3221_v29 = vpop.f32.mrb[27].mxu0 }
 0x635   : > { %v3222_v56 = vadd.f32 %v3221_v29, %v3220_v52  ;;  %v2642_v24 = vadd.f32 %v3219_v51, %v2491_v27  ;;  %v3671_v52 = vld [vmem:[%s4946_s6 + $0x18] sm:$0xff]  }
 0x636   : > { %3291 = vmatprep.subr.bf16.mxu0 %v3671_v52 }
 0x637   : > { %v2645_v43 = vadd.f32 %v3222_v56, %v2496_v34  ;;  %3292 = vmatpush3.bf16.msra.mxu0 %v3671_v52  ;;  %v3672_v56 = vld [vmem:[%s4946_s6 + $0x20] sm:$0xff]  }
 0x638   : > { %3293 = vmatprep.subr.bf16.mxu0 %v3672_v56 }
 0x639   : > { %v3223_v35 = vpop.f32.mrb[28].mxu0 }
 0x63a   : > { %v3224_v58 = vpop.f32.mrb[29].mxu0 }
 0x63b   : > { %v3225_v60 = vadd.f32 %v3224_v58, %v3223_v35  ;;  %v3226_v32 = vpop.f32.mrb[30].mxu0  ;;  %3294 = vmatpush3.bf16.msra.mxu0 %v3672_v56 }
 0x63c   : > { %v3227_v9 = vpop.f32.mrb[31].mxu0 }
 0x63d   : > { %v3228_v5 = vadd.f32 %v3227_v9, %v3226_v32  ;;  %v2650_v31 = vadd.f32 %v3225_v60, %v2501_v42 }
 0x63f   : > { %v2653_v45 = vadd.f32 %v3228_v5, %v2506_v0 }
 0x641   : > { %v3229_v55 = vpop.f32.mrb[32].mxu0 }
 0x642   : > { %v3230_v59 = vpop.f32.mrb[33].mxu0 }
 0x643   : > { %v3231_v19 = vadd.f32 %v3230_v59, %v3229_v55  ;;  %v3232_v26 = vpop.f32.mrb[34].mxu0  ;;  %v3673_v55 = vld [vmem:[%s4946_s6 + $0x28] ss:$0 sps:$4 sm:$0x33]  }
 0x644   : > { %v3233_v6 = vpop.f32.mrb[35].mxu0 }
 0x645   : > { %v2658_v46 = vadd.f32 %v3231_v19, %v2511_v63  ;;  %v2859_v19 = vand.u32 %v3673_v55, %v4433_v10 }
 0x647   : > { %3295 = vmatprep.subr.bf16.mxu0 %v2859_v19 }
 0x648   : > { %3296 = vmatpush3.bf16.msra.mxu0 %v2859_v19 }
 0x65d   : > { %v3251_v7 = vpop.f32.mrb[36].mxu0 }
 0x65e   : > { %v3252_v13 = vpop.f32.mrb[37].mxu0 }
 0x65f   : > { %v3253_v33 = vadd.f32 %v3252_v13, %v3251_v7  ;;  %v3254_v22 = vpop.f32.mrb[38].mxu0 }
 0x660   : > { %v3255_v3 = vpop.f32.mrb[39].mxu0 }
 0x661   : > { %v2698_v1 = vadd.f32 %v3253_v33, %v2634_v21  ;;  %v3256_v25 = vadd.f32 %v3255_v3, %v3254_v22 }
 0x663   : > { %v2701_v2 = vadd.f32 %v3256_v25, %v2637_v38 }
 0x665   : > { %v3492_v39 = vpack.i.bf16 %v2701_v2, %v2698_v1  ;;  %v3257_v28 = vpop.f32.mrb[40].mxu0 }
 0x666   : > { %v3258_v54 = vpop.f32.mrb[41].mxu0 }
 0x667   : > { %v3259_v57 = vadd.f32 %v3258_v54, %v3257_v28  ;;  %v3260_v30 = vpop.f32.mrb[42].mxu0  ;;  %3493 = vrot.lane.b32.xlu0 %v3492_v39, %s3754_s17 }
 0x668   : > { %v3261_v36 = vpop.f32.mrb[43].mxu0 }
 0x669   : > { %v2706_v37 = vadd.f32 %v3259_v57, %v2642_v24  ;;  %v3262_v41 = vadd.f32 %v3261_v36, %v3260_v30 }
 0x66b   : > { %v2709_v49 = vadd.f32 %v3262_v41, %v2645_v43 }
 0x66d   : > { %v3497_v48 = vpack.i.bf16 %v2709_v49, %v2706_v37  ;;  %v3263_v53 = vpop.f32.mrb[44].mxu0 }
 0x66e   : > { %v3264_v12 = vpop.f32.mrb[45].mxu0 }
 0x66f   : > { %v3265_v23 = vadd.f32 %v3264_v12, %v3263_v53  ;;  %v3266_v17 = vpop.f32.mrb[46].mxu0  ;;  %3498 = vrot.lane.b32.xlu1 %v3497_v48, %s3754_s17 }
 0x670   : > { %v3267_v40 = vpop.f32.mrb[47].mxu0 }
 0x671   : > { %v2714_v61 = vadd.f32 %v3265_v23, %v2650_v31  ;;  %v3268_v11 = vadd.f32 %v3267_v40, %v3266_v17 }
 0x673   : > { %v2717_v20 = vadd.f32 %v3268_v11, %v2653_v45 }
 0x675   : > { %v3502_v44 = vpack.i.bf16 %v2717_v20, %v2714_v61  ;;  %v3269_v16 = vpop.f32.mrb[48].mxu0 }
 0x676   : > { %v3270_v50 = vpop.f32.mrb[49].mxu0 }
 0x677   : > { %v3271_v47 = vadd.f32 %v3270_v50, %v3269_v16  ;;  %3503 = vrot.lane.b32.xlu0 %v3502_v44, %s3754_s17  ;;  %v3272_v4 = vpop.f32.mrb[50].mxu0 }
 0x678   : > { %v3273_v51 = vpop.f32.mrb[51].mxu0 }
 0x679   : > { %v2722_v29 = vadd.f32 %v3271_v47, %v2658_v46 }
 0x67b   : > { %2746 = vrot.lane.b32.xlu1 %v2722_v29, %s3754_s17  ;;  %s3325_s17 = smul.u32 28, %s4966_s27 }
 0x67d   : > { %s305_s25 = scalar_lea.vmem %s4947_s7, %s3325_s17 }
 0x6d9   : > { %v3494_v35 = vpop.permute.xlu0 %3493 }
 0x6da   : > { %v3496_v58 = vunpack.i.h.bf16 %v3494_v35  ;;  %v3495_v60 = vunpack.i.l.bf16 %v3494_v35 }
 0x6dc   : > { %v2756_v32 = vmax.f32 %v2701_v2, %v3496_v58  ;;  %v2755_v9 = vmax.f32 %v2698_v1, %v3495_v60 }
 0x6de   : > { %v3507_v5 = vpack.i.bf16 %v2756_v32, %v2755_v9 }
 0x6e0   : > { %3508 = vrot.lane.b32.xlu0 %v3507_v5, %s3783_s15 }
 0x6e1   : > { %v3499_v59 = vpop.permute.xlu1 %3498 }
 0x6e2   : > { %v3501_v26 = vunpack.i.h.bf16 %v3499_v59  ;;  %v3500_v6 = vunpack.i.l.bf16 %v3499_v59 }
 0x6e4   : > { %v2758_v7 = vmax.f32 %v2709_v49, %v3501_v26  ;;  %v2757_v8 = vmax.f32 %v2706_v37, %v3500_v6 }
 0x6e6   : > { %v3512_v13 = vpack.i.bf16 %v2758_v7, %v2757_v8 }
 0x6e8   : > { %3513 = vrot.lane.b32.xlu1 %v3512_v13, %s3783_s15 }
 0x6e9   : > { %v3504_v21 = vpop.permute.xlu0 %3503 }
 0x6ea   : > { %v3506_v33 = vunpack.i.h.bf16 %v3504_v21  ;;  %v3505_v22 = vunpack.i.l.bf16 %v3504_v21 }
 0x6ec   : > { %v2760_v14 = vmax.f32 %v2717_v20, %v3506_v33  ;;  %v2759_v3 = vmax.f32 %v2714_v61, %v3505_v22 }
 0x6ed   : > { %v2747_v38 = vpop.permute.xlu1 %2746 }
 0x6ee   : > { %v3517_v1 = vpack.i.bf16 %v2760_v14, %v2759_v3  ;;  %v2761_v25 = vmax.f32 %v2722_v29, %v2747_v38 }
 0x6f0   : > { %2781 = vrot.lane.b32.xlu1 %v2761_v25, %s3783_s15  ;;  %3518 = vrot.lane.b32.xlu0 %v3517_v1, %s3783_s15 }
 0x752   : > { %v3509_v10 = vpop.permute.xlu0 %3508 }
 0x753   : > { %v3511_v2 = vunpack.i.h.bf16 %v3509_v10  ;;  %v3510_v39 = vunpack.i.l.bf16 %v3509_v10 }
 0x755   : > { %v2791_v28 = vmax.f32 %v2756_v32, %v3511_v2  ;;  %v2790_v27 = vmax.f32 %v2755_v9, %v3510_v39 }
 0x757   : > { %v2797_v54 = vpack.c.bf16 %v2791_v28, %v2790_v27 }
 0x759   : > { %3297 = vmatprep.mubr.msk.bf16.mxu0 %vm2845_vm14, %v2797_v54 }
 0x75a   : > { %v3514_v24 = vpop.permute.xlu1 %3513 }
 0x75b   : > { %v3516_v57 = vunpack.i.h.bf16 %v3514_v24  ;;  %v3515_v30 = vunpack.i.l.bf16 %v3514_v24 }
 0x75d   : > { %v2793_v34 = vmax.f32 %v2758_v7, %v3516_v57  ;;  %v2792_v36 = vmax.f32 %v2757_v8, %v3515_v30 }
 0x75f   : > { %v2798_v43 = vpack.c.bf16 %v2793_v34, %v2792_v36 }
 0x761   : > { %3298 = vmatmul.mubr.msk.bf16.vlgmr.msra.gmra.mrb[52].mxu0 %vm2845_vm14, %v2798_v43 }
 0x762   : > { %v2782_v37 = vpop.permute.xlu1 %2781  ;;  %v3519_v41 = vpop.permute.xlu0 %3518 }
 0x763   : > { %v3521_v49 = vunpack.i.h.bf16 %v3519_v41  ;;  %v3520_v48 = vunpack.i.l.bf16 %v3519_v41  ;;  %v2796_v53 = vmax.f32 %v2761_v25, %v2782_v37 }
 0x765   : > { %v2795_v42 = vmax.f32 %v2760_v14, %v3521_v49  ;;  %v2794_v12 = vmax.f32 %v2759_v3, %v3520_v48  ;;  %v2800_v23 = vpack.c.bf16 %v2796_v53, %v2796_v53 }
 0x767   : > { %v2799_v31 = vpack.c.bf16 %v2795_v42, %v2794_v12 }
 0x769   : > { %3301 = vmatprep.mubr.msk.bf16.mxu0 %vm2845_vm14, %v2799_v31 }
 0x76a   : > { %3302 = vmatmul.mubr.msk.bf16.gmra.mrb[56].mxu0 %vm2845_vm14, %v2800_v23 }
 0x834   : > { %v3299_v17 = vpop.f32.mrb[52].mxu0 }
 0x835   : > { %v2927_v0 = vmax.f32 %v3299_v17, 0.0  ;;  %v2895_v40 = vpop.f32.mrb[53].mxu0 }
 0x836   : > { %v2925_v18 = vmax.f32 %v2895_v40, 0.0  ;;  %v3300_v62 = vpop.f32.mrb[54].mxu0 }
 0x837   : > { %v3190_v45 = vpack.c.bf16 %v2927_v0, %v2927_v0  ;;  %v2928_v61 = vmax.f32 %v3300_v62, 0.0  ;;  %v2898_v11 = vpop.f32.mrb[55].mxu0 }
 0x838   : > { %v3188_v20 = vpack.c.bf16 %v2925_v18, %v2925_v18  ;;  %v2926_v15 = vmax.f32 %v2898_v11, 0.0 }
 0x839   : > { %2964 = vst.msk [vmem:[%s305_s25 + $0x8] sm:$0xf] %vm2961_vm7, %v3190_v45  ;;  %v3191_v44 = vpack.c.bf16 %v2928_v61, %v2928_v61 }
 0x83a   : > { %2962 = vst.msk [vmem:[%s305_s25] sm:$0xf] %vm2961_vm7, %v3188_v20  ;;  %v3189_v16 = vpack.c.bf16 %v2926_v15, %v2926_v15 }
 0x83b   : > { %2965 = vst.msk [vmem:[%s305_s25 + $0xc] sm:$0xf] %vm2961_vm7, %v3191_v44 }
 0x83c   : > { %2963 = vst.msk [vmem:[%s305_s25 + $0x4] sm:$0xf] %vm2961_vm7, %v3189_v16 }
 0x83d   : > { %v3303_v63 = vpop.f32.mrb[56].mxu0 }
 0x83e   : > { %v2931_v50 = vmax.f32 %v3303_v63, 0.0  ;;  %v2911_v46 = vpop.f32.mrb[57].mxu0 }
 0x83f   : > { %v2929_v47 = vmax.f32 %v2911_v46, 0.0  ;;  %v3304_v4 = vpop.f32.mrb[58].mxu0 }
 0x840   : > { %v3194_v51 = vpack.c.bf16 %v2931_v50, %v2931_v50  ;;  %v2914_v52 = vpop.f32.mrb[59].mxu0 }
 0x841   : > { %v3192_v29 = vpack.c.bf16 %v2929_v47, %v2929_v47  ;;  %v2930_v56 = vmax.f32 %v2914_v52, 0.0 }
 0x842   : > { %2969 = vst.msk [vmem:[%s305_s25 + $0x18] sm:$0x1] %vm2968_vm10, %v3194_v51 }
 0x843   : > { %2966 = vst.msk [vmem:[%s305_s25 + $0x10] sm:$0xf] %vm2961_vm7, %v3192_v29  ;;  %v3193_v35 = vpack.c.bf16 %v2930_v56, %v2930_v56 }
 0x845   : > { %2967 = vst.msk [vmem:[%s305_s25 + $0x14] sm:$0xf] %vm2961_vm7, %v3193_v35 }
 0x846 PF: > { %s19_s24 = sadd.s32 1, %s3744_s24  }
 0x847   : > { %p16_p5 = scmp.ge.s32.totalorder %s19_s24, 4  }
 0x849   :  { %18 = sbr.rel (!%p16_p5) target bundleno = 2 (0x2), region = 111 }
 0x850   :  { %2991 = vsyncpa [#allocation8], 1 }
 0x851   :  { %2993 = vsyncpa [#allocation8 + $0x1], 1 }
 0x852   :  { %2994 = vsyncpa [#allocation10], 1 }

// kernel: net_forward.3
= control target key start
LH: loop header
LB: loop body
LE: loop exit
PB: predicated region body
PF: predicated region fallthrough
CT: control target
= control target key end

     0   :  { %v225_v36 = vlaneseq  ;;  %v2683_v37 = vmov 1966171168   ;;  %s3456_s0 = inlined_call_operand.vmem [shape: bf16[2,800], index: 0, kind: input, shape index: {}]   ;;  %s3457_s1 = inlined_call_operand.vmem [shape: bf16[800,512], index: 1, kind: input, shape index: {}]   ;;  %s3458_s2 = inlined_call_operand.vmem [shape: f32[1,512], index: 2, kind: input, shape index: {}]   ;;  %s3459_s3 = inlined_call_operand.vmem [shape: bf16[512,128], index: 3, kind: input, shape index: {}]   ;;  %s3460_s4 = inlined_call_operand.vmem [shape: f32[1,128], index: 4, kind: input, shape index: {}]   ;;  %s3461_s5 = inlined_call_operand.hbm [shape: f32[2,10], index: 5, kind: output, shape index: {}]  }
   0x1   :  { %v2322_v0 = vld [vmem:[%s3457_s1 + $0x4] ss:$16 sps:$4 sm:$0xff]   ;;  %v2324_v1 = vld [vmem:[%s3457_s1 + $0xc] ss:$16 sps:$4 sm:$0xff]   ;;  %v2326_v2 = vld [vmem:[%s3457_s1] ss:$16 sps:$4 sm:$0xff]   ;;  %v248_v38 = vunpack.c.l.s4 %v2683_v37 }
   0x2   :  { %1304 = vmatprep.subr.bf16.mxu0 %v2322_v0  ;;  %v2327_v3 = vld [vmem:[%s3457_s1 + $0x8] ss:$16 sps:$4 sm:$0xff]   ;;  %1468 = vmatprep.subr.bf16.mxu1 %v2324_v1  ;;  %v2328_v4 = vld [vmem:[%s3457_s1 + $0x24] ss:$16 sps:$4 sm:$0xff]   ;;  %v2330_v5 = vld [vmem:[%s3457_s1 + $0x2c] ss:$16 sps:$4 sm:$0xff]  }
   0x3   :  { %1305 = vmatpush1.bf16.msra.mxu0 %v2326_v2  ;;  %1469 = vmatpush1.bf16.msra.mxu1 %v2327_v3  ;;  %v2332_v6 = vld [vmem:[%s3457_s1 + $0x20] ss:$16 sps:$4 sm:$0xff]   ;;  %v2333_v7 = vld [vmem:[%s3457_s1 + $0x28] ss:$16 sps:$4 sm:$0xff]   ;;  %v2334_v8 = vld [vmem:[%s3457_s1 + $0x44] ss:$16 sps:$4 sm:$0xff]   ;;  %v249_v43 = vunpack.c.0.s8 %v248_v38 }
   0x4   :  { %1306 = vmatprep.subr.bf16.mxu0 %v2328_v4  ;;  %1470 = vmatprep.subr.bf16.mxu1 %v2330_v5  ;;  %v2336_v9 = vld [vmem:[%s3457_s1 + $0x4c] ss:$16 sps:$4 sm:$0xff]   ;;  %v2338_v10 = vld [vmem:[%s3457_s1 + $0x40] ss:$16 sps:$4 sm:$0xff]   ;;  %v2339_v11 = vld [vmem:[%s3457_s1 + $0x48] ss:$16 sps:$4 sm:$0xff]  }
   0x5   :  { %v2340_v12 = vld [vmem:[%s3457_s1 + $0x64] ss:$16 sps:$4 sm:$0xff]   ;;  %v2342_v13 = vld [vmem:[%s3457_s1 + $0x6c] ss:$16 sps:$4 sm:$0xff]   ;;  %v2344_v14 = vld [vmem:[%s3457_s1 + $0x60] ss:$16 sps:$4 sm:$0xff]  }
   0x6   :  { %v2345_v15 = vld [vmem:[%s3457_s1 + $0x68] ss:$16 sps:$4 sm:$0xff]   ;;  %v2346_v16 = vld [vmem:[%s3457_s1 + $0x84] ss:$16 sps:$4 sm:$0xff]   ;;  %v2348_v17 = vld [vmem:[%s3457_s1 + $0x8c] ss:$16 sps:$4 sm:$0xff]  }
   0x7   :  { %1307 = vmatpush1.bf16.msra.mxu0 %v2332_v6  ;;  %1471 = vmatpush1.bf16.msra.mxu1 %v2333_v7  ;;  %v2350_v18 = vld [vmem:[%s3457_s1 + $0x80] ss:$16 sps:$4 sm:$0xff]   ;;  %v2351_v19 = vld [vmem:[%s3457_s1 + $0x88] ss:$16 sps:$4 sm:$0xff]   ;;  %v2352_v20 = vld [vmem:[%s3457_s1 + $0xa4] ss:$16 sps:$4 sm:$0xff]  }
   0x8   :  { %1308 = vmatprep.subr.bf16.mxu0 %v2334_v8  ;;  %1472 = vmatprep.subr.bf16.mxu1 %v2336_v9  ;;  %v2354_v21 = vld [vmem:[%s3457_s1 + $0xac] ss:$16 sps:$4 sm:$0xff]   ;;  %v2356_v22 = vld [vmem:[%s3457_s1 + $0xa0] ss:$16 sps:$4 sm:$0xff]   ;;  %v2357_v23 = vld [vmem:[%s3457_s1 + $0xa8] ss:$16 sps:$4 sm:$0xff]  }
   0x9   :  { %v2358_v24 = vld [vmem:[%s3457_s1 + $0xc4] ss:$16 sps:$4 sm:$0xff]   ;;  %v2360_v25 = vld [vmem:[%s3457_s1 + $0xcc] ss:$16 sps:$4 sm:$0xff]   ;;  %v2362_v26 = vld [vmem:[%s3457_s1 + $0xc0] ss:$16 sps:$4 sm:$0xff]  }
   0xa   :  { %v2363_v27 = vld [vmem:[%s3457_s1 + $0xc8] ss:$16 sps:$4 sm:$0xff]   ;;  %v2364_v28 = vld [vmem:[%s3457_s1 + $0xe4] ss:$16 sps:$4 sm:$0xff]   ;;  %v2366_v29 = vld [vmem:[%s3457_s1 + $0xec] ss:$16 sps:$4 sm:$0xff]  }
   0xb   :  { %1309 = vmatpush1.bf16.msra.mxu0 %v2338_v10  ;;  %1473 = vmatpush1.bf16.msra.mxu1 %v2339_v11  ;;  %v2368_v30 = vld [vmem:[%s3457_s1 + $0xe0] ss:$16 sps:$4 sm:$0xff]   ;;  %v2369_v31 = vld [vmem:[%s3457_s1 + $0xe8] ss:$16 sps:$4 sm:$0xff]   ;;  %v2370_v32 = vld [vmem:[%s3457_s1 + $0x104] ss:$16 sps:$4 sm:$0xff]  }
   0xc   :  { %1310 = vmatprep.subr.bf16.mxu0 %v2340_v12  ;;  %1474 = vmatprep.subr.bf16.mxu1 %v2342_v13  ;;  %v2372_v33 = vld [vmem:[%s3457_s1 + $0x10c] ss:$16 sps:$4 sm:$0xff]   ;;  %v2374_v34 = vld [vmem:[%s3457_s1 + $0x100] ss:$16 sps:$4 sm:$0xff]   ;;  %v2375_v35 = vld [vmem:[%s3457_s1 + $0x108] ss:$16 sps:$4 sm:$0xff]  }
   0xd   :  { %v2376_v39 = vld [vmem:[%s3457_s1 + $0x124] ss:$16 sps:$4 sm:$0xff]   ;;  %v2378_v40 = vld [vmem:[%s3457_s1 + $0x12c] ss:$16 sps:$4 sm:$0xff]   ;;  %v2380_v41 = vld [vmem:[%s3457_s1 + $0x120] ss:$16 sps:$4 sm:$0xff]  }
   0xe   :  { %v2833_v42 = vshrl.u32 %v225_v36, 7  ;;  %v2381_v44 = vld [vmem:[%s3457_s1 + $0x128] ss:$16 sps:$4 sm:$0xff]   ;;  %v2382_v45 = vld [vmem:[%s3457_s1 + $0x144] ss:$16 sps:$4 sm:$0xff]  }
   0xf   :  { %1311 = vmatpush1.bf16.msra.mxu0 %v2344_v14  ;;  %1475 = vmatpush1.bf16.msra.mxu1 %v2345_v15  ;;  %v2384_v46 = vld [vmem:[%s3457_s1 + $0x14c] ss:$16 sps:$4 sm:$0xff]   ;;  %v2386_v47 = vld [vmem:[%s3457_s1 + $0x140] ss:$16 sps:$4 sm:$0xff]   ;;  %v2387_v48 = vld [vmem:[%s3457_s1 + $0x148] ss:$16 sps:$4 sm:$0xff]  }
  0x10   :  { %1312 = vmatprep.subr.bf16.mxu0 %v2346_v16  ;;  %1476 = vmatprep.subr.bf16.mxu1 %v2348_v17  ;;  %v252_v49 = vsub.s32 %v249_v43, %v2833_v42  ;;  %v2388_v50 = vld [vmem:[%s3457_s1 + $0x164] ss:$16 sps:$4 sm:$0xff]   ;;  %v2390_v51 = vld [vmem:[%s3457_s1 + $0x16c] ss:$16 sps:$4 sm:$0xff]   ;;  %v2392_v53 = vld [vmem:[%s3457_s1 + $0x160] ss:$16 sps:$4 sm:$0xff]  }
  0x11   :  { %v22_v52 = vld [vmem:[%s3456_s0] sm:$0x7f]  ;;  %v2393_v55 = vld [vmem:[%s3457_s1 + $0x168] ss:$16 sps:$4 sm:$0xff]   ;;  %v2396_v57 = vld [vmem:[%s3457_s1 + $0x18c] ss:$16 sps:$4 sm:$0xff]  }
  0x12   :  { %v253_v54 = vrot.slane %v22_v52, %v252_v49  ;;  %v2394_v56 = vld [vmem:[%s3457_s1 + $0x184] ss:$16 sps:$4 sm:$0xff]   ;;  %v2398_v59 = vld [vmem:[%s3457_s1 + $0x180] ss:$16 sps:$4 sm:$0xff]   ;;  %v2399_v61 = vld [vmem:[%s3457_s1 + $0x188] ss:$16 sps:$4 sm:$0xff]   ;;  %v246_v8 = vcombine.high %v22_v52, %v22_v52 }
  0x13   :  { %1313 = vmatpush1.bf16.msra.mxu0 %v2350_v18  ;;  %1477 = vmatpush1.bf16.msra.mxu1 %v2351_v19  ;;  %v2400_v62 = vld [vmem:[%s3457_s1 + $0x1a4] ss:$16 sps:$4 sm:$0xff]   ;;  %v2402_v63 = vld [vmem:[%s3457_s1 + $0x1ac] ss:$16 sps:$4 sm:$0xff]   ;;  %v2404_v0 = vld [vmem:[%s3457_s1 + $0x1a0] ss:$16 sps:$4 sm:$0xff]  }
  0x14   :  { %1314 = vmatprep.subr.bf16.mxu0 %v2352_v20  ;;  %1478 = vmatprep.subr.bf16.mxu1 %v2354_v21  ;;  %v261_v58 = vcombine.high %v253_v54, %v253_v54  ;;  %v2405_v1 = vld [vmem:[%s3457_s1 + $0x1a8] ss:$16 sps:$4 sm:$0xff]   ;;  %v2406_v2 = vld [vmem:[%s3457_s1 + $0x1c4] ss:$16 sps:$4 sm:$0xff]   ;;  %v2408_v3 = vld [vmem:[%s3457_s1 + $0x1cc] ss:$16 sps:$4 sm:$0xff]   ;;  %v260_v11 = vrot.slane %v246_v8, %v252_v49  ;;  %v2923_v16 = vrot.slane %v253_v54, %v252_v49 }
  0x15   :  { %v2410_v4 = vld [vmem:[%s3457_s1 + $0x1c0] ss:$16 sps:$4 sm:$0xff]   ;;  %v2411_v5 = vld [vmem:[%s3457_s1 + $0x1c8] ss:$16 sps:$4 sm:$0xff]   ;;  %v2412_v6 = vld [vmem:[%s3457_s1 + $0x1e4] ss:$16 sps:$4 sm:$0xff]  }
  0x16   :  { %v283_v60 = vrot.slane %v261_v58, %v252_v49  ;;  %v2414_v7 = vld [vmem:[%s3457_s1 + $0x1ec] ss:$16 sps:$4 sm:$0xff]   ;;  %v2416_v9 = vld [vmem:[%s3457_s1 + $0x1e0] ss:$16 sps:$4 sm:$0xff]   ;;  %v2417_v10 = vld [vmem:[%s3457_s1 + $0x1e8] ss:$16 sps:$4 sm:$0xff]   ;;  %v262_v14 = vcombine.high %v260_v11, %v260_v11  ;;  %v2930_v19 = vrot.slane %v260_v11, %v252_v49 }
  0x17   :  { %1315 = vmatpush1.bf16.msra.mxu0 %v2356_v22  ;;  %1479 = vmatpush1.bf16.msra.mxu1 %v2357_v23  ;;  %v2420_v12 = vld [vmem:[%s3457_s1 + $0x204] ss:$16 sps:$4 sm:$0xff]   ;;  %v2423_v13 = vld [vmem:[%s3457_s1 + $0x20c] ss:$16 sps:$4 sm:$0xff]   ;;  %v2418_v15 = vld [vmem:[%s3457_s1 + $0x200] ss:$16 sps:$4 sm:$0xff]  }
  0x18   :  { %1316 = vmatprep.subr.bf16.mxu0 %v2358_v24  ;;  %1480 = vmatprep.subr.bf16.mxu1 %v2360_v25  ;;  %v2421_v17 = vld [vmem:[%s3457_s1 + $0x208] ss:$16 sps:$4 sm:$0xff]   ;;  %v2928_v18 = vrot.slane %v262_v14, %v252_v49  ;;  %v2426_v20 = vld [vmem:[%s3457_s1 + $0x224] ss:$16 sps:$4 sm:$0xff]   ;;  %v2429_v21 = vld [vmem:[%s3457_s1 + $0x22c] ss:$16 sps:$4 sm:$0xff]   ;;  %v293_v22 = vcombine.high %v283_v60, %v283_v60 }
  0x19   :  { %1336 = vmatprep.mubr.bf16.mxu0 %v283_v60  ;;  %1500 = vmatprep.mubr.bf16.mxu1 %v283_v60  ;;  %v2424_v23 = vld [vmem:[%s3457_s1 + $0x220] ss:$16 sps:$4 sm:$0xff]   ;;  %v2427_v24 = vld [vmem:[%s3457_s1 + $0x228] ss:$16 sps:$4 sm:$0xff]   ;;  %v2432_v25 = vld [vmem:[%s3457_s1 + $0x244] ss:$16 sps:$4 sm:$0xff]  }
  0x1a   :  { %v2445_v36 = vld [vmem:[%s3457_s1 + $0x288] ss:$16 sps:$4 sm:$0xff]   ;;  %v2450_v37 = vld [vmem:[%s3457_s1 + $0x2a4] ss:$16 sps:$4 sm:$0xff]   ;;  %v2453_v38 = vld [vmem:[%s3457_s1 + $0x2ac] ss:$16 sps:$4 sm:$0xff]  }
  0x1b   :  { %1317 = vmatpush1.bf16.msra.mxu0 %v2362_v26  ;;  %1481 = vmatpush1.bf16.msra.mxu1 %v2363_v27  ;;  %v2435_v26 = vld [vmem:[%s3457_s1 + $0x24c] ss:$16 sps:$4 sm:$0xff]   ;;  %v2430_v27 = vld [vmem:[%s3457_s1 + $0x240] ss:$16 sps:$4 sm:$0xff]   ;;  %v2463_v49 = vld [vmem:[%s3457_s1 + $0x2e8] ss:$16 sps:$4 sm:$0xff]  }
  0x1c   :  { %1318 = vmatprep.subr.bf16.mxu0 %v2364_v28  ;;  %1482 = vmatprep.subr.bf16.mxu1 %v2366_v29  ;;  %v2433_v28 = vld [vmem:[%s3457_s1 + $0x248] ss:$16 sps:$4 sm:$0xff]   ;;  %v2438_v29 = vld [vmem:[%s3457_s1 + $0x264] ss:$16 sps:$4 sm:$0xff]   ;;  %v2459_v43 = vld [vmem:[%s3457_s1 + $0x2cc] ss:$16 sps:$4 sm:$0xff]  }
  0x1d   :  { %v2466_v52 = vld [vmem:[%s3457_s1 + $0x300] ss:$16 sps:$4 sm:$0xff]   ;;  %v2474_v54 = vld [vmem:[%s3457_s1 + $0x324] ss:$16 sps:$4 sm:$0xff]   ;;  %v2507_v11 = vld [vmem:[%s3457_s1 + $0x3cc] ss:$16 sps:$4 sm:$0xff]  }
  0x1e   :  { %v2480_v58 = vld [vmem:[%s3457_s1 + $0x344] ss:$16 sps:$4 sm:$0xff]   ;;  %v2478_v60 = vld [vmem:[%s3457_s1 + $0x340] ss:$16 sps:$4 sm:$0xff]  }
  0x1f   :  { %1319 = vmatpush1.bf16.msra.mxu0 %v2368_v30  ;;  %1483 = vmatpush1.bf16.msra.mxu1 %v2369_v31  ;;  %v2441_v30 = vld [vmem:[%s3457_s1 + $0x26c] ss:$16 sps:$4 sm:$0xff]   ;;  %v2436_v31 = vld [vmem:[%s3457_s1 + $0x260] ss:$16 sps:$4 sm:$0xff]   ;;  %v2510_v14 = vld [vmem:[%s3457_s1 + $0x3e4] ss:$16 sps:$4 sm:$0xff]  }
  0x20   :  { %1320 = vmatprep.subr.bf16.mxu0 %v2370_v32  ;;  %1484 = vmatprep.subr.bf16.mxu1 %v2372_v33  ;;  %v2439_v32 = vld [vmem:[%s3457_s1 + $0x268] ss:$16 sps:$4 sm:$0xff]   ;;  %v2444_v33 = vld [vmem:[%s3457_s1 + $0x284] ss:$16 sps:$4 sm:$0xff]   ;;  %v2496_v8 = vld [vmem:[%s3457_s1 + $0x3a0] ss:$16 sps:$4 sm:$0xff]  }
  0x23   :  { %1321 = vmatpush1.bf16.msra.mxu0 %v2374_v34  ;;  %1485 = vmatpush1.bf16.msra.mxu1 %v2375_v35  ;;  %v2447_v34 = vld [vmem:[%s3457_s1 + $0x28c] ss:$16 sps:$4 sm:$0xff]   ;;  %v2442_v35 = vld [vmem:[%s3457_s1 + $0x280] ss:$16 sps:$4 sm:$0xff]  }
  0x24   :  { %1322 = vmatprep.subr.bf16.mxu0 %v2376_v39  ;;  %1486 = vmatprep.subr.bf16.mxu1 %v2378_v40  ;;  %v2448_v39 = vld [vmem:[%s3457_s1 + $0x2a0] ss:$16 sps:$4 sm:$0xff]   ;;  %v2451_v40 = vld [vmem:[%s3457_s1 + $0x2a8] ss:$16 sps:$4 sm:$0xff]  }
  0x27   :  { %1323 = vmatpush1.bf16.msra.mxu0 %v2380_v41  ;;  %1487 = vmatpush1.bf16.msra.mxu1 %v2381_v44  ;;  %v2456_v41 = vld [vmem:[%s3457_s1 + $0x2c4] ss:$16 sps:$4 sm:$0xff]   ;;  %v2454_v44 = vld [vmem:[%s3457_s1 + $0x2c0] ss:$16 sps:$4 sm:$0xff]  }
  0x28   :  { %1324 = vmatprep.subr.bf16.mxu0 %v2382_v45  ;;  %1488 = vmatprep.subr.bf16.mxu1 %v2384_v46  ;;  %v2457_v45 = vld [vmem:[%s3457_s1 + $0x2c8] ss:$16 sps:$4 sm:$0xff]   ;;  %v2462_v46 = vld [vmem:[%s3457_s1 + $0x2e4] ss:$16 sps:$4 sm:$0xff]  }
  0x2b   :  { %1325 = vmatpush1.bf16.msra.mxu0 %v2386_v47  ;;  %1489 = vmatpush1.bf16.msra.mxu1 %v2387_v48  ;;  %v2465_v47 = vld [vmem:[%s3457_s1 + $0x2ec] ss:$16 sps:$4 sm:$0xff]   ;;  %v2460_v48 = vld [vmem:[%s3457_s1 + $0x2e0] ss:$16 sps:$4 sm:$0xff]  }
  0x2c   :  { %1326 = vmatprep.subr.bf16.mxu0 %v2388_v50  ;;  %1490 = vmatprep.subr.bf16.mxu1 %v2390_v51  ;;  %v2468_v50 = vld [vmem:[%s3457_s1 + $0x304] ss:$16 sps:$4 sm:$0xff]   ;;  %v2471_v51 = vld [vmem:[%s3457_s1 + $0x30c] ss:$16 sps:$4 sm:$0xff]  }
  0x2f   :  { %1327 = vmatpush1.bf16.msra.mxu0 %v2392_v53  ;;  %1491 = vmatpush1.bf16.msra.mxu1 %v2393_v55  ;;  %v2469_v53 = vld [vmem:[%s3457_s1 + $0x308] ss:$16 sps:$4 sm:$0xff]   ;;  %v2477_v55 = vld [vmem:[%s3457_s1 + $0x32c] ss:$16 sps:$4 sm:$0xff]  }
  0x30   :  { %1328 = vmatprep.subr.bf16.mxu0 %v2394_v56  ;;  %1492 = vmatprep.subr.bf16.mxu1 %v2396_v57  ;;  %v2472_v56 = vld [vmem:[%s3457_s1 + $0x320] ss:$16 sps:$4 sm:$0xff]   ;;  %v2475_v57 = vld [vmem:[%s3457_s1 + $0x328] ss:$16 sps:$4 sm:$0xff]  }
  0x33   :  { %1329 = vmatpush1.bf16.msra.mxu0 %v2398_v59  ;;  %1493 = vmatpush1.bf16.msra.mxu1 %v2399_v61  ;;  %v2483_v59 = vld [vmem:[%s3457_s1 + $0x34c] ss:$16 sps:$4 sm:$0xff]   ;;  %v2481_v61 = vld [vmem:[%s3457_s1 + $0x348] ss:$16 sps:$4 sm:$0xff]  }
  0x34   :  { %1330 = vmatprep.subr.bf16.mxu0 %v2400_v62  ;;  %1494 = vmatprep.subr.bf16.mxu1 %v2402_v63  ;;  %v2486_v62 = vld [vmem:[%s3457_s1 + $0x364] ss:$16 sps:$4 sm:$0xff]   ;;  %v2489_v63 = vld [vmem:[%s3457_s1 + $0x36c] ss:$16 sps:$4 sm:$0xff]  }
  0x37   :  { %1331 = vmatpush1.bf16.msra.mxu0 %v2404_v0  ;;  %1495 = vmatpush1.bf16.msra.mxu1 %v2405_v1  ;;  %v2484_v0 = vld [vmem:[%s3457_s1 + $0x360] ss:$16 sps:$4 sm:$0xff]   ;;  %v2487_v1 = vld [vmem:[%s3457_s1 + $0x368] ss:$16 sps:$4 sm:$0xff]  }
  0x38   :  { %1332 = vmatprep.subr.bf16.mxu0 %v2406_v2  ;;  %1496 = vmatprep.subr.bf16.mxu1 %v2408_v3  ;;  %v2492_v2 = vld [vmem:[%s3457_s1 + $0x384] ss:$16 sps:$4 sm:$0xff]   ;;  %v2495_v3 = vld [vmem:[%s3457_s1 + $0x38c] ss:$16 sps:$4 sm:$0xff]  }
  0x3b   :  { %1333 = vmatpush1.bf16.msra.mxu0 %v2410_v4  ;;  %1497 = vmatpush1.bf16.msra.mxu1 %v2411_v5  ;;  %v2490_v4 = vld [vmem:[%s3457_s1 + $0x380] ss:$16 sps:$4 sm:$0xff]   ;;  %v2493_v5 = vld [vmem:[%s3457_s1 + $0x388] ss:$16 sps:$4 sm:$0xff]  }
  0x3c   :  { %1334 = vmatprep.subr.bf16.mxu0 %v2412_v6  ;;  %1498 = vmatprep.subr.bf16.mxu1 %v2414_v7  ;;  %v2498_v6 = vld [vmem:[%s3457_s1 + $0x3a4] ss:$16 sps:$4 sm:$0xff]   ;;  %v2501_v7 = vld [vmem:[%s3457_s1 + $0x3ac] ss:$16 sps:$4 sm:$0xff]  }
  0x3f   :  { %1335 = vmatpush1.bf16.msra.mxu0 %v2416_v9  ;;  %1499 = vmatpush1.bf16.msra.mxu1 %v2417_v10  ;;  %v2499_v9 = vld [vmem:[%s3457_s1 + $0x3a8] ss:$16 sps:$4 sm:$0xff]   ;;  %v2504_v10 = vld [vmem:[%s3457_s1 + $0x3c4] ss:$16 sps:$4 sm:$0xff]  }
  0x40   :  { %1345 = vmatprep.subr.bf16.mxu0 %v2420_v12  ;;  %1509 = vmatprep.subr.bf16.mxu1 %v2423_v13  ;;  %v2502_v12 = vld [vmem:[%s3457_s1 + $0x3c0] ss:$16 sps:$4 sm:$0xff]   ;;  %v2505_v13 = vld [vmem:[%s3457_s1 + $0x3c8] ss:$16 sps:$4 sm:$0xff]  }
  0x42   :  { %1337 = vmatmul.mubr.bf16.vlgmr.msra.gmra.mrb[0].mxu0 %v2923_v16  ;;  %1501 = vmatmul.mubr.bf16.vlgmr.msra.gmra.mrb[0].mxu1 %v2923_v16 }
  0x43   :  { %1346 = vmatpush1.bf16.msra.mxu0 %v2418_v15  ;;  %1510 = vmatpush1.bf16.msra.mxu1 %v2421_v17  ;;  %v2513_v15 = vld [vmem:[%s3457_s1 + $0x3ec] ss:$16 sps:$4 sm:$0xff]   ;;  %v2508_v17 = vld [vmem:[%s3457_s1 + $0x3e0] ss:$16 sps:$4 sm:$0xff]  }
  0x44   :  { %1347 = vmatprep.subr.bf16.mxu0 %v2426_v20  ;;  %1511 = vmatprep.subr.bf16.mxu1 %v2429_v21  ;;  %v2511_v20 = vld [vmem:[%s3457_s1 + $0x3e8] ss:$16 sps:$4 sm:$0xff]   ;;  %v2516_v21 = vld [vmem:[%s3457_s1 + $0x404] ss:$16 sps:$4 sm:$0xff]  }
  0x45   :  { %1377 = vmatprep.mubr.bf16.mxu0 %v293_v22  ;;  %1541 = vmatprep.mubr.bf16.mxu1 %v293_v22  ;;  %v2519_v22 = vld [vmem:[%s3457_s1 + $0x40c] ss:$16 sps:$4 sm:$0xff]  }
  0x47   :  { %1348 = vmatpush1.bf16.msra.mxu0 %v2424_v23  ;;  %1512 = vmatpush1.bf16.msra.mxu1 %v2427_v24  ;;  %v2514_v23 = vld [vmem:[%s3457_s1 + $0x400] ss:$16 sps:$4 sm:$0xff]   ;;  %v291_v24 = vcombine.high %v2923_v16, %v2923_v16 }
  0x48   :  { %1349 = vmatprep.subr.bf16.mxu0 %v2432_v25  ;;  %1513 = vmatprep.subr.bf16.mxu1 %v2435_v26  ;;  %v2517_v25 = vld [vmem:[%s3457_s1 + $0x408] ss:$16 sps:$4 sm:$0xff]   ;;  %v2522_v26 = vld [vmem:[%s3457_s1 + $0x424] ss:$16 sps:$4 sm:$0xff]   ;;  %v2520_v16 = vld [vmem:[%s3457_s1 + $0x420] ss:$16 sps:$4 sm:$0xff]  }
  0x4b   :  { %1350 = vmatpush1.bf16.msra.mxu0 %v2430_v27  ;;  %1514 = vmatpush1.bf16.msra.mxu1 %v2433_v28  ;;  %v2525_v27 = vld [vmem:[%s3457_s1 + $0x42c] ss:$16 sps:$4 sm:$0xff]   ;;  %v2523_v28 = vld [vmem:[%s3457_s1 + $0x428] ss:$16 sps:$4 sm:$0xff]  }
  0x4c   :  { %1351 = vmatprep.subr.bf16.mxu0 %v2438_v29  ;;  %1515 = vmatprep.subr.bf16.mxu1 %v2441_v30  ;;  %v2528_v29 = vld [vmem:[%s3457_s1 + $0x444] ss:$16 sps:$4 sm:$0xff]   ;;  %v2531_v30 = vld [vmem:[%s3457_s1 + $0x44c] ss:$16 sps:$4 sm:$0xff]  }
  0x4f   :  { %1352 = vmatpush1.bf16.msra.mxu0 %v2436_v31  ;;  %1516 = vmatpush1.bf16.msra.mxu1 %v2439_v32  ;;  %v2526_v31 = vld [vmem:[%s3457_s1 + $0x440] ss:$16 sps:$4 sm:$0xff]   ;;  %v2529_v32 = vld [vmem:[%s3457_s1 + $0x448] ss:$16 sps:$4 sm:$0xff]  }
  0x50   :  { %1353 = vmatprep.subr.bf16.mxu0 %v2444_v33  ;;  %1517 = vmatprep.subr.bf16.mxu1 %v2447_v34  ;;  %v2534_v33 = vld [vmem:[%s3457_s1 + $0x464] ss:$16 sps:$4 sm:$0xff]   ;;  %v2537_v34 = vld [vmem:[%s3457_s1 + $0x46c] ss:$16 sps:$4 sm:$0xff]  }
  0x53   :  { %1354 = vmatpush1.bf16.msra.mxu0 %v2442_v35  ;;  %1518 = vmatpush1.bf16.msra.mxu1 %v2445_v36  ;;  %v2535_v35 = vld [vmem:[%s3457_s1 + $0x468] ss:$16 sps:$4 sm:$0xff]   ;;  %v2540_v36 = vld [vmem:[%s3457_s1 + $0x484] ss:$16 sps:$4 sm:$0xff]  }
  0x54   :  { %1355 = vmatprep.subr.bf16.mxu0 %v2450_v37  ;;  %1519 = vmatprep.subr.bf16.mxu1 %v2453_v38  ;;  %v2543_v37 = vld [vmem:[%s3457_s1 + $0x48c] ss:$16 sps:$4 sm:$0xff]   ;;  %v2538_v38 = vld [vmem:[%s3457_s1 + $0x480] ss:$16 sps:$4 sm:$0xff]  }
  0x57   :  { %1356 = vmatpush1.bf16.msra.mxu0 %v2448_v39  ;;  %1520 = vmatpush1.bf16.msra.mxu1 %v2451_v40  ;;  %v2541_v39 = vld [vmem:[%s3457_s1 + $0x488] ss:$16 sps:$4 sm:$0xff]   ;;  %v2546_v40 = vld [vmem:[%s3457_s1 + $0x4a4] ss:$16 sps:$4 sm:$0xff]  }
  0x58   :  { %1357 = vmatprep.subr.bf16.mxu0 %v2456_v41  ;;  %1521 = vmatprep.subr.bf16.mxu1 %v2459_v43  ;;  %v2549_v41 = vld [vmem:[%s3457_s1 + $0x4ac] ss:$16 sps:$4 sm:$0xff]   ;;  %v2544_v43 = vld [vmem:[%s3457_s1 + $0x4a0] ss:$16 sps:$4 sm:$0xff]  }
  0x5b   :  { %1358 = vmatpush1.bf16.msra.mxu0 %v2454_v44  ;;  %1522 = vmatpush1.bf16.msra.mxu1 %v2457_v45  ;;  %v2547_v44 = vld [vmem:[%s3457_s1 + $0x4a8] ss:$16 sps:$4 sm:$0xff]   ;;  %v2552_v45 = vld [vmem:[%s3457_s1 + $0x4c4] ss:$16 sps:$4 sm:$0xff]  }
  0x5c   :  { %1359 = vmatprep.subr.bf16.mxu0 %v2462_v46  ;;  %1523 = vmatprep.subr.bf16.mxu1 %v2465_v47  ;;  %v2555_v46 = vld [vmem:[%s3457_s1 + $0x4cc] ss:$16 sps:$4 sm:$0xff]   ;;  %v2550_v47 = vld [vmem:[%s3457_s1 + $0x4c0] ss:$16 sps:$4 sm:$0xff]  }
  0x5f   :  { %1360 = vmatpush1.bf16.msra.mxu0 %v2460_v48  ;;  %1524 = vmatpush1.bf16.msra.mxu1 %v2463_v49  ;;  %v2553_v48 = vld [vmem:[%s3457_s1 + $0x4c8] ss:$16 sps:$4 sm:$0xff]   ;;  %v2558_v49 = vld [vmem:[%s3457_s1 + $0x4e4] ss:$16 sps:$4 sm:$0xff]  }
  0x60   :  { %1361 = vmatprep.subr.bf16.mxu0 %v2468_v50  ;;  %1525 = vmatprep.subr.bf16.mxu1 %v2471_v51  ;;  %v2561_v50 = vld [vmem:[%s3457_s1 + $0x4ec] ss:$16 sps:$4 sm:$0xff]   ;;  %v2556_v51 = vld [vmem:[%s3457_s1 + $0x4e0] ss:$16 sps:$4 sm:$0xff]  }
  0x63   :  { %1362 = vmatpush1.bf16.msra.mxu0 %v2466_v52  ;;  %1526 = vmatpush1.bf16.msra.mxu1 %v2469_v53  ;;  %v2559_v52 = vld [vmem:[%s3457_s1 + $0x4e8] ss:$16 sps:$4 sm:$0xff]   ;;  %v2564_v53 = vld [vmem:[%s3457_s1 + $0x504] ss:$16 sps:$4 sm:$0xff]  }
  0x64   :  { %1363 = vmatprep.subr.bf16.mxu0 %v2474_v54  ;;  %1527 = vmatprep.subr.bf16.mxu1 %v2477_v55  ;;  %v2567_v54 = vld [vmem:[%s3457_s1 + $0x50c] ss:$16 sps:$4 sm:$0xff]   ;;  %v2562_v55 = vld [vmem:[%s3457_s1 + $0x500] ss:$16 sps:$4 sm:$0xff]  }
  0x67   :  { %1364 = vmatpush1.bf16.msra.mxu0 %v2472_v56  ;;  %1528 = vmatpush1.bf16.msra.mxu1 %v2475_v57  ;;  %v2565_v56 = vld [vmem:[%s3457_s1 + $0x508] ss:$16 sps:$4 sm:$0xff]   ;;  %v2570_v57 = vld [vmem:[%s3457_s1 + $0x524] ss:$16 sps:$4 sm:$0xff]  }
  0x68   :  { %1365 = vmatprep.subr.bf16.mxu0 %v2480_v58  ;;  %1529 = vmatprep.subr.bf16.mxu1 %v2483_v59  ;;  %v2573_v58 = vld [vmem:[%s3457_s1 + $0x52c] ss:$16 sps:$4 sm:$0xff]  }
  0x6b   :  { %1366 = vmatpush1.bf16.msra.mxu0 %v2478_v60  ;;  %1530 = vmatpush1.bf16.msra.mxu1 %v2481_v61 }
  0x6c   :  { %1367 = vmatprep.subr.bf16.mxu0 %v2486_v62  ;;  %1531 = vmatprep.subr.bf16.mxu1 %v2489_v63 }
  0x6f   :  { %1368 = vmatpush1.bf16.msra.mxu0 %v2484_v0  ;;  %1532 = vmatpush1.bf16.msra.mxu1 %v2487_v1 }
  0x70   :  { %1369 = vmatprep.subr.bf16.mxu0 %v2492_v2  ;;  %1533 = vmatprep.subr.bf16.mxu1 %v2495_v3 }
  0x73   :  { %1370 = vmatpush1.bf16.msra.mxu0 %v2490_v4  ;;  %1534 = vmatpush1.bf16.msra.mxu1 %v2493_v5 }
  0x74   :  { %1371 = vmatprep.subr.bf16.mxu0 %v2498_v6  ;;  %1535 = vmatprep.subr.bf16.mxu1 %v2501_v7 }
  0x77   :  { %1372 = vmatpush1.bf16.msra.mxu0 %v2496_v8  ;;  %1536 = vmatpush1.bf16.msra.mxu1 %v2499_v9 }
  0x78   :  { %1373 = vmatprep.subr.bf16.mxu0 %v2504_v10  ;;  %1537 = vmatprep.subr.bf16.mxu1 %v2507_v11 }
  0x7b   :  { %1374 = vmatpush1.bf16.msra.mxu0 %v2502_v12  ;;  %1538 = vmatpush1.bf16.msra.mxu1 %v2505_v13 }
  0x7c   :  { %1375 = vmatprep.subr.bf16.mxu0 %v2510_v14  ;;  %1539 = vmatprep.subr.bf16.mxu1 %v2513_v15 }
  0x7f   :  { %1376 = vmatpush1.bf16.msra.mxu0 %v2508_v17  ;;  %1540 = vmatpush1.bf16.msra.mxu1 %v2511_v20 }
  0x80   :  { %1386 = vmatprep.subr.bf16.mxu0 %v2516_v21  ;;  %1550 = vmatprep.subr.bf16.mxu1 %v2519_v22 }
  0x82   :  { %1378 = vmatmul.mubr.bf16.vlgmr.msra.gmra.mrb[0].mxu0 %v291_v24  ;;  %1542 = vmatmul.mubr.bf16.vlgmr.msra.gmra.mrb[0].mxu1 %v291_v24 }
  0x83   :  { %1387 = vmatpush1.bf16.msra.mxu0 %v2514_v23  ;;  %1551 = vmatpush1.bf16.msra.mxu1 %v2517_v25 }
  0x84   :  { %1388 = vmatprep.subr.bf16.mxu0 %v2522_v26  ;;  %1552 = vmatprep.subr.bf16.mxu1 %v2525_v27 }
  0x85   :  { %1418 = vmatprep.mubr.bf16.mxu0 %v2928_v18  ;;  %1582 = vmatprep.mubr.bf16.mxu1 %v2928_v18  ;;  %v2532_v18 = vld [vmem:[%s3457_s1 + $0x460] ss:$16 sps:$4 sm:$0xff]  }
  0x87   :  { %1389 = vmatpush1.bf16.msra.mxu0 %v2520_v16  ;;  %1553 = vmatpush1.bf16.msra.mxu1 %v2523_v28 }
  0x88   :  { %1390 = vmatprep.subr.bf16.mxu0 %v2528_v29  ;;  %1554 = vmatprep.subr.bf16.mxu1 %v2531_v30 }
  0x8b   :  { %1391 = vmatpush1.bf16.msra.mxu0 %v2526_v31  ;;  %1555 = vmatpush1.bf16.msra.mxu1 %v2529_v32 }
  0x8c   :  { %1392 = vmatprep.subr.bf16.mxu0 %v2534_v33  ;;  %1556 = vmatprep.subr.bf16.mxu1 %v2537_v34 }
  0x8f   :  { %1393 = vmatpush1.bf16.msra.mxu0 %v2532_v18  ;;  %1557 = vmatpush1.bf16.msra.mxu1 %v2535_v35 }
  0x90   :  { %1394 = vmatprep.subr.bf16.mxu0 %v2540_v36  ;;  %1558 = vmatprep.subr.bf16.mxu1 %v2543_v37 }
  0x93   :  { %1395 = vmatpush1.bf16.msra.mxu0 %v2538_v38  ;;  %1559 = vmatpush1.bf16.msra.mxu1 %v2541_v39 }
  0x94   :  { %1396 = vmatprep.subr.bf16.mxu0 %v2546_v40  ;;  %1560 = vmatprep.subr.bf16.mxu1 %v2549_v41 }
  0x97   :  { %1397 = vmatpush1.bf16.msra.mxu0 %v2544_v43  ;;  %1561 = vmatpush1.bf16.msra.mxu1 %v2547_v44 }
  0x98   :  { %1398 = vmatprep.subr.bf16.mxu0 %v2552_v45  ;;  %1562 = vmatprep.subr.bf16.mxu1 %v2555_v46 }
  0x9b   :  { %1399 = vmatpush1.bf16.msra.mxu0 %v2550_v47  ;;  %1563 = vmatpush1.bf16.msra.mxu1 %v2553_v48 }
  0x9c   :  { %1400 = vmatprep.subr.bf16.mxu0 %v2558_v49  ;;  %1564 = vmatprep.subr.bf16.mxu1 %v2561_v50 }
  0x9f   :  { %1401 = vmatpush1.bf16.msra.mxu0 %v2556_v51  ;;  %1565 = vmatpush1.bf16.msra.mxu1 %v2559_v52 }
  0xa0   :  { %1402 = vmatprep.subr.bf16.mxu0 %v2564_v53  ;;  %1566 = vmatprep.subr.bf16.mxu1 %v2567_v54 }
  0xa1   :  { %10 = vsyncpa [#allocation3], 0  ;;  %v2568_v59 = vld [vmem:[%s3457_s1 + $0x520] ss:$16 sps:$4 sm:$0xff]   ;;  %v2571_v60 = vld [vmem:[%s3457_s1 + $0x528] ss:$16 sps:$4 sm:$0xff]   ;;  %v292_v34 = vcombine.high %v2930_v19, %v2930_v19 }
  0xa2   :  { %v2576_v61 = vld [vmem:[%s3457_s1 + $0x544] ss:$16 sps:$4 sm:$0xff]   ;;  %v2579_v62 = vld [vmem:[%s3457_s1 + $0x54c] ss:$16 sps:$4 sm:$0xff]   ;;  %v2574_v63 = vld [vmem:[%s3457_s1 + $0x540] ss:$16 sps:$4 sm:$0xff]  }
  0xa3   :  { %1403 = vmatpush1.bf16.msra.mxu0 %v2562_v55  ;;  %1567 = vmatpush1.bf16.msra.mxu1 %v2565_v56  ;;  %v2577_v0 = vld [vmem:[%s3457_s1 + $0x548] ss:$16 sps:$4 sm:$0xff]   ;;  %v2582_v1 = vld [vmem:[%s3457_s1 + $0x564] ss:$16 sps:$4 sm:$0xff]   ;;  %v2585_v2 = vld [vmem:[%s3457_s1 + $0x56c] ss:$16 sps:$4 sm:$0xff]  }
  0xa4   :  { %1404 = vmatprep.subr.bf16.mxu0 %v2570_v57  ;;  %1568 = vmatprep.subr.bf16.mxu1 %v2573_v58  ;;  %v2580_v3 = vld [vmem:[%s3457_s1 + $0x560] ss:$16 sps:$4 sm:$0xff]   ;;  %v2583_v4 = vld [vmem:[%s3457_s1 + $0x568] ss:$16 sps:$4 sm:$0xff]   ;;  %v2588_v5 = vld [vmem:[%s3457_s1 + $0x584] ss:$16 sps:$4 sm:$0xff]  }
  0xa5   :  { %v2591_v6 = vld [vmem:[%s3457_s1 + $0x58c] ss:$16 sps:$4 sm:$0xff]   ;;  %v2586_v7 = vld [vmem:[%s3457_s1 + $0x580] ss:$16 sps:$4 sm:$0xff]   ;;  %v2589_v8 = vld [vmem:[%s3457_s1 + $0x588] ss:$16 sps:$4 sm:$0xff]  }
  0xa6   :  { %v2594_v9 = vld [vmem:[%s3457_s1 + $0x5a4] ss:$16 sps:$4 sm:$0xff]   ;;  %v2597_v10 = vld [vmem:[%s3457_s1 + $0x5ac] ss:$16 sps:$4 sm:$0xff]   ;;  %v2592_v11 = vld [vmem:[%s3457_s1 + $0x5a0] ss:$16 sps:$4 sm:$0xff]  }
  0xa7   :  { %1405 = vmatpush1.bf16.msra.mxu0 %v2568_v59  ;;  %1569 = vmatpush1.bf16.msra.mxu1 %v2571_v60  ;;  %v2595_v12 = vld [vmem:[%s3457_s1 + $0x5a8] ss:$16 sps:$4 sm:$0xff]   ;;  %v2600_v13 = vld [vmem:[%s3457_s1 + $0x5c4] ss:$16 sps:$4 sm:$0xff]   ;;  %v2603_v14 = vld [vmem:[%s3457_s1 + $0x5cc] ss:$16 sps:$4 sm:$0xff]  }
  0xa8   :  { %1406 = vmatprep.subr.bf16.mxu0 %v2576_v61  ;;  %1570 = vmatprep.subr.bf16.mxu1 %v2579_v62  ;;  %v2598_v15 = vld [vmem:[%s3457_s1 + $0x5c0] ss:$16 sps:$4 sm:$0xff]   ;;  %v2601_v17 = vld [vmem:[%s3457_s1 + $0x5c8] ss:$16 sps:$4 sm:$0xff]   ;;  %v2606_v20 = vld [vmem:[%s3457_s1 + $0x5e4] ss:$16 sps:$4 sm:$0xff]  }
  0xa9   :  { %v2609_v21 = vld [vmem:[%s3457_s1 + $0x5ec] ss:$16 sps:$4 sm:$0xff]   ;;  %v2604_v22 = vld [vmem:[%s3457_s1 + $0x5e0] ss:$16 sps:$4 sm:$0xff]   ;;  %v2607_v23 = vld [vmem:[%s3457_s1 + $0x5e8] ss:$16 sps:$4 sm:$0xff]  }
  0xaa   :  { %v2613_v24 = vld [vmem:[%s3457_s1 + $0x604] ss:$16 sps:$4 sm:$0xff]   ;;  %v2616_v25 = vld [vmem:[%s3457_s1 + $0x60c] ss:$16 sps:$4 sm:$0xff]   ;;  %v2611_v26 = vld [vmem:[%s3457_s1 + $0x600] ss:$16 sps:$4 sm:$0xff]  }
  0xab   :  { %1407 = vmatpush1.bf16.msra.mxu0 %v2574_v63  ;;  %1571 = vmatpush1.bf16.msra.mxu1 %v2577_v0  ;;  %v2614_v27 = vld [vmem:[%s3457_s1 + $0x608] ss:$16 sps:$4 sm:$0xff]   ;;  %v2619_v16 = vld [vmem:[%s3457_s1 + $0x624] ss:$16 sps:$4 sm:$0xff]   ;;  %v2622_v28 = vld [vmem:[%s3457_s1 + $0x62c] ss:$16 sps:$4 sm:$0xff]  }
  0xac   :  { %1408 = vmatprep.subr.bf16.mxu0 %v2582_v1  ;;  %1572 = vmatprep.subr.bf16.mxu1 %v2585_v2  ;;  %v2617_v29 = vld [vmem:[%s3457_s1 + $0x620] ss:$16 sps:$4 sm:$0xff]   ;;  %v2620_v30 = vld [vmem:[%s3457_s1 + $0x628] ss:$16 sps:$4 sm:$0xff]   ;;  %v2684_v33 = vmov 0   ;;  %vm1300_vm0 = vcmask 261120  }
  0xad   :  { %v2623_v31 = vld [vmem:[%s3459_s3 + $0x40] sm:$0xff]   ;;  %v2627_v36 = vld [vmem:[%s3459_s3 + $0x48] sm:$0xff]   ;;  %v2631_v39 = vld [vmem:[%s3459_s3 + $0x50] sm:$0xff]   ;;  %v227_v0 = vsub.s32 0, %v2833_v42  ;;  %v235_v1 = vsub.s32 2, %v2833_v42  ;;  %vm1983_vm1 = vcmask 1041408  }
  0xae   :  { %v2624_v32 = vld [vmem:[%s3459_s3 + $0xc0] sm:$0xff]   ;;  %v2628_v37 = vld [vmem:[%s3459_s3 + $0xc8] sm:$0xff]   ;;  %v2632_v40 = vld [vmem:[%s3459_s3 + $0xd0] sm:$0xff]   ;;  %vm1996_vm2 = vcmask 74752  }
  0xaf   :  { %1409 = vmatpush1.bf16.msra.mxu0 %v2580_v3  ;;  %1573 = vmatpush1.bf16.msra.mxu1 %v2583_v4  ;;  %v2625_v18 = vld [vmem:[%s3459_s3] sm:$0xff]   ;;  %v2630_v38 = vld [vmem:[%s3459_s3 + $0x88] sm:$0xff]   ;;  %v2633_v41 = vld [vmem:[%s3459_s3 + $0x10] sm:$0xff]   ;;  %v231_v3 = vsub.s32 1, %v2833_v42  ;;  %v239_v4 = vsub.s32 3, %v2833_v42 }
  0xb0   :  { %1410 = vmatprep.subr.bf16.mxu0 %v2588_v5  ;;  %1574 = vmatprep.subr.bf16.mxu1 %v2591_v6  ;;  %v2626_v35 = vld [vmem:[%s3459_s3 + $0x80] sm:$0xff]   ;;  %v2634_v43 = vld [vmem:[%s3459_s3 + $0x90] sm:$0xff]   ;;  %v2635_v44 = vld [vmem:[%s3459_s3 + $0x58] sm:$0xff]  }
  0xb1   :  { %v2636_v45 = vld [vmem:[%s3459_s3 + $0xd8] sm:$0xff]   ;;  %v2639_v48 = vld [vmem:[%s3459_s3 + $0x60] sm:$0xff]   ;;  %v2643_v52 = vld [vmem:[%s3459_s3 + $0x68] sm:$0xff]  }
  0xb2   :  { %v2637_v46 = vld [vmem:[%s3459_s3 + $0x18] sm:$0xff]   ;;  %v2640_v49 = vld [vmem:[%s3459_s3 + $0xe0] sm:$0xff]   ;;  %v2644_v53 = vld [vmem:[%s3459_s3 + $0xe8] sm:$0xff]  }
  0xb3   :  { %1411 = vmatpush1.bf16.msra.mxu0 %v2586_v7  ;;  %1575 = vmatpush1.bf16.msra.mxu1 %v2589_v8  ;;  %v2638_v47 = vld [vmem:[%s3459_s3 + $0x98] sm:$0xff]   ;;  %v2641_v50 = vld [vmem:[%s3459_s3 + $0x20] sm:$0xff]   ;;  %v2645_v54 = vld [vmem:[%s3459_s3 + $0x28] sm:$0xff]  }
  0xb4   :  { %1412 = vmatprep.subr.bf16.mxu0 %v2594_v9  ;;  %1576 = vmatprep.subr.bf16.mxu1 %v2597_v10  ;;  %v2642_v51 = vld [vmem:[%s3459_s3 + $0xa0] sm:$0xff]   ;;  %v2646_v55 = vld [vmem:[%s3459_s3 + $0xa8] sm:$0xff]   ;;  %v2647_v56 = vld [vmem:[%s3459_s3 + $0x70] sm:$0xff]  }
  0xb5   :  { %v2648_v57 = vld [vmem:[%s3459_s3 + $0xf0] sm:$0xff]   ;;  %v2651_v60 = vld [vmem:[%s3459_s3 + $0x78] sm:$0xff]   ;;  %v223_v2 = vld [vmem:[%s3458_s2] sm:$0xf] }
  0xb6   :  { %v2649_v58 = vld [vmem:[%s3459_s3 + $0x30] sm:$0xff]   ;;  %v2652_v61 = vld [vmem:[%s3459_s3 + $0xf8] sm:$0xff]   ;;  %v228_v5 = vrot.slane %v223_v2, %v227_v0  ;;  %v236_v6 = vrot.slane %v223_v2, %v235_v1  ;;  %v232_v7 = vrot.slane %v223_v2, %v231_v3  ;;  %v240_v8 = vrot.slane %v223_v2, %v239_v4 }
  0xb7   :  { %1413 = vmatpush1.bf16.msra.mxu0 %v2592_v11  ;;  %1577 = vmatpush1.bf16.msra.mxu1 %v2595_v12  ;;  %v2650_v59 = vld [vmem:[%s3459_s3 + $0xb0] sm:$0xff]   ;;  %v2653_v62 = vld [vmem:[%s3459_s3 + $0x38] sm:$0xff]  }
  0xb8   :  { %1414 = vmatprep.subr.bf16.mxu0 %v2600_v13  ;;  %1578 = vmatprep.subr.bf16.mxu1 %v2603_v14  ;;  %v2654_v63 = vld [vmem:[%s3459_s3 + $0xb8] sm:$0xff]  }
  0xbb   :  { %1415 = vmatpush1.bf16.msra.mxu0 %v2598_v15  ;;  %1579 = vmatpush1.bf16.msra.mxu1 %v2601_v17 }
  0xbc   :  { %1416 = vmatprep.subr.bf16.mxu0 %v2606_v20  ;;  %1580 = vmatprep.subr.bf16.mxu1 %v2609_v21 }
  0xbf   :  { %1417 = vmatpush1.bf16.msra.mxu0 %v2604_v22  ;;  %1581 = vmatpush1.bf16.msra.mxu1 %v2607_v23 }
  0xc0   :  { %1427 = vmatprep.subr.bf16.mxu0 %v2613_v24  ;;  %1591 = vmatprep.subr.bf16.mxu1 %v2616_v25 }
  0xc2   :  { %1419 = vmatmul.mubr.bf16.vlgmr.msra.gmra.mrb[0].mxu0 %v2930_v19  ;;  %1583 = vmatmul.mubr.bf16.vlgmr.msra.gmra.mrb[0].mxu1 %v2930_v19  ;;  %v2629_v19 = vld [vmem:[%s3459_s3 + $0x8] sm:$0xff]  }
  0xc3   :  { %1428 = vmatpush1.bf16.msra.mxu0 %v2611_v26  ;;  %1592 = vmatpush1.bf16.msra.mxu1 %v2614_v27 }
  0xc4   :  { %1429 = vmatprep.subr.bf16.mxu0 %v2619_v16  ;;  %1593 = vmatprep.subr.bf16.mxu1 %v2622_v28 }
  0xc5   :  { %1459 = vmatprep.mubr.bf16.mxu0 %v2684_v33  ;;  %1623 = vmatprep.mubr.bf16.mxu1 %v2684_v33 }
  0xc7   :  { %1430 = vmatpush1.bf16.msra.mxu0 %v2617_v29  ;;  %1594 = vmatpush1.bf16.msra.mxu1 %v2620_v30 }
  0xc8   :  { %2247 = vmatprep.subr.bf16.mxu0 %v2623_v31  ;;  %2269 = vmatprep.subr.bf16.mxu1 %v2624_v32  ;;  %v2214_v32 = vld [vmem:[%s3460_s4] ss:$0 sm:$0xff]  ;;  %s2685_s4 = smov [#allocation2]  }
  0xc9   :  { %s2004_s19 = sshll.u32 %s2685_s4, 4  ;;  %s2005_s19 = int_to_ptr.vmem [resolvable:$true] %s2004_s19 }
  0xca   :  { %s2659_s0 = scalar_lea.vmem %s2005_s19, 32  ;;  %p2664_p1 = scmp.lt.s32.totalorder %s2005_s19, %s2005_s19 }
  0xcb   :  { %p2660_p0 = scmp.ne.s32.totalorder %s2005_s19, %s2659_s0  ;;  %p2665_p2 = scmp.lt.s32.totalorder %s2659_s0, %s2659_s0 }
  0xcd   :  { %p2666_p3 = por %p2665_p2, %p2664_p1 }
  0xce   :  { %2212 = vmatmul.mubr.msk.bf16.vlgmr.msra.gmra.mrb[0].mxu0 %vm1300_vm0, %v292_v34  ;;  %2213 = vmatmul.mubr.msk.bf16.vlgmr.msra.gmra.mrb[0].mxu1 %vm1300_vm0, %v292_v34 }
  0xcf   :  { %2248 = vmatpush3.bf16.msra.mxu0 %v2625_v18  ;;  %2270 = vmatpush3.bf16.msra.mxu1 %v2626_v35  ;;  %p2667_p4 = pnand %p2666_p3, %p2660_p0 }
  0xd0   :  { %2249 = vmatprep.subr.bf16.mxu0 %v2627_v36  ;;  %2271 = vmatprep.subr.bf16.mxu1 %v2628_v37 }
  0xd3   :  { %2250 = vmatpush3.bf16.msra.mxu0 %v2629_v19  ;;  %2272 = vmatpush3.bf16.msra.mxu1 %v2630_v38 }
  0xd4   :  { %2251 = vmatprep.subr.bf16.mxu0 %v2631_v39  ;;  %2273 = vmatprep.subr.bf16.mxu1 %v2632_v40 }
  0xd7   :  { %2252 = vmatpush3.bf16.msra.mxu0 %v2633_v41  ;;  %2274 = vmatpush3.bf16.msra.mxu1 %v2634_v43 }
  0xd8   :  { %2253 = vmatprep.subr.bf16.mxu0 %v2635_v44  ;;  %2275 = vmatprep.subr.bf16.mxu1 %v2636_v45 }
  0xdb   :  { %2254 = vmatpush3.bf16.msra.mxu0 %v2637_v46  ;;  %2276 = vmatpush3.bf16.msra.mxu1 %v2638_v47 }
  0xdc   :  { %2255 = vmatprep.subr.bf16.mxu0 %v2639_v48  ;;  %2277 = vmatprep.subr.bf16.mxu1 %v2640_v49 }
  0xdf   :  { %2256 = vmatpush3.bf16.msra.mxu0 %v2641_v50  ;;  %2278 = vmatpush3.bf16.msra.mxu1 %v2642_v51 }
  0xe0   :  { %2257 = vmatprep.subr.bf16.mxu0 %v2643_v52  ;;  %2279 = vmatprep.subr.bf16.mxu1 %v2644_v53 }
  0xe3   :  { %2258 = vmatpush3.bf16.msra.mxu0 %v2645_v54  ;;  %2280 = vmatpush3.bf16.msra.mxu1 %v2646_v55 }
  0xe4   :  { %2259 = vmatprep.subr.bf16.mxu0 %v2647_v56  ;;  %2281 = vmatprep.subr.bf16.mxu1 %v2648_v57 }
  0xe7   :  { %2260 = vmatpush3.bf16.msra.mxu0 %v2649_v58  ;;  %2282 = vmatpush3.bf16.msra.mxu1 %v2650_v59 }
  0xe8   :  { %2261 = vmatprep.subr.bf16.mxu0 %v2651_v60  ;;  %2283 = vmatprep.subr.bf16.mxu1 %v2652_v61 }
  0xeb   :  { %2262 = vmatpush3.bf16.msra.mxu0 %v2653_v62  ;;  %2284 = vmatpush3.bf16.msra.mxu1 %v2654_v63 }
 0x1a1   :  { %v1461_v9 = vpop.f32.mrb[0].mxu0  ;;  %v1625_v10 = vpop.f32.mrb[0].mxu1 }
 0x1a2   :  { %v2291_v11 = vadd.f32 %v1461_v9, %v228_v5  ;;  %v2293_v12 = vadd.f32 %v1625_v10, %v236_v6  ;;  %v1463_v13 = vpop.f32.mrb[1].mxu0  ;;  %v1627_v14 = vpop.f32.mrb[1].mxu1 }
 0x1a3   :  { %v2292_v15 = vadd.f32 %v1463_v13, %v232_v7  ;;  %v2294_v17 = vadd.f32 %v1627_v14, %v240_v8  ;;  %v1465_v20 = vpop.f32.mrb[2].mxu0  ;;  %v1629_v21 = vpop.f32.mrb[2].mxu1 }
 0x1a4   :  { %v1632_v22 = vmax.f32 %v2291_v11, 0.0  ;;  %v1634_v23 = vmax.f32 %v2293_v12, 0.0  ;;  %v1466_v24 = vpop.f32.mrb[3].mxu0  ;;  %v1630_v25 = vpop.f32.mrb[3].mxu1 }
 0x1a5   :  { %v1633_v26 = vmax.f32 %v2292_v15, 0.0  ;;  %v1635_v42 = vmax.f32 %v2294_v17, 0.0 }
 0x1a6   :  { %v1636_v28 = vpack.c.bf16 %v1632_v22, %v1632_v22  ;;  %v1638_v29 = vpack.c.bf16 %v1634_v23, %v1634_v23 }
 0x1a7   :  { %v1637_v27 = vpack.c.bf16 %v1633_v26, %v1633_v26  ;;  %v1639_v16 = vpack.c.bf16 %v1635_v42, %v1635_v42 }
 0x1a9   :  { %1935 = vmatprep.mubr.bf16.mxu0 %v1637_v27  ;;  %1975 = vmatprep.mubr.bf16.mxu1 %v1639_v16 }
 0x1aa   :  { %1936 = vmatmul.mubr.bf16.vlgmr.msra.gmra.mrb[4].mxu0 %v1636_v28  ;;  %1976 = vmatmul.mubr.bf16.vlgmr.msra.gmra.mrb[4].mxu1 %v1638_v29 }
 0x27d   :  { %v2263_v30 = vpop.f32.mrb[4].mxu0  ;;  %v2285_v31 = vpop.f32.mrb[4].mxu1 }
 0x27e   :  { %v2264_v33 = vpop.f32.mrb[5].mxu0  ;;  %v2286_v34 = vpop.f32.mrb[5].mxu1 }
 0x27f   :  { %v2265_v18 = vadd.f32 %v2264_v33, %v2263_v30  ;;  %v2287_v35 = vadd.f32 %v2286_v34, %v2285_v31  ;;  %v2266_v36 = vpop.f32.mrb[6].mxu0  ;;  %v2288_v37 = vpop.f32.mrb[6].mxu1 }
 0x280   :  { %v2267_v19 = vpop.f32.mrb[7].mxu0  ;;  %v2289_v38 = vpop.f32.mrb[7].mxu1 }
 0x281   :  { %v1938_v39 = vadd.f32 %v2265_v18, %v2214_v32 }
 0x283   :  { %v1978_v40 = vadd.f32 %v2287_v35, %v1938_v39 }
 0x285   :  { %v1984_v41 = vsel %vm1983_vm1, %v1978_v40, -inf }
 0x286   :  { %1985 = vmax.xlane.f32.xlu0 %v1984_v41 }
 0x313   :  { %v1986_v43 = vpop.xlane.xlu0 %1985 }
 0x314   :  { %v1987_v44 = vsub.f32 %v1978_v40, %v1986_v43 }
 0x316   :  { %v1988_v45 = vmul.f32 1.442695, %v1987_v44 }
 0x318   :  { %2655 = vpow2.f32 %v1988_v45 }
 0x322   :  { %v2656_v46 = vpop.eup %2655 }
 0x323   :  { %v1990_v47 = vsel %vm1983_vm1, %v2656_v46, 0.0 }
 0x324   :  { %1991 = vadd.xlane.f32.xlu0 %v1990_v47 }
 0x3b1   :  { %v1992_v48 = vpop.xlane.xlu0 %1991 }
 0x3b2   :  { %2657 = vlog2.f32 %v1992_v48 }
 0x3bc   :  { %v2658_v49 = vpop.eup %2657 }
 0x3bd   :  { %v1994_v50 = vmul.f32 0.6931472, %v2658_v49 }
 0x3bf   :  { %v1995_v51 = vsub.f32 %v1987_v44, %v1994_v50 }
 0x3c1   :  { %1997 = vst.msk [vmem:[#allocation2] sm:$0x3] %vm1996_vm2, %v1995_v51 }
 0x3c2   :  { %2670 = shalt.err (!%p2667_p4)
}
 0x3c3   :  { %s2671_s22 = scalar_lea.hbm %s3461_s5, 32 }
 0x3c4   :  { %p2672_p5 = scmp.ne.s32.totalorder %s3461_s5, %s2671_s22  ;;  %p2675_p6 = scmp.lt.u32.totalorder %s2671_s22, %s3461_s5 }
 0x3c6   :  { %p2677_p7 = pnand %p2675_p6, %p2672_p5 }
 0x3c8   :  { %2680 = shalt.err (!%p2677_p7)
}
 0x3c9   :  { %2007 = dma.vmem_to_hbm [thread:$0]  %s2005_s19, 32, %s3461_s5, [#allocation3]  }
 0x3ca   :  { %2681 = dma.done.wait [#allocation3], 32  }
 0x3cb   :  { %2682 = vsyncadd [#allocation3], 4294967264 }
 0x3cc   :  { %2011 = vsyncpa [#allocation3], 1 }

</bundles_post_ra>
